<compile_context>
chip_gen: v7x
topology: tpu7x:2x2x1
jax: 0.10.0
libtpu: 0.0.40
codegen_flags: <defaults>
</compile_context>

<pallas_src>
import jax
import jax.numpy as jnp
from jax import lax
from jax.experimental import pallas as pl
from jax.experimental.pallas import tpu as pltpu


def _make_conv3x3x3_mish_kernel(tap_offsets, nb, cin_p, cout, lp):
    """One grid step: nb batch elements, fused-tap conv + bias + Mish."""
    ktot = len(tap_offsets) * cin_p

    def kernel(x_ref, w_ref, b_ref, o_ref, col_ref, acc_ref):
        # x_ref:   (nb, cin_p, lp)    flattened zero-padded volumes (storage dtype)
        # w_ref:   (cout, ktot)       lane-dense packed weights, column k = t*cin_p + ci
        # b_ref:   (nb*cout, 1)       bias (f32), tiled nb times
        # o_ref:   (1, nb*cout, lp)   output in padded-flat coordinates (interior valid)
        # col_ref: (ktot, lp)         VMEM im2col scratch (storage dtype)
        # acc_ref: (nb*cout, lp)      f32 accumulator
        w = w_ref[...]                                   # hoisted single weight read
        for b in range(nb):
            x = x_ref[b]                                 # (cin_p, lp); one VMEM read
            for t, off in enumerate(tap_offsets):
                # shifted[:, j] == x[:, j + off] for every interior output position;
                # wrap-around only lands on halo/tail lanes the wrapper discards.
                col_ref[t * cin_p:(t + 1) * cin_p, :] = (
                    x if off == 0 else pltpu.roll(x, (-off) % lp, 1))
            # Single fused MXU call per batch element: K = 27*cin_p.
            acc_ref[b * cout:(b + 1) * cout, :] = jnp.dot(
                w, col_ref[...], preferred_element_type=jnp.float32)

        acc = acc_ref[...] + b_ref[...]                  # (nb*cout, lp) f32

        # Mish(x) = x * tanh(softplus(x)); tanh(softplus(x)) = t/(t+2), t = e*(e+2),
        # e = exp(min(x, 20)) (PyTorch softplus threshold).  One exp + one approx recip.
        e = jnp.exp(jnp.minimum(acc, 20.0))
        t2 = e * (e + 2.0)
        y = acc * (t2 * pl.reciprocal(t2 + 2.0, approx=True))
        o_ref[...] = y[None].astype(o_ref.dtype)

    return kernel


def my_bottleneck_forward(x_ncdhw, weight, bias, compute_dtype=None):
    """x_ncdhw: (N, Cin, D, H, W); weight: (Cout, Cin, 3, 3, 3); bias: (Cout,).

    compute_dtype: storage/MXU dtype for x and weights (e.g. jnp.bfloat16); accumulation,
    bias and the Mish epilogue are always f32; output keeps x_ncdhw.dtype.
    """
    N, Cin, D, H, W = x_ncdhw.shape
    Cout = weight.shape[0]
    assert weight.shape == (Cout, Cin, 3, 3, 3) and bias.shape == (Cout,)

    cdt = jnp.dtype(compute_dtype) if compute_dtype is not None else jnp.dtype(x_ncdhw.dtype)

    Dp, Hp, Wp = D + 2, H + 2, W + 2
    Lflat = Dp * Hp * Wp
    Lp = pl.cdiv(Lflat, 128) * 128              # lane-dense flat length (multiple of 128)
    c_align = 8 if cdt.itemsize >= 4 else 16    # keep im2col slabs native-tile aligned
    Cin_p = pl.cdiv(Cin, c_align) * c_align
    Ktot = 27 * Cin_p

    # Batch elements per grid step so the output block fills whole sublanes.
    nb = 1
    while (nb * Cout) % 8 != 0:
        nb += 1
    N_pad = pl.cdiv(N, nb) * nb
    G = N_pad // nb

    # Flat offset of tap (kd, kh, kw) relative to the output voxel (padded coords).
    tap_offsets = tuple(
        (kd - 1) * Hp * Wp + (kh - 1) * Wp + (kw - 1)
        for kd in range(3) for kh in range(3) for kw in range(3))
    # Roll-safety invariant (valid ONLY for k=3, stride=1, dilation=1, halo=1): every
    # retained interior output index j satisfies max_off <= j <= Lflat-1-max_off, so
    # j+off never wraps for any tap.
    max_off = Hp * Wp + Wp + 1
    assert max(abs(o) for o in tap_offsets) == max_off and Lp >= Lflat

    # Zero 'same' padding (k=3, s=1) + channel/batch padding; layout stays NCDHW.
    # TODO(synk): fold this pad/flatten (and the post-kernel slice) into the kernel via an
    # ANY-space input to avoid one extra HBM round trip of the tensor.
    x = x_ncdhw.astype(cdt)
    x_pad = jnp.pad(x, ((0, N_pad - N), (0, Cin_p - Cin), (1, 1), (1, 1), (1, 1)))
    x_flat = x_pad.reshape(N_pad, Cin_p, Lflat)
    x_flat = jnp.pad(x_flat, ((0, 0), (0, 0), (0, Lp - Lflat)))

    # Lane-dense packed weights: column k = t*Cin_p + ci; padded channels contribute zero.
    w_packed = jnp.transpose(weight, (0, 2, 3, 4, 1)).reshape(Cout, 27, Cin)
    w_packed = jnp.pad(w_packed, ((0, 0), (0, 0), (0, Cin_p - Cin)))
    w_packed = w_packed.reshape(Cout, Ktot).astype(cdt)
    b_col = jnp.tile(bias.astype(jnp.float32), nb).reshape(nb * Cout, 1)

    out_flat = pl.pallas_call(
        _make_conv3x3x3_mish_kernel(tap_offsets, nb, Cin_p, Cout, Lp),
        out_shape=jax.ShapeDtypeStruct((G, nb * Cout, Lp), x_ncdhw.dtype),
        grid_spec=pltpu.PrefetchScalarGridSpec(
            num_scalar_prefetch=0,
            grid=(G,),
            in_specs=[
                pl.BlockSpec((nb, Cin_p, Lp), lambda g: (g, 0, 0)),
                pl.BlockSpec((Cout, Ktot), lambda g: (0, 0)),       # VMEM-resident
                pl.BlockSpec((nb * Cout, 1), lambda g: (0, 0)),
            ],
            out_specs=pl.BlockSpec((1, nb * Cout, Lp), lambda g: (g, 0, 0)),
            scratch_shapes=[
                pltpu.VMEM((Ktot, Lp), cdt),               # im2col scratch
                pltpu.VMEM((nb * Cout, Lp), jnp.float32),  # f32 accumulator
            ],
        ),
        compiler_params=pltpu.CompilerParams(
            dimension_semantics=("parallel",)),
    )(x_flat, w_packed, b_col)

    # (G, nb*Cout, Lp) -> (N, Cout, D, H, W): drop batch padding, alignment tail and halo.
    out = out_flat.reshape(N_pad, Cout, Lp)[:N, :, :Lflat]
    out = out.reshape(N, Cout, Dp, Hp, Wp)
    return out[:, :, 1:-1, 1:-1, 1:-1]


def _reference_forward(x, weight, bias):
    """Pure-JAX reference (XLA conv + exact Mish) for validation."""
    y = lax.conv_general_dilated(
        x, weight, window_strides=(1, 1, 1),
        padding=((1, 1), (1, 1), (1, 1)),
        dimension_numbers=("NCDHW", "OIDHW", "NCDHW"))
    y = y + bias[None, :, None, None, None]
    sp = jnp.where(y > 20.0, y, jnp.log1p(jnp.exp(jnp.minimum(y, 20.0))))
    return y * jnp.tanh(sp)


if __name__ == "__main__":
    key = jax.random.PRNGKey(0)
    k_x, k_w, k_b = jax.random.split(key, 3)

    # Small shapes consistent with a 5-D Conv3d input; MyBottleneck(channels=4).
    N, Cin, D, H, W = 4, 4, 8, 8, 8
    Cout = 4

    x = jax.random.normal(k_x, (N, Cin, D, H, W), dtype=jnp.float32)

    # Deterministic, PyTorch-like kaiming-uniform init for Conv3d.
    fan_in = Cin * 3 * 3 * 3
    bound = 1.0 / (fan_in ** 0.5)
    weight = jax.random.uniform(k_w, (Cout, Cin, 3, 3, 3), jnp.float32,
                                minval=-bound, maxval=bound)
    bias = jax.random.uniform(k_b, (Cout,), jnp.float32,
                              minval=-bound, maxval=bound)

    ref = _reference_forward(x, weight, bias)

    # f32 storage path.
    out = jax.block_until_ready(jax.jit(my_bottleneck_forward)(x, weight, bias))
    assert out.shape == (N, Cout, D, H, W)
    err = float(jnp.max(jnp.abs(out - ref)))
    if err > 1e-2:   # slack covers the approx-reciprocal Mish epilogue
        raise AssertionError(f"f32 Pallas kernel mismatch vs reference: {err}")

    # bf16 storage path (halved HBM read bytes / x VMEM block; f32 accumulate + f32 Mish).
    fwd_bf16 = jax.jit(
        lambda a, w, b: my_bottleneck_forward(a, w, b, compute_dtype=jnp.bfloat16))
    out_bf16 = jax.block_until_ready(fwd_bf16(x, weight, bias))
    err_bf16 = float(jnp.max(jnp.abs(out_bf16 - ref)))
    if err_bf16 > 5e-2:
        raise AssertionError(f"bf16 Pallas kernel mismatch vs reference: {err_bf16}")

    print("KERNEL_OK")
</pallas_src>

<mosaic_0001>
module attributes {stable_mosaic.version = 11 : i64} {
  func.func @kernel(%arg0: i32, %arg1: memref<2x8x1024xf32, #tpu.memory_space<vmem>>, %arg2: memref<4x216xf32, #tpu.memory_space<vmem>>, %arg3: memref<8x1xf32, #tpu.memory_space<vmem>>, %arg4: memref<1x8x1024xf32, #tpu.memory_space<vmem>>, %arg5: memref<216x1024xf32, #tpu.memory_space<vmem>>, %arg6: memref<8x1024xf32, #tpu.memory_space<vmem>>) attributes {dimension_semantics = [#tpu.dimension_semantics<parallel>], iteration_bounds = array<i64: 2>, scalar_prefetch = 0 : i64, scratch_operands = 2 : i64, tpu.core_type = #tpu.core_type<tc>, window_params = [{transform_indices = @transform_0, window_bounds = array<i64: 2, 8, 1024>}, {pipeline_mode = #tpu.pipeline_mode<synchronous>, transform_indices = @transform_1, window_bounds = array<i64: 4, 216>}, {pipeline_mode = #tpu.pipeline_mode<synchronous>, transform_indices = @transform_2, window_bounds = array<i64: 8, 1>}, {transform_indices = @transform_3, window_bounds = array<i64: 1, 8, 1024>}]} {
    %c0 = arith.constant 0 : index
    %c0_0 = arith.constant 0 : index
    %0 = vector.load %arg2[%c0, %c0_0] : memref<4x216xf32, #tpu.memory_space<vmem>>, vector<4x216xf32>
    %c0_1 = arith.constant 0 : index
    %c0_2 = arith.constant 0 : index
    %c0_3 = arith.constant 0 : index
    %1 = vector.load %arg1[%c0_1, %c0_2, %c0_3] : memref<2x8x1024xf32, #tpu.memory_space<vmem>>, vector<1x8x1024xf32>
    %2 = vector.shape_cast %1 : vector<1x8x1024xf32> to vector<8x1024xf32>
    %c111_i32 = arith.constant 111 : i32
    %3 = tpu.dynamic_rotate %2 by %c111_i32 dim 1 : vector<8x1024xf32>, i32 -> vector<8x1024xf32>
    %c0_4 = arith.constant 0 : index
    %c0_5 = arith.constant 0 : index
    %4 = vector.load %arg5[%c0_4, %c0_5] : memref<216x1024xf32, #tpu.memory_space<vmem>>, vector<8x1024xf32>
    tpu.vector_store %arg5[%c0_4, %c0_5], %3 {strides = array<i32>} : memref<216x1024xf32, #tpu.memory_space<vmem>>, vector<8x1024xf32>,
    %c110_i32 = arith.constant 110 : i32
    %5 = tpu.dynamic_rotate %2 by %c110_i32 dim 1 : vector<8x1024xf32>, i32 -> vector<8x1024xf32>
    %c8 = arith.constant 8 : index
    %c0_6 = arith.constant 0 : index
    %6 = vector.load %arg5[%c8, %c0_6] : memref<216x1024xf32, #tpu.memory_space<vmem>>, vector<8x1024xf32>
    tpu.vector_store %arg5[%c8, %c0_6], %5 {strides = array<i32>} : memref<216x1024xf32, #tpu.memory_space<vmem>>, vector<8x1024xf32>,
    %c109_i32 = arith.constant 109 : i32
    %7 = tpu.dynamic_rotate %2 by %c109_i32 dim 1 : vector<8x1024xf32>, i32 -> vector<8x1024xf32>
    %c16 = arith.constant 16 : index
    %c0_7 = arith.constant 0 : index
    %8 = vector.load %arg5[%c16, %c0_7] : memref<216x1024xf32, #tpu.memory_space<vmem>>, vector<8x1024xf32>
    tpu.vector_store %arg5[%c16, %c0_7], %7 {strides = array<i32>} : memref<216x1024xf32, #tpu.memory_space<vmem>>, vector<8x1024xf32>,
    %c101_i32 = arith.constant 101 : i32
    %9 = tpu.dynamic_rotate %2 by %c101_i32 dim 1 : vector<8x1024xf32>, i32 -> vector<8x1024xf32>
    %c24 = arith.constant 24 : index
    %c0_8 = arith.constant 0 : index
    %10 = vector.load %arg5[%c24, %c0_8] : memref<216x1024xf32, #tpu.memory_space<vmem>>, vector<8x1024xf32>
    tpu.vector_store %arg5[%c24, %c0_8], %9 {strides = array<i32>} : memref<216x1024xf32, #tpu.memory_space<vmem>>, vector<8x1024xf32>,
    %c100_i32 = arith.constant 100 : i32
    %11 = tpu.dynamic_rotate %2 by %c100_i32 dim 1 : vector<8x1024xf32>, i32 -> vector<8x1024xf32>
    %c32 = arith.constant 32 : index
    %c0_9 = arith.constant 0 : index
    %12 = vector.load %arg5[%c32, %c0_9] : memref<216x1024xf32, #tpu.memory_space<vmem>>, vector<8x1024xf32>
    tpu.vector_store %arg5[%c32, %c0_9], %11 {strides = array<i32>} : memref<216x1024xf32, #tpu.memory_space<vmem>>, vector<8x1024xf32>,
    %c99_i32 = arith.constant 99 : i32
    %13 = tpu.dynamic_rotate %2 by %c99_i32 dim 1 : vector<8x1024xf32>, i32 -> vector<8x1024xf32>
    %c40 = arith.constant 40 : index
    %c0_10 = arith.constant 0 : index
    %14 = vector.load %arg5[%c40, %c0_10] : memref<216x1024xf32, #tpu.memory_space<vmem>>, vector<8x1024xf32>
    tpu.vector_store %arg5[%c40, %c0_10], %13 {strides = array<i32>} : memref<216x1024xf32, #tpu.memory_space<vmem>>, vector<8x1024xf32>,
    %c91_i32 = arith.constant 91 : i32
    %15 = tpu.dynamic_rotate %2 by %c91_i32 dim 1 : vector<8x1024xf32>, i32 -> vector<8x1024xf32>
    %c48 = arith.constant 48 : index
    %c0_11 = arith.constant 0 : index
    %16 = vector.load %arg5[%c48, %c0_11] : memref<216x1024xf32, #tpu.memory_space<vmem>>, vector<8x1024xf32>
    tpu.vector_store %arg5[%c48, %c0_11], %15 {strides = array<i32>} : memref<216x1024xf32, #tpu.memory_space<vmem>>, vector<8x1024xf32>,
    %c90_i32 = arith.constant 90 : i32
    %17 = tpu.dynamic_rotate %2 by %c90_i32 dim 1 : vector<8x1024xf32>, i32 -> vector<8x1024xf32>
    %c56 = arith.constant 56 : index
    %c0_12 = arith.constant 0 : index
    %18 = vector.load %arg5[%c56, %c0_12] : memref<216x1024xf32, #tpu.memory_space<vmem>>, vector<8x1024xf32>
    tpu.vector_store %arg5[%c56, %c0_12], %17 {strides = array<i32>} : memref<216x1024xf32, #tpu.memory_space<vmem>>, vector<8x1024xf32>,
    %c89_i32 = arith.constant 89 : i32
    %19 = tpu.dynamic_rotate %2 by %c89_i32 dim 1 : vector<8x1024xf32>, i32 -> vector<8x1024xf32>
    %c64 = arith.constant 64 : index
    %c0_13 = arith.constant 0 : index
    %20 = vector.load %arg5[%c64, %c0_13] : memref<216x1024xf32, #tpu.memory_space<vmem>>, vector<8x1024xf32>
    tpu.vector_store %arg5[%c64, %c0_13], %19 {strides = array<i32>} : memref<216x1024xf32, #tpu.memory_space<vmem>>, vector<8x1024xf32>,
    %c11_i32 = arith.constant 11 : i32
    %21 = tpu.dynamic_rotate %2 by %c11_i32 dim 1 : vector<8x1024xf32>, i32 -> vector<8x1024xf32>
    %c72 = arith.constant 72 : index
    %c0_14 = arith.constant 0 : index
    %22 = vector.load %arg5[%c72, %c0_14] : memref<216x1024xf32, #tpu.memory_space<vmem>>, vector<8x1024xf32>
    tpu.vector_store %arg5[%c72, %c0_14], %21 {strides = array<i32>} : memref<216x1024xf32, #tpu.memory_space<vmem>>, vector<8x1024xf32>,
    %c10_i32 = arith.constant 10 : i32
    %23 = tpu.dynamic_rotate %2 by %c10_i32 dim 1 : vector<8x1024xf32>, i32 -> vector<8x1024xf32>
    %c80 = arith.constant 80 : index
    %c0_15 = arith.constant 0 : index
    %24 = vector.load %arg5[%c80, %c0_15] : memref<216x1024xf32, #tpu.memory_space<vmem>>, vector<8x1024xf32>
    tpu.vector_store %arg5[%c80, %c0_15], %23 {strides = array<i32>} : memref<216x1024xf32, #tpu.memory_space<vmem>>, vector<8x1024xf32>,
    %c9_i32 = arith.constant 9 : i32
    %25 = tpu.dynamic_rotate %2 by %c9_i32 dim 1 : vector<8x1024xf32>, i32 -> vector<8x1024xf32>
    %c88 = arith.constant 88 : index
    %c0_16 = arith.constant 0 : index
    %26 = vector.load %arg5[%c88, %c0_16] : memref<216x1024xf32, #tpu.memory_space<vmem>>, vector<8x1024xf32>
    tpu.vector_store %arg5[%c88, %c0_16], %25 {strides = array<i32>} : memref<216x1024xf32, #tpu.memory_space<vmem>>, vector<8x1024xf32>,
    %c1_i32 = arith.constant 1 : i32
    %27 = tpu.dynamic_rotate %2 by %c1_i32 dim 1 : vector<8x1024xf32>, i32 -> vector<8x1024xf32>
    %c96 = arith.constant 96 : index
    %c0_17 = arith.constant 0 : index
    %28 = vector.load %arg5[%c96, %c0_17] : memref<216x1024xf32, #tpu.memory_space<vmem>>, vector<8x1024xf32>
    tpu.vector_store %arg5[%c96, %c0_17], %27 {strides = array<i32>} : memref<216x1024xf32, #tpu.memory_space<vmem>>, vector<8x1024xf32>,
    %c104 = arith.constant 104 : index
    %c0_18 = arith.constant 0 : index
    %29 = vector.load %arg5[%c104, %c0_18] : memref<216x1024xf32, #tpu.memory_space<vmem>>, vector<8x1024xf32>
    tpu.vector_store %arg5[%c104, %c0_18], %2 {strides = array<i32>} : memref<216x1024xf32, #tpu.memory_space<vmem>>, vector<8x1024xf32>,
    %c1023_i32 = arith.constant 1023 : i32
    %30 = tpu.dynamic_rotate %2 by %c1023_i32 dim 1 : vector<8x1024xf32>, i32 -> vector<8x1024xf32>
    %c112 = arith.constant 112 : index
    %c0_19 = arith.constant 0 : index
    %31 = vector.load %arg5[%c112, %c0_19] : memref<216x1024xf32, #tpu.memory_space<vmem>>, vector<8x1024xf32>
    tpu.vector_store %arg5[%c112, %c0_19], %30 {strides = array<i32>} : memref<216x1024xf32, #tpu.memory_space<vmem>>, vector<8x1024xf32>,
    %c1015_i32 = arith.constant 1015 : i32
    %32 = tpu.dynamic_rotate %2 by %c1015_i32 dim 1 : vector<8x1024xf32>, i32 -> vector<8x1024xf32>
    %c120 = arith.constant 120 : index
    %c0_20 = arith.constant 0 : index
    %33 = vector.load %arg5[%c120, %c0_20] : memref<216x1024xf32, #tpu.memory_space<vmem>>, vector<8x1024xf32>
    tpu.vector_store %arg5[%c120, %c0_20], %32 {strides = array<i32>} : memref<216x1024xf32, #tpu.memory_space<vmem>>, vector<8x1024xf32>,
    %c1014_i32 = arith.constant 1014 : i32
    %34 = tpu.dynamic_rotate %2 by %c1014_i32 dim 1 : vector<8x1024xf32>, i32 -> vector<8x1024xf32>
    %c128 = arith.constant 128 : index
    %c0_21 = arith.constant 0 : index
    %35 = vector.load %arg5[%c128, %c0_21] : memref<216x1024xf32, #tpu.memory_space<vmem>>, vector<8x1024xf32>
    tpu.vector_store %arg5[%c128, %c0_21], %34 {strides = array<i32>} : memref<216x1024xf32, #tpu.memory_space<vmem>>, vector<8x1024xf32>,
    %c1013_i32 = arith.constant 1013 : i32
    %36 = tpu.dynamic_rotate %2 by %c1013_i32 dim 1 : vector<8x1024xf32>, i32 -> vector<8x1024xf32>
    %c136 = arith.constant 136 : index
    %c0_22 = arith.constant 0 : index
    %37 = vector.load %arg5[%c136, %c0_22] : memref<216x1024xf32, #tpu.memory_space<vmem>>, vector<8x1024xf32>
    tpu.vector_store %arg5[%c136, %c0_22], %36 {strides = array<i32>} : memref<216x1024xf32, #tpu.memory_space<vmem>>, vector<8x1024xf32>,
    %c935_i32 = arith.constant 935 : i32
    %38 = tpu.dynamic_rotate %2 by %c935_i32 dim 1 : vector<8x1024xf32>, i32 -> vector<8x1024xf32>
    %c144 = arith.constant 144 : index
    %c0_23 = arith.constant 0 : index
    %39 = vector.load %arg5[%c144, %c0_23] : memref<216x1024xf32, #tpu.memory_space<vmem>>, vector<8x1024xf32>
    tpu.vector_store %arg5[%c144, %c0_23], %38 {strides = array<i32>} : memref<216x1024xf32, #tpu.memory_space<vmem>>, vector<8x1024xf32>,
    %c934_i32 = arith.constant 934 : i32
    %40 = tpu.dynamic_rotate %2 by %c934_i32 dim 1 : vector<8x1024xf32>, i32 -> vector<8x1024xf32>
    %c152 = arith.constant 152 : index
    %c0_24 = arith.constant 0 : index
    %41 = vector.load %arg5[%c152, %c0_24] : memref<216x1024xf32, #tpu.memory_space<vmem>>, vector<8x1024xf32>
    tpu.vector_store %arg5[%c152, %c0_24], %40 {strides = array<i32>} : memref<216x1024xf32, #tpu.memory_space<vmem>>, vector<8x1024xf32>,
    %c933_i32 = arith.constant 933 : i32
    %42 = tpu.dynamic_rotate %2 by %c933_i32 dim 1 : vector<8x1024xf32>, i32 -> vector<8x1024xf32>
    %c160 = arith.constant 160 : index
    %c0_25 = arith.constant 0 : index
    %43 = vector.load %arg5[%c160, %c0_25] : memref<216x1024xf32, #tpu.memory_space<vmem>>, vector<8x1024xf32>
    tpu.vector_store %arg5[%c160, %c0_25], %42 {strides = array<i32>} : memref<216x1024xf32, #tpu.memory_space<vmem>>, vector<8x1024xf32>,
    %c925_i32 = arith.constant 925 : i32
    %44 = tpu.dynamic_rotate %2 by %c925_i32 dim 1 : vector<8x1024xf32>, i32 -> vector<8x1024xf32>
    %c168 = arith.constant 168 : index
    %c0_26 = arith.constant 0 : index
    %45 = vector.load %arg5[%c168, %c0_26] : memref<216x1024xf32, #tpu.memory_space<vmem>>, vector<8x1024xf32>
    tpu.vector_store %arg5[%c168, %c0_26], %44 {strides = array<i32>} : memref<216x1024xf32, #tpu.memory_space<vmem>>, vector<8x1024xf32>,
    %c924_i32 = arith.constant 924 : i32
    %46 = tpu.dynamic_rotate %2 by %c924_i32 dim 1 : vector<8x1024xf32>, i32 -> vector<8x1024xf32>
    %c176 = arith.constant 176 : index
    %c0_27 = arith.constant 0 : index
    %47 = vector.load %arg5[%c176, %c0_27] : memref<216x1024xf32, #tpu.memory_space<vmem>>, vector<8x1024xf32>
    tpu.vector_store %arg5[%c176, %c0_27], %46 {strides = array<i32>} : memref<216x1024xf32, #tpu.memory_space<vmem>>, vector<8x1024xf32>,
    %c923_i32 = arith.constant 923 : i32
    %48 = tpu.dynamic_rotate %2 by %c923_i32 dim 1 : vector<8x1024xf32>, i32 -> vector<8x1024xf32>
    %c184 = arith.constant 184 : index
    %c0_28 = arith.constant 0 : index
    %49 = vector.load %arg5[%c184, %c0_28] : memref<216x1024xf32, #tpu.memory_space<vmem>>, vector<8x1024xf32>
    tpu.vector_store %arg5[%c184, %c0_28], %48 {strides = array<i32>} : memref<216x1024xf32, #tpu.memory_space<vmem>>, vector<8x1024xf32>,
    %c915_i32 = arith.constant 915 : i32
    %50 = tpu.dynamic_rotate %2 by %c915_i32 dim 1 : vector<8x1024xf32>, i32 -> vector<8x1024xf32>
    %c192 = arith.constant 192 : index
    %c0_29 = arith.constant 0 : index
    %51 = vector.load %arg5[%c192, %c0_29] : memref<216x1024xf32, #tpu.memory_space<vmem>>, vector<8x1024xf32>
    tpu.vector_store %arg5[%c192, %c0_29], %50 {strides = array<i32>} : memref<216x1024xf32, #tpu.memory_space<vmem>>, vector<8x1024xf32>,
    %c914_i32 = arith.constant 914 : i32
    %52 = tpu.dynamic_rotate %2 by %c914_i32 dim 1 : vector<8x1024xf32>, i32 -> vector<8x1024xf32>
    %c200 = arith.constant 200 : index
    %c0_30 = arith.constant 0 : index
    %53 = vector.load %arg5[%c200, %c0_30] : memref<216x1024xf32, #tpu.memory_space<vmem>>, vector<8x1024xf32>
    tpu.vector_store %arg5[%c200, %c0_30], %52 {strides = array<i32>} : memref<216x1024xf32, #tpu.memory_space<vmem>>, vector<8x1024xf32>,
    %c913_i32 = arith.constant 913 : i32
    %54 = tpu.dynamic_rotate %2 by %c913_i32 dim 1 : vector<8x1024xf32>, i32 -> vector<8x1024xf32>
    %c208 = arith.constant 208 : index
    %c0_31 = arith.constant 0 : index
    %55 = vector.load %arg5[%c208, %c0_31] : memref<216x1024xf32, #tpu.memory_space<vmem>>, vector<8x1024xf32>
    tpu.vector_store %arg5[%c208, %c0_31], %54 {strides = array<i32>} : memref<216x1024xf32, #tpu.memory_space<vmem>>, vector<8x1024xf32>,
    %c0_32 = arith.constant 0 : index
    %c0_33 = arith.constant 0 : index
    %56 = vector.load %arg5[%c0_32, %c0_33] : memref<216x1024xf32, #tpu.memory_space<vmem>>, vector<216x1024xf32>
    %cst = arith.constant dense<0.000000e+00> : vector<4x1024xf32>
    %57 = tpu.matmul %0, %56, %cst {dimension_numbers = #tpu.dot_dimension_numbers<[1], [0], [0], [1], [0, 0, 1, 1], [], []>} : vector<4x216xf32>, vector<216x1024xf32>, vector<4x1024xf32> -> vector<4x1024xf32>
    %c0_34 = arith.constant 0 : index
    %c0_35 = arith.constant 0 : index
    %58 = vector.load %arg6[%c0_34, %c0_35] : memref<8x1024xf32, #tpu.memory_space<vmem>>, vector<4x1024xf32>
    tpu.vector_store %arg6[%c0_34, %c0_35], %57 {strides = array<i32>} : memref<8x1024xf32, #tpu.memory_space<vmem>>, vector<4x1024xf32>,
    %c1 = arith.constant 1 : index
    %c0_36 = arith.constant 0 : index
    %c0_37 = arith.constant 0 : index
    %59 = vector.load %arg1[%c1, %c0_36, %c0_37] : memref<2x8x1024xf32, #tpu.memory_space<vmem>>, vector<1x8x1024xf32>
    %60 = vector.shape_cast %59 : vector<1x8x1024xf32> to vector<8x1024xf32>
    %c111_i32_38 = arith.constant 111 : i32
    %61 = tpu.dynamic_rotate %60 by %c111_i32_38 dim 1 : vector<8x1024xf32>, i32 -> vector<8x1024xf32>
    %c0_39 = arith.constant 0 : index
    %c0_40 = arith.constant 0 : index
    %62 = vector.load %arg5[%c0_39, %c0_40] : memref<216x1024xf32, #tpu.memory_space<vmem>>, vector<8x1024xf32>
    tpu.vector_store %arg5[%c0_39, %c0_40], %61 {strides = array<i32>} : memref<216x1024xf32, #tpu.memory_space<vmem>>, vector<8x1024xf32>,
    %c110_i32_41 = arith.constant 110 : i32
    %63 = tpu.dynamic_rotate %60 by %c110_i32_41 dim 1 : vector<8x1024xf32>, i32 -> vector<8x1024xf32>
    %c8_42 = arith.constant 8 : index
    %c0_43 = arith.constant 0 : index
    %64 = vector.load %arg5[%c8_42, %c0_43] : memref<216x1024xf32, #tpu.memory_space<vmem>>, vector<8x1024xf32>
    tpu.vector_store %arg5[%c8_42, %c0_43], %63 {strides = array<i32>} : memref<216x1024xf32, #tpu.memory_space<vmem>>, vector<8x1024xf32>,
    %c109_i32_44 = arith.constant 109 : i32
    %65 = tpu.dynamic_rotate %60 by %c109_i32_44 dim 1 : vector<8x1024xf32>, i32 -> vector<8x1024xf32>
    %c16_45 = arith.constant 16 : index
    %c0_46 = arith.constant 0 : index
    %66 = vector.load %arg5[%c16_45, %c0_46] : memref<216x1024xf32, #tpu.memory_space<vmem>>, vector<8x1024xf32>
    tpu.vector_store %arg5[%c16_45, %c0_46], %65 {strides = array<i32>} : memref<216x1024xf32, #tpu.memory_space<vmem>>, vector<8x1024xf32>,
    %c101_i32_47 = arith.constant 101 : i32
    %67 = tpu.dynamic_rotate %60 by %c101_i32_47 dim 1 : vector<8x1024xf32>, i32 -> vector<8x1024xf32>
    %c24_48 = arith.constant 24 : index
    %c0_49 = arith.constant 0 : index
    %68 = vector.load %arg5[%c24_48, %c0_49] : memref<216x1024xf32, #tpu.memory_space<vmem>>, vector<8x1024xf32>
    tpu.vector_store %arg5[%c24_48, %c0_49], %67 {strides = array<i32>} : memref<216x1024xf32, #tpu.memory_space<vmem>>, vector<8x1024xf32>,
    %c100_i32_50 = arith.constant 100 : i32
    %69 = tpu.dynamic_rotate %60 by %c100_i32_50 dim 1 : vector<8x1024xf32>, i32 -> vector<8x1024xf32>
    %c32_51 = arith.constant 32 : index
    %c0_52 = arith.constant 0 : index
    %70 = vector.load %arg5[%c32_51, %c0_52] : memref<216x1024xf32, #tpu.memory_space<vmem>>, vector<8x1024xf32>
    tpu.vector_store %arg5[%c32_51, %c0_52], %69 {strides = array<i32>} : memref<216x1024xf32, #tpu.memory_space<vmem>>, vector<8x1024xf32>,
    %c99_i32_53 = arith.constant 99 : i32
    %71 = tpu.dynamic_rotate %60 by %c99_i32_53 dim 1 : vector<8x1024xf32>, i32 -> vector<8x1024xf32>
    %c40_54 = arith.constant 40 : index
    %c0_55 = arith.constant 0 : index
    %72 = vector.load %arg5[%c40_54, %c0_55] : memref<216x1024xf32, #tpu.memory_space<vmem>>, vector<8x1024xf32>
    tpu.vector_store %arg5[%c40_54, %c0_55], %71 {strides = array<i32>} : memref<216x1024xf32, #tpu.memory_space<vmem>>, vector<8x1024xf32>,
    %c91_i32_56 = arith.constant 91 : i32
    %73 = tpu.dynamic_rotate %60 by %c91_i32_56 dim 1 : vector<8x1024xf32>, i32 -> vector<8x1024xf32>
    %c48_57 = arith.constant 48 : index
    %c0_58 = arith.constant 0 : index
    %74 = vector.load %arg5[%c48_57, %c0_58] : memref<216x1024xf32, #tpu.memory_space<vmem>>, vector<8x1024xf32>
    tpu.vector_store %arg5[%c48_57, %c0_58], %73 {strides = array<i32>} : memref<216x1024xf32, #tpu.memory_space<vmem>>, vector<8x1024xf32>,
    %c90_i32_59 = arith.constant 90 : i32
    %75 = tpu.dynamic_rotate %60 by %c90_i32_59 dim 1 : vector<8x1024xf32>, i32 -> vector<8x1024xf32>
    %c56_60 = arith.constant 56 : index
    %c0_61 = arith.constant 0 : index
    %76 = vector.load %arg5[%c56_60, %c0_61] : memref<216x1024xf32, #tpu.memory_space<vmem>>, vector<8x1024xf32>
    tpu.vector_store %arg5[%c56_60, %c0_61], %75 {strides = array<i32>} : memref<216x1024xf32, #tpu.memory_space<vmem>>, vector<8x1024xf32>,
    %c89_i32_62 = arith.constant 89 : i32
    %77 = tpu.dynamic_rotate %60 by %c89_i32_62 dim 1 : vector<8x1024xf32>, i32 -> vector<8x1024xf32>
    %c64_63 = arith.constant 64 : index
    %c0_64 = arith.constant 0 : index
    %78 = vector.load %arg5[%c64_63, %c0_64] : memref<216x1024xf32, #tpu.memory_space<vmem>>, vector<8x1024xf32>
    tpu.vector_store %arg5[%c64_63, %c0_64], %77 {strides = array<i32>} : memref<216x1024xf32, #tpu.memory_space<vmem>>, vector<8x1024xf32>,
    %c11_i32_65 = arith.constant 11 : i32
    %79 = tpu.dynamic_rotate %60 by %c11_i32_65 dim 1 : vector<8x1024xf32>, i32 -> vector<8x1024xf32>
    %c72_66 = arith.constant 72 : index
    %c0_67 = arith.constant 0 : index
    %80 = vector.load %arg5[%c72_66, %c0_67] : memref<216x1024xf32, #tpu.memory_space<vmem>>, vector<8x1024xf32>
    tpu.vector_store %arg5[%c72_66, %c0_67], %79 {strides = array<i32>} : memref<216x1024xf32, #tpu.memory_space<vmem>>, vector<8x1024xf32>,
    %c10_i32_68 = arith.constant 10 : i32
    %81 = tpu.dynamic_rotate %60 by %c10_i32_68 dim 1 : vector<8x1024xf32>, i32 -> vector<8x1024xf32>
    %c80_69 = arith.constant 80 : index
    %c0_70 = arith.constant 0 : index
    %82 = vector.load %arg5[%c80_69, %c0_70] : memref<216x1024xf32, #tpu.memory_space<vmem>>, vector<8x1024xf32>
    tpu.vector_store %arg5[%c80_69, %c0_70], %81 {strides = array<i32>} : memref<216x1024xf32, #tpu.memory_space<vmem>>, vector<8x1024xf32>,
    %c9_i32_71 = arith.constant 9 : i32
    %83 = tpu.dynamic_rotate %60 by %c9_i32_71 dim 1 : vector<8x1024xf32>, i32 -> vector<8x1024xf32>
    %c88_72 = arith.constant 88 : index
    %c0_73 = arith.constant 0 : index
    %84 = vector.load %arg5[%c88_72, %c0_73] : memref<216x1024xf32, #tpu.memory_space<vmem>>, vector<8x1024xf32>
    tpu.vector_store %arg5[%c88_72, %c0_73], %83 {strides = array<i32>} : memref<216x1024xf32, #tpu.memory_space<vmem>>, vector<8x1024xf32>,
    %c1_i32_74 = arith.constant 1 : i32
    %85 = tpu.dynamic_rotate %60 by %c1_i32_74 dim 1 : vector<8x1024xf32>, i32 -> vector<8x1024xf32>
    %c96_75 = arith.constant 96 : index
    %c0_76 = arith.constant 0 : index
    %86 = vector.load %arg5[%c96_75, %c0_76] : memref<216x1024xf32, #tpu.memory_space<vmem>>, vector<8x1024xf32>
    tpu.vector_store %arg5[%c96_75, %c0_76], %85 {strides = array<i32>} : memref<216x1024xf32, #tpu.memory_space<vmem>>, vector<8x1024xf32>,
    %c104_77 = arith.constant 104 : index
    %c0_78 = arith.constant 0 : index
    %87 = vector.load %arg5[%c104_77, %c0_78] : memref<216x1024xf32, #tpu.memory_space<vmem>>, vector<8x1024xf32>
    tpu.vector_store %arg5[%c104_77, %c0_78], %60 {strides = array<i32>} : memref<216x1024xf32, #tpu.memory_space<vmem>>, vector<8x1024xf32>,
    %c1023_i32_79 = arith.constant 1023 : i32
    %88 = tpu.dynamic_rotate %60 by %c1023_i32_79 dim 1 : vector<8x1024xf32>, i32 -> vector<8x1024xf32>
    %c112_80 = arith.constant 112 : index
    %c0_81 = arith.constant 0 : index
    %89 = vector.load %arg5[%c112_80, %c0_81] : memref<216x1024xf32, #tpu.memory_space<vmem>>, vector<8x1024xf32>
    tpu.vector_store %arg5[%c112_80, %c0_81], %88 {strides = array<i32>} : memref<216x1024xf32, #tpu.memory_space<vmem>>, vector<8x1024xf32>,
    %c1015_i32_82 = arith.constant 1015 : i32
    %90 = tpu.dynamic_rotate %60 by %c1015_i32_82 dim 1 : vector<8x1024xf32>, i32 -> vector<8x1024xf32>
    %c120_83 = arith.constant 120 : index
    %c0_84 = arith.constant 0 : index
    %91 = vector.load %arg5[%c120_83, %c0_84] : memref<216x1024xf32, #tpu.memory_space<vmem>>, vector<8x1024xf32>
    tpu.vector_store %arg5[%c120_83, %c0_84], %90 {strides = array<i32>} : memref<216x1024xf32, #tpu.memory_space<vmem>>, vector<8x1024xf32>,
    %c1014_i32_85 = arith.constant 1014 : i32
    %92 = tpu.dynamic_rotate %60 by %c1014_i32_85 dim 1 : vector<8x1024xf32>, i32 -> vector<8x1024xf32>
    %c128_86 = arith.constant 128 : index
    %c0_87 = arith.constant 0 : index
    %93 = vector.load %arg5[%c128_86, %c0_87] : memref<216x1024xf32, #tpu.memory_space<vmem>>, vector<8x1024xf32>
    tpu.vector_store %arg5[%c128_86, %c0_87], %92 {strides = array<i32>} : memref<216x1024xf32, #tpu.memory_space<vmem>>, vector<8x1024xf32>,
    %c1013_i32_88 = arith.constant 1013 : i32
    %94 = tpu.dynamic_rotate %60 by %c1013_i32_88 dim 1 : vector<8x1024xf32>, i32 -> vector<8x1024xf32>
    %c136_89 = arith.constant 136 : index
    %c0_90 = arith.constant 0 : index
    %95 = vector.load %arg5[%c136_89, %c0_90] : memref<216x1024xf32, #tpu.memory_space<vmem>>, vector<8x1024xf32>
    tpu.vector_store %arg5[%c136_89, %c0_90], %94 {strides = array<i32>} : memref<216x1024xf32, #tpu.memory_space<vmem>>, vector<8x1024xf32>,
    %c935_i32_91 = arith.constant 935 : i32
    %96 = tpu.dynamic_rotate %60 by %c935_i32_91 dim 1 : vector<8x1024xf32>, i32 -> vector<8x1024xf32>
    %c144_92 = arith.constant 144 : index
    %c0_93 = arith.constant 0 : index
    %97 = vector.load %arg5[%c144_92, %c0_93] : memref<216x1024xf32, #tpu.memory_space<vmem>>, vector<8x1024xf32>
    tpu.vector_store %arg5[%c144_92, %c0_93], %96 {strides = array<i32>} : memref<216x1024xf32, #tpu.memory_space<vmem>>, vector<8x1024xf32>,
    %c934_i32_94 = arith.constant 934 : i32
    %98 = tpu.dynamic_rotate %60 by %c934_i32_94 dim 1 : vector<8x1024xf32>, i32 -> vector<8x1024xf32>
    %c152_95 = arith.constant 152 : index
    %c0_96 = arith.constant 0 : index
    %99 = vector.load %arg5[%c152_95, %c0_96] : memref<216x1024xf32, #tpu.memory_space<vmem>>, vector<8x1024xf32>
    tpu.vector_store %arg5[%c152_95, %c0_96], %98 {strides = array<i32>} : memref<216x1024xf32, #tpu.memory_space<vmem>>, vector<8x1024xf32>,
    %c933_i32_97 = arith.constant 933 : i32
    %100 = tpu.dynamic_rotate %60 by %c933_i32_97 dim 1 : vector<8x1024xf32>, i32 -> vector<8x1024xf32>
    %c160_98 = arith.constant 160 : index
    %c0_99 = arith.constant 0 : index
    %101 = vector.load %arg5[%c160_98, %c0_99] : memref<216x1024xf32, #tpu.memory_space<vmem>>, vector<8x1024xf32>
    tpu.vector_store %arg5[%c160_98, %c0_99], %100 {strides = array<i32>} : memref<216x1024xf32, #tpu.memory_space<vmem>>, vector<8x1024xf32>,
    %c925_i32_100 = arith.constant 925 : i32
    %102 = tpu.dynamic_rotate %60 by %c925_i32_100 dim 1 : vector<8x1024xf32>, i32 -> vector<8x1024xf32>
    %c168_101 = arith.constant 168 : index
    %c0_102 = arith.constant 0 : index
    %103 = vector.load %arg5[%c168_101, %c0_102] : memref<216x1024xf32, #tpu.memory_space<vmem>>, vector<8x1024xf32>
    tpu.vector_store %arg5[%c168_101, %c0_102], %102 {strides = array<i32>} : memref<216x1024xf32, #tpu.memory_space<vmem>>, vector<8x1024xf32>,
    %c924_i32_103 = arith.constant 924 : i32
    %104 = tpu.dynamic_rotate %60 by %c924_i32_103 dim 1 : vector<8x1024xf32>, i32 -> vector<8x1024xf32>
    %c176_104 = arith.constant 176 : index
    %c0_105 = arith.constant 0 : index
    %105 = vector.load %arg5[%c176_104, %c0_105] : memref<216x1024xf32, #tpu.memory_space<vmem>>, vector<8x1024xf32>
    tpu.vector_store %arg5[%c176_104, %c0_105], %104 {strides = array<i32>} : memref<216x1024xf32, #tpu.memory_space<vmem>>, vector<8x1024xf32>,
    %c923_i32_106 = arith.constant 923 : i32
    %106 = tpu.dynamic_rotate %60 by %c923_i32_106 dim 1 : vector<8x1024xf32>, i32 -> vector<8x1024xf32>
    %c184_107 = arith.constant 184 : index
    %c0_108 = arith.constant 0 : index
    %107 = vector.load %arg5[%c184_107, %c0_108] : memref<216x1024xf32, #tpu.memory_space<vmem>>, vector<8x1024xf32>
    tpu.vector_store %arg5[%c184_107, %c0_108], %106 {strides = array<i32>} : memref<216x1024xf32, #tpu.memory_space<vmem>>, vector<8x1024xf32>,
    %c915_i32_109 = arith.constant 915 : i32
    %108 = tpu.dynamic_rotate %60 by %c915_i32_109 dim 1 : vector<8x1024xf32>, i32 -> vector<8x1024xf32>
    %c192_110 = arith.constant 192 : index
    %c0_111 = arith.constant 0 : index
    %109 = vector.load %arg5[%c192_110, %c0_111] : memref<216x1024xf32, #tpu.memory_space<vmem>>, vector<8x1024xf32>
    tpu.vector_store %arg5[%c192_110, %c0_111], %108 {strides = array<i32>} : memref<216x1024xf32, #tpu.memory_space<vmem>>, vector<8x1024xf32>,
    %c914_i32_112 = arith.constant 914 : i32
    %110 = tpu.dynamic_rotate %60 by %c914_i32_112 dim 1 : vector<8x1024xf32>, i32 -> vector<8x1024xf32>
    %c200_113 = arith.constant 200 : index
    %c0_114 = arith.constant 0 : index
    %111 = vector.load %arg5[%c200_113, %c0_114] : memref<216x1024xf32, #tpu.memory_space<vmem>>, vector<8x1024xf32>
    tpu.vector_store %arg5[%c200_113, %c0_114], %110 {strides = array<i32>} : memref<216x1024xf32, #tpu.memory_space<vmem>>, vector<8x1024xf32>,
    %c913_i32_115 = arith.constant 913 : i32
    %112 = tpu.dynamic_rotate %60 by %c913_i32_115 dim 1 : vector<8x1024xf32>, i32 -> vector<8x1024xf32>
    %c208_116 = arith.constant 208 : index
    %c0_117 = arith.constant 0 : index
    %113 = vector.load %arg5[%c208_116, %c0_117] : memref<216x1024xf32, #tpu.memory_space<vmem>>, vector<8x1024xf32>
    tpu.vector_store %arg5[%c208_116, %c0_117], %112 {strides = array<i32>} : memref<216x1024xf32, #tpu.memory_space<vmem>>, vector<8x1024xf32>,
    %c0_118 = arith.constant 0 : index
    %c0_119 = arith.constant 0 : index
    %114 = vector.load %arg5[%c0_118, %c0_119] : memref<216x1024xf32, #tpu.memory_space<vmem>>, vector<216x1024xf32>
    %cst_120 = arith.constant dense<0.000000e+00> : vector<4x1024xf32>
    %115 = tpu.matmul %0, %114, %cst_120 {dimension_numbers = #tpu.dot_dimension_numbers<[1], [0], [0], [1], [0, 0, 1, 1], [], []>} : vector<4x216xf32>, vector<216x1024xf32>, vector<4x1024xf32> -> vector<4x1024xf32>
    %c4 = arith.constant 4 : index
    %c0_121 = arith.constant 0 : index
    %116 = vector.load %arg6[%c4, %c0_121] : memref<8x1024xf32, #tpu.memory_space<vmem>>, vector<4x1024xf32>
    tpu.vector_store %arg6[%c4, %c0_121], %115 {strides = array<i32>} : memref<8x1024xf32, #tpu.memory_space<vmem>>, vector<4x1024xf32>,
    %c0_122 = arith.constant 0 : index
    %c0_123 = arith.constant 0 : index
    %117 = vector.load %arg6[%c0_122, %c0_123] : memref<8x1024xf32, #tpu.memory_space<vmem>>, vector<8x1024xf32>
    %c0_124 = arith.constant 0 : index
    %c0_125 = arith.constant 0 : index
    %118 = vector.load %arg3[%c0_124, %c0_125] : memref<8x1xf32, #tpu.memory_space<vmem>>, vector<8x1xf32>
    %119 = vector.broadcast %118 : vector<8x1xf32> to vector<8x1024xf32>
    %120 = arith.addf %117, %119 : vector<8x1024xf32>
    %cst_126 = arith.constant 2.000000e+01 : f32
    %121 = vector.broadcast %cst_126 : f32 to vector<8x1024xf32>
    %122 = arith.minimumf %120, %121 : vector<8x1024xf32>
    %123 = math.exp %122 : vector<8x1024xf32>
    %cst_127 = arith.constant 2.000000e+00 : f32
    %124 = vector.broadcast %cst_127 : f32 to vector<8x1024xf32>
    %125 = arith.addf %123, %124 : vector<8x1024xf32>
    %126 = arith.mulf %123, %125 : vector<8x1024xf32>
    %cst_128 = arith.constant 2.000000e+00 : f32
    %127 = vector.broadcast %cst_128 : f32 to vector<8x1024xf32>
    %128 = arith.addf %126, %127 : vector<8x1024xf32>
    %129 = tpu.reciprocal %128 {approx = true} : vector<8x1024xf32> -> vector<8x1024xf32>
    %130 = arith.mulf %126, %129 : vector<8x1024xf32>
    %131 = arith.mulf %120, %130 : vector<8x1024xf32>
    %132 = vector.shape_cast %131 : vector<8x1024xf32> to vector<1x8x1024xf32>
    %c0_129 = arith.constant 0 : index
    %c0_130 = arith.constant 0 : index
    %c0_131 = arith.constant 0 : index
    %133 = vector.load %arg4[%c0_129, %c0_130, %c0_131] : memref<1x8x1024xf32, #tpu.memory_space<vmem>>, vector<1x8x1024xf32>
    tpu.vector_store %arg4[%c0_129, %c0_130, %c0_131], %132 {strides = array<i32>} : memref<1x8x1024xf32, #tpu.memory_space<vmem>>, vector<1x8x1024xf32>,
    return
  }
  func.func @transform_0(%arg0: i32) -> (i32, i32, i32) {
    %c0_i32 = arith.constant 0 : i32
    %c0_i32_0 = arith.constant 0 : i32
    %c0_i32_1 = arith.constant 0 : i32
    return %arg0, %c0_i32, %c0_i32_0 : i32, i32, i32
  }
  func.func @transform_1(%arg0: i32) -> (i32, i32) {
    %c0_i32 = arith.constant 0 : i32
    %c0_i32_0 = arith.constant 0 : i32
    %c0_i32_1 = arith.constant 0 : i32
    return %c0_i32, %c0_i32_0 : i32, i32
  }
  func.func @transform_2(%arg0: i32) -> (i32, i32) {
    %c0_i32 = arith.constant 0 : i32
    %c0_i32_0 = arith.constant 0 : i32
    %c0_i32_1 = arith.constant 0 : i32
    return %c0_i32, %c0_i32_0 : i32, i32
  }
  func.func @transform_3(%arg0: i32) -> (i32, i32, i32) {
    %c0_i32 = arith.constant 0 : i32
    %c0_i32_0 = arith.constant 0 : i32
    %c0_i32_1 = arith.constant 0 : i32
    return %arg0, %c0_i32, %c0_i32_0 : i32, i32, i32
  }
}

</mosaic_0001>

<bundles_post_ra>
// kernel: tile.8
= control target key start
LH: loop header
LB: loop body
LE: loop exit
PB: predicated region body
PF: predicated region fallthrough
CT: control target
= control target key end

     0   :  { %s22_s0 = inlined_call_operand.vmem [shape: f32[4], index: 0, kind: input, shape index: {}]   ;;  %s23_s1 = inlined_call_operand.vmem [shape: f32[2,4], index: 1, kind: output, shape index: {}]  }
   0x1   :  { %v4_v0 = vld [vmem:[%s22_s0] ss:$0 sm:$0xff] }
   0x2   :  { %5 = vst [vmem:[%s23_s1] sm:$0x3] %v4_v0 }

// kernel: tile.0
= control target key start
LH: loop header
LB: loop body
LE: loop exit
PB: predicated region body
PF: predicated region fallthrough
CT: control target
= control target key end

     0   :  { %s34_s8 = smov 125   ;;  %vm7_vm0 = vcmask 7168   ;;  %s35_s11 = smov 126   ;;  %s61_s0 = inlined_call_operand.vmem [shape: f32[2,4], index: 0, kind: input, shape index: {}]   ;;  %s62_s1 = inlined_call_operand.vmem [shape: f32[8,1], index: 1, kind: output, shape index: {}]  }
   0x1   :  { %v4_v0 = vld [vmem:[%s61_s0] sm:$0x3]  ;;  %s33_s0 = smov 127  }
   0x2   :  { %5 = vst [vmem:[#allocation0] sm:$0x3] %v4_v0 }
   0x9   :  { %v9_v1 = vld [vmem:[#allocation0] sm:$0x3]  }
   0xa   :  { %v21_v2 = vld [vmem:[#allocation0] sm:$0x3]   ;;  %10 = vrot.lane.b32.xlu0 %v9_v1, %s33_s0 }
   0xb   :  { %22 = vrot.lane.b32.xlu1 %v21_v2, %s34_s8  ;;  %v6_v3 = vld [vmem:[#allocation0] sm:$0x3]  }
   0xc   :  { %v15_v4 = vld [vmem:[#allocation0] sm:$0x3]   ;;  %8 = vst.msk [vmem:[%s62_s1] ss:$4 sm:$0x3] %vm7_vm0, %v6_v3  }
   0xe   :  { %16 = vrot.lane.b32.xlu0 %v15_v4, %s35_s11 }
  0x7c   :  { %v11_v5 = vpop.permute.xlu0 %10  }
  0x7d   :  { %v23_v6 = vpop.permute.xlu1 %22   ;;  %27 = vst.msk [vmem:[%s62_s1 + $0x1] ss:$4 sm:$0x3] %vm7_vm0, %v11_v5  }
  0x7e   :  { %29 = vst.msk [vmem:[%s62_s1 + $0x3] ss:$4 sm:$0x3] %vm7_vm0, %v23_v6  }
  0x80   :  { %v17_v7 = vpop.permute.xlu0 %16  }
  0x81   :  { %28 = vst.msk [vmem:[%s62_s1 + $0x2] ss:$4 sm:$0x3] %vm7_vm0, %v17_v7  }

// kernel: my_bottleneck_forward.1
= control target key start
LH: loop header
LB: loop body
LE: loop exit
PB: predicated region body
PF: predicated region fallthrough
CT: control target
= control target key end

     0   :  { %s4632_s12 = smov 0   ;;  %s7313_s0 = inlined_call_operand.vmem [shape: f32[4,8,1024], index: 0, kind: input, shape index: {}]   ;;  %s7314_s1 = inlined_call_operand.vmem [shape: f32[4,216], index: 1, kind: input, shape index: {}]   ;;  %s7315_s2 = inlined_call_operand.vmem [shape: f32[8,1], index: 2, kind: input, shape index: {}]   ;;  %s7316_s3 = inlined_call_operand.vmem [shape: f32[2,8,1024], index: 3, kind: output, shape index: {}]  }
   0x1 LB: > { %s4638_s13 = sadd.s32 4294967295, %s4583_s12   ;;  %p3108_p0 = scmp.ge.s32.totalorder %s4583_s12, 1  ;;  %s4583_s12 = sphi %s4632_s12, %s13_s12  }
   0x2   : > { %p139_p1 = scmp.lt.s32.totalorder %s4583_s12, 3 }
   0x4   : > { %p140_p2 = pnand %p3108_p0, %p139_p1 }
   0x6   : > { %143 = sbr.rel (%p140_p2) target bundleno = 864 (0x360), region = 32 }
   0xd   : > { %s3109_s14 = sshll.u32 %s4638_s13, 1  ;;  %s4585_s19 = smov 111   ;;  %v201_v13 = vlaneseq  ;;  %vm1271_vm10 = vcmask 719872  }
   0xe   : > { %p165_p3 = scmp.lt.s32.totalorder %s3109_s14, 3  ;;  %s4586_s20 = smov 110  }
   0xf   : > { %s4587_s21 = smov 109   ;;  %s4588_s22 = smov 101   ;;  %v4804_v15 = vand.u32 127, %v201_v13 }
  0x10   : > { %s7904_s14 = smov (!%p165_p3, %s3109_s14), 3  ;;  %s4589_s23 = smov 100  }
  0x11   : > { %s3132_s15 = sshll.u32 %s7904_s14, 6  ;;  %s4590_s24 = smov 99   ;;  %vm203_vm0 = vcmp.lt.s32.totalorder %v4804_v15, 111  ;;  %vm236_vm1 = vcmp.lt.s32.totalorder %v4804_v15, 110  ;;  %vm269_vm2 = vcmp.lt.s32.totalorder %v4804_v15, 109  ;;  %vm302_vm3 = vcmp.lt.s32.totalorder %v4804_v15, 101 }
  0x12   : > { %s4646_s18 = scalar_lea.vmem %s7313_s0, %s3132_s15  ;;  %s4591_s25 = smov 91   ;;  %vm335_vm4 = vcmp.lt.s32.totalorder %v4804_v15, 100  ;;  %vm368_vm5 = vcmp.lt.s32.totalorder %v4804_v15, 99  ;;  %vm7451_vm6 = vcmp.lt.s32.totalorder %v4804_v15, 91  ;;  %vm434_vm7 = vcmp.lt.s32.totalorder %v4804_v15, 90 }
  0x13   : > { %v4649_v0 = vld [vmem:[%s4646_s18 + $0x20] sm:$0xff]  ;;  %v4652_v1 = vld [vmem:[%s4646_s18 + $0x28] sm:$0xff]  ;;  %v183_v5 = vld [vmem:[%s4646_s18 + $0x30] sm:$0xff]  ;;  %s4592_s26 = smov 90   ;;  %s4593_s27 = smov 89   ;;  %vm7441_vm8 = vcmp.lt.s32.totalorder %v4804_v15, 89 }
  0x14   : > { %v4655_v2 = vld [vmem:[%s4646_s18] sm:$0xff]  ;;  %v4659_v3 = vpack.i.bf16 %v4652_v1, %v4649_v0  ;;  %v4662_v4 = vld [vmem:[%s4646_s18 + $0x8] sm:$0xff]  ;;  %v184_v6 = vld [vmem:[%s4646_s18 + $0x38] sm:$0xff]  ;;  %s4594_s28 = smov 11   ;;  %s4595_s29 = smov 10   ;;  %vm7439_vm9 = vcmp.lt.s32.totalorder %v4804_v15, 11 }
  0x15   : > { %v4668_v7 = vpack.i.bf16 %v4662_v4, %v4655_v2  ;;  %v4671_v8 = vld [vmem:[%s4646_s18 + $0x10] sm:$0xff]  ;;  %v4674_v9 = vld [vmem:[%s4646_s18 + $0x18] sm:$0xff]  ;;  %v4678_v10 = vpack.i.bf16 %v184_v6, %v183_v5  ;;  %s4596_s30 = smov 9   ;;  %s4597_s4 = smov 1   ;;  %vm7442_vm11 = vcmp.lt.s32.totalorder %v4804_v15, 10  ;;  %vm7440_vm12 = vcmp.lt.s32.totalorder %v4804_v15, 9 }
  0x16   : > { %3596 = vrot.lane.b32.xlu1 %v4659_v3, %s4585_s19  ;;  %v4684_v11 = vpack.i.bf16 %v4674_v9, %v4671_v8  ;;  %s4598_s5 = smov 127   ;;  %s4599_s6 = smov 119   ;;  %vm7435_vm13 = vcmp.lt.s32.totalorder %v4804_v15, 1  ;;  %vm7372_vm14 = vcmp.lt.s32.totalorder %v4804_v15, 127  ;;  %vm7373_vm15 = vcmp.lt.s32.totalorder %v4804_v15, 119 }
  0x17   : > { %3586 = vrot.lane.b32.xlu0 %v4668_v7, %s4585_s19  ;;  %s7437_s7 = smov 118   ;;  %s4601_s8 = smov 117  }
  0x18   : > { %s7443_s9 = smov 39   ;;  %s7329_s10 = smov 38  }
  0x19   : > { %s7327_s11 = smov 37   ;;  %s7325_s14 = smov 29  }
  0x1a   : > { %3601 = vrot.lane.b32.xlu1 %v4678_v10, %s4585_s19  ;;  %s4606_s15 = smov 28   ;;  %s4607_s16 = smov 27  }
  0x1b   : > { %3591 = vrot.lane.b32.xlu0 %v4684_v11, %s4585_s19  ;;  %s4608_s17 = smov 19   ;;  %p171_p4 = scmp.lt.s32.totalorder %s4638_s13, 1 }
  0x1d   : > { %s7906_s13 = smov (!%p171_p4, %s4638_s13), 1 }
  0x1e   : > { %3611 = vrot.lane.b32.xlu1 %v4684_v11, %s4586_s20 }
  0x1f   : > { %3606 = vrot.lane.b32.xlu0 %v4668_v7, %s4586_s20 }
  0x22   : > { %3621 = vrot.lane.b32.xlu1 %v4678_v10, %s4586_s20 }
  0x23   : > { %3616 = vrot.lane.b32.xlu0 %v4659_v3, %s4586_s20 }
  0x26   : > { %3631 = vrot.lane.b32.xlu1 %v4684_v11, %s4587_s21 }
  0x27   : > { %3626 = vrot.lane.b32.xlu0 %v4668_v7, %s4587_s21 }
  0x2a   : > { %3641 = vrot.lane.b32.xlu1 %v4678_v10, %s4587_s21 }
  0x2b   : > { %3636 = vrot.lane.b32.xlu0 %v4659_v3, %s4587_s21 }
  0x2e   : > { %3651 = vrot.lane.b32.xlu1 %v4684_v11, %s4588_s22 }
  0x2f   : > { %3646 = vrot.lane.b32.xlu0 %v4668_v7, %s4588_s22 }
  0x32   : > { %3661 = vrot.lane.b32.xlu1 %v4678_v10, %s4588_s22 }
  0x33   : > { %3656 = vrot.lane.b32.xlu0 %v4659_v3, %s4588_s22 }
  0x36   : > { %3671 = vrot.lane.b32.xlu1 %v4684_v11, %s4589_s23 }
  0x37   : > { %3666 = vrot.lane.b32.xlu0 %v4668_v7, %s4589_s23 }
  0x3a   : > { %3681 = vrot.lane.b32.xlu1 %v4678_v10, %s4589_s23 }
  0x3b   : > { %3676 = vrot.lane.b32.xlu0 %v4659_v3, %s4589_s23 }
  0x3e   : > { %3691 = vrot.lane.b32.xlu1 %v4684_v11, %s4590_s24 }
  0x3f   : > { %3686 = vrot.lane.b32.xlu0 %v4668_v7, %s4590_s24 }
  0x42   : > { %3701 = vrot.lane.b32.xlu1 %v4678_v10, %s4590_s24 }
  0x43   : > { %3696 = vrot.lane.b32.xlu0 %v4659_v3, %s4590_s24 }
  0x46   : > { %3711 = vrot.lane.b32.xlu1 %v4684_v11, %s4591_s25 }
  0x47   : > { %3706 = vrot.lane.b32.xlu0 %v4668_v7, %s4591_s25 }
  0x4a   : > { %3721 = vrot.lane.b32.xlu1 %v4678_v10, %s4591_s25 }
  0x4b   : > { %3716 = vrot.lane.b32.xlu0 %v4659_v3, %s4591_s25 }
  0x4e   : > { %3731 = vrot.lane.b32.xlu1 %v4684_v11, %s4592_s26 }
  0x4f   : > { %3726 = vrot.lane.b32.xlu0 %v4668_v7, %s4592_s26 }
  0x52   : > { %3741 = vrot.lane.b32.xlu1 %v4678_v10, %s4592_s26 }
  0x53   : > { %3736 = vrot.lane.b32.xlu0 %v4659_v3, %s4592_s26 }
  0x56   : > { %3751 = vrot.lane.b32.xlu1 %v4684_v11, %s4593_s27 }
  0x57   : > { %3746 = vrot.lane.b32.xlu0 %v4668_v7, %s4593_s27 }
  0x5a   : > { %3761 = vrot.lane.b32.xlu1 %v4678_v10, %s4593_s27 }
  0x5b   : > { %3756 = vrot.lane.b32.xlu0 %v4659_v3, %s4593_s27 }
  0x5e   : > { %3771 = vrot.lane.b32.xlu1 %v4684_v11, %s4594_s28 }
  0x5f   : > { %3766 = vrot.lane.b32.xlu0 %v4668_v7, %s4594_s28 }
  0x62   : > { %3781 = vrot.lane.b32.xlu1 %v4678_v10, %s4594_s28 }
  0x63   : > { %3776 = vrot.lane.b32.xlu0 %v4659_v3, %s4594_s28 }
  0x66   : > { %3791 = vrot.lane.b32.xlu1 %v4684_v11, %s4595_s29 }
  0x67   : > { %3786 = vrot.lane.b32.xlu0 %v4668_v7, %s4595_s29 }
  0x6a   : > { %3801 = vrot.lane.b32.xlu1 %v4678_v10, %s4595_s29 }
  0x6b   : > { %3796 = vrot.lane.b32.xlu0 %v4659_v3, %s4595_s29 }
  0x6e   : > { %3811 = vrot.lane.b32.xlu1 %v4684_v11, %s4596_s30 }
  0x6f   : > { %3806 = vrot.lane.b32.xlu0 %v4668_v7, %s4596_s30 }
  0x72   : > { %3821 = vrot.lane.b32.xlu1 %v4678_v10, %s4596_s30 }
  0x73   : > { %3816 = vrot.lane.b32.xlu0 %v4659_v3, %s4596_s30 }
  0x76   : > { %3831 = vrot.lane.b32.xlu1 %v4684_v11, %s4597_s4 }
  0x77   : > { %3826 = vrot.lane.b32.xlu0 %v4668_v7, %s4597_s4 }
  0x7a   : > { %3841 = vrot.lane.b32.xlu1 %v4678_v10, %s4597_s4 }
  0x7b   : > { %3836 = vrot.lane.b32.xlu0 %v4659_v3, %s4597_s4 }
  0x7e   : > { %3851 = vrot.lane.b32.xlu1 %v4684_v11, %s4598_s5 }
  0x7f   : > { %3846 = vrot.lane.b32.xlu0 %v4668_v7, %s4598_s5 }
  0x82   : > { %3861 = vrot.lane.b32.xlu1 %v4678_v10, %s4598_s5 }
  0x83   : > { %3856 = vrot.lane.b32.xlu0 %v4659_v3, %s4598_s5 }
  0x86   : > { %3871 = vrot.lane.b32.xlu1 %v4684_v11, %s4599_s6 }
  0x87   : > { %3866 = vrot.lane.b32.xlu0 %v4668_v7, %s4599_s6 }
  0x88   : > { %v4798_v12 = vpop.permute.xlu1 %3596 }
  0x89   : > { %v3587_v14 = vpop.permute.xlu0 %3586  ;;  %v7324_v48 = vunpack.i.l.bf16 %v4798_v12 }
  0x8a   : > { %3881 = vrot.lane.b32.xlu1 %v4678_v10, %s4599_s6  ;;  %v3589_v18 = vunpack.i.h.bf16 %v3587_v14  ;;  %v3588_v19 = vunpack.i.l.bf16 %v3587_v14 }
  0x8b   : > { %3876 = vrot.lane.b32.xlu0 %v4659_v3, %s4599_s6 }
  0x8c   : > { %v4806_v16 = vpop.permute.xlu1 %3601  ;;  %v210_v30 = vsel %vm203_vm0, %v3588_v19, %v3589_v18 }
  0x8d   : > { %v3592_v17 = vpop.permute.xlu0 %3591  ;;  %v3604_v26 = vunpack.i.h.bf16 %v4806_v16  ;;  %v7337_v29 = vunpack.i.l.bf16 %v4806_v16 }
  0x8e   : > { %3891 = vrot.lane.b32.xlu1 %v4684_v11, %s7437_s7  ;;  %v3594_v20 = vunpack.i.h.bf16 %v3592_v17  ;;  %v3593_v21 = vunpack.i.l.bf16 %v3592_v17 }
  0x8f   : > { %3886 = vrot.lane.b32.xlu0 %v4668_v7, %s7437_s7  ;;  %v211_v44 = vsel %vm203_vm0, %v3604_v26, %v3588_v19  ;;  %v4851_v46 = vsel %vm203_vm0, %v7337_v29, %v3604_v26 }
  0x90   : > { %v3612_v22 = vpop.permute.xlu1 %3611  ;;  %v208_v31 = vsel %vm203_vm0, %v3593_v21, %v3594_v20  ;;  %v209_v36 = vsel %vm203_vm0, %v3589_v18, %v3593_v21  ;;  %v4872_v54 = vsel %vm203_vm0, %v3594_v20, %v7324_v48 }
  0x91   : > { %v3614_v23 = vunpack.i.h.bf16 %v3612_v22  ;;  %v3613_v24 = vunpack.i.l.bf16 %v3612_v22  ;;  %v3607_v25 = vpop.permute.xlu0 %3606 }
  0x92   : > { %v3609_v27 = vunpack.i.h.bf16 %v3607_v25  ;;  %v3608_v28 = vunpack.i.l.bf16 %v3607_v25  ;;  %3901 = vrot.lane.b32.xlu1 %v4678_v10, %s7437_s7 }
  0x93   : > { %3896 = vrot.lane.b32.xlu0 %v4659_v3, %s7437_s7  ;;  %v241_v32 = vsel %vm236_vm1, %v3613_v24, %v3614_v23 }
  0x94   : > { %v4826_v33 = vpop.permute.xlu1 %3621  ;;  %v243_v34 = vsel %vm236_vm1, %v3608_v28, %v3609_v27  ;;  %v3186_v35 = vpack.c.bf16 %v241_v32, %v208_v31  ;;  %v242_v37 = vsel %vm236_vm1, %v3609_v27, %v3613_v24 }
  0x95   : > { %v3624_v38 = vunpack.i.h.bf16 %v4826_v33  ;;  %v7338_v39 = vunpack.i.l.bf16 %v4826_v33  ;;  %v4836_v40 = vpop.permute.xlu0 %3616  ;;  %v3134_v41 = vpack.c.bf16 %v243_v34, %v210_v30  ;;  %v3188_v42 = vpack.c.bf16 %v242_v37, %v209_v36 }
  0x96   : > { %v7336_v43 = vunpack.i.l.bf16 %v4836_v40  ;;  %3911 = vrot.lane.b32.xlu1 %v4684_v11, %s4601_s8  ;;  %3187 = vmatprep.subr.bf16.mxu1 %v3186_v35 }
  0x97   : > { %3906 = vrot.lane.b32.xlu0 %v4668_v7, %s4601_s8  ;;  %3135 = vmatprep.subr.bf16.mxu0 %v3134_v41  ;;  %v244_v45 = vsel %vm236_vm1, %v3624_v38, %v3608_v28  ;;  %v4857_v47 = vsel %vm236_vm1, %v7338_v39, %v3624_v38 }
  0x98   : > { %v4864_v49 = vsel %vm236_vm1, %v3614_v23, %v7336_v43  ;;  %3189 = vmatpush1.bf16.msra.mxu1 %v3188_v42  ;;  %v3632_v50 = vpop.permute.xlu1 %3631  ;;  %v3136_v51 = vpack.c.bf16 %v244_v45, %v211_v44 }
  0x99   : > { %v3627_v53 = vpop.permute.xlu0 %3626  ;;  %v3634_v58 = vunpack.i.h.bf16 %v3632_v50  ;;  %v3633_v59 = vunpack.i.l.bf16 %v3632_v50 }
  0x9a   : > { %3921 = vrot.lane.b32.xlu1 %v4678_v10, %s4601_s8  ;;  %3137 = vmatpush1.bf16.msra.mxu0 %v3136_v51  ;;  %v3629_v60 = vunpack.i.h.bf16 %v3627_v53  ;;  %v3628_v61 = vunpack.i.l.bf16 %v3627_v53 }
  0x9b   : > { %3916 = vrot.lane.b32.xlu0 %v4659_v3, %s4601_s8  ;;  %v274_v19 = vsel %vm269_vm2, %v3633_v59, %v3634_v58 }
  0x9c   : > { %v4880_v56 = vpop.permute.xlu1 %3641  ;;  %v276_v18 = vsel %vm269_vm2, %v3628_v61, %v3629_v60  ;;  %v275_v21 = vsel %vm269_vm2, %v3629_v60, %v3633_v59  ;;  %v5052_v59 = vpack.i.bf16 %v4652_v1, %v4655_v2 }
  0x9d   : > { %v4882_v57 = vpop.permute.xlu0 %3636  ;;  %v3644_v13 = vunpack.i.h.bf16 %v4880_v56  ;;  %v7322_v22 = vunpack.i.l.bf16 %v4880_v56 }
  0x9e   : > { %3931 = vrot.lane.b32.xlu1 %v4684_v11, %s7443_s9  ;;  %v7321_v34 = vunpack.i.l.bf16 %v4882_v57 }
  0x9f   : > { %3926 = vrot.lane.b32.xlu0 %v4668_v7, %s7443_s9  ;;  %v277_v36 = vsel %vm269_vm2, %v3644_v13, %v3628_v61  ;;  %v4928_v38 = vsel %vm269_vm2, %v7322_v22, %v3644_v13 }
  0xa0   : > { %v3652_v62 = vpop.permute.xlu1 %3651  ;;  %v4948_v53 = vsel %vm269_vm2, %v3634_v58, %v7321_v34 }
  0xa1   : > { %v3654_v63 = vunpack.i.h.bf16 %v3652_v62  ;;  %v3653_v5 = vunpack.i.l.bf16 %v3652_v62  ;;  %v3647_v6 = vpop.permute.xlu0 %3646 }
  0xa2   : > { %v3649_v14 = vunpack.i.h.bf16 %v3647_v6  ;;  %v3648_v17 = vunpack.i.l.bf16 %v3647_v6  ;;  %3941 = vrot.lane.b32.xlu1 %v4678_v10, %s7443_s9 }
  0xa3   : > { %3936 = vrot.lane.b32.xlu0 %v4659_v3, %s7443_s9  ;;  %v307_v20 = vsel %vm302_vm3, %v3653_v5, %v3654_v63 }
  0xa4   : > { %v4904_v23 = vpop.permute.xlu1 %3661  ;;  %v309_v24 = vsel %vm302_vm3, %v3648_v17, %v3649_v14  ;;  %v3190_v25 = vpack.c.bf16 %v307_v20, %v274_v19  ;;  %v308_v26 = vsel %vm302_vm3, %v3649_v14, %v3653_v5 }
  0xa5   : > { %v3664_v27 = vunpack.i.h.bf16 %v4904_v23  ;;  %v7335_v28 = vunpack.i.l.bf16 %v4904_v23  ;;  %v4912_v30 = vpop.permute.xlu0 %3656  ;;  %v3138_v31 = vpack.c.bf16 %v309_v24, %v276_v18  ;;  %v3192_v32 = vpack.c.bf16 %v308_v26, %v275_v21 }
  0xa6   : > { %v7323_v35 = vunpack.i.l.bf16 %v4912_v30  ;;  %3951 = vrot.lane.b32.xlu1 %v4684_v11, %s7329_s10  ;;  %3191 = vmatprep.subr.bf16.mxu1 %v3190_v25 }
  0xa7   : > { %3946 = vrot.lane.b32.xlu0 %v4668_v7, %s7329_s10  ;;  %3139 = vmatprep.subr.bf16.mxu0 %v3138_v31  ;;  %v310_v37 = vsel %vm302_vm3, %v3664_v27, %v3648_v17  ;;  %v4934_v41 = vsel %vm302_vm3, %v7335_v28, %v3664_v27 }
  0xa8   : > { %v4940_v42 = vsel %vm302_vm3, %v3654_v63, %v7323_v35  ;;  %3193 = vmatpush1.bf16.msra.mxu1 %v3192_v32  ;;  %v3672_v44 = vpop.permute.xlu1 %3671  ;;  %v3140_v45 = vpack.c.bf16 %v310_v37, %v277_v36 }
  0xa9   : > { %v3667_v51 = vpop.permute.xlu0 %3666  ;;  %v3674_v58 = vunpack.i.h.bf16 %v3672_v44  ;;  %v3673_v62 = vunpack.i.l.bf16 %v3672_v44 }
  0xaa   : > { %3961 = vrot.lane.b32.xlu1 %v4678_v10, %s7329_s10  ;;  %3141 = vmatpush1.bf16.msra.mxu0 %v3140_v45  ;;  %v3669_v63 = vunpack.i.h.bf16 %v3667_v51  ;;  %v3668_v5 = vunpack.i.l.bf16 %v3667_v51 }
  0xab   : > { %3956 = vrot.lane.b32.xlu0 %v4659_v3, %s7329_s10  ;;  %v340_v24 = vsel %vm335_vm4, %v3673_v62, %v3674_v58  ;;  %s4610_s10 = smov 17  }
  0xac   : > { %v4956_v60 = vpop.permute.xlu1 %3681  ;;  %v342_v21 = vsel %vm335_vm4, %v3668_v5, %v3669_v63  ;;  %v341_v26 = vsel %vm335_vm4, %v3669_v63, %v3673_v62 }
  0xad   : > { %v4958_v61 = vpop.permute.xlu0 %3676  ;;  %v3684_v18 = vunpack.i.h.bf16 %v4956_v60  ;;  %v7318_v27 = vunpack.i.l.bf16 %v4956_v60 }
  0xae   : > { %3971 = vrot.lane.b32.xlu1 %v4684_v11, %s7327_s11  ;;  %v7317_v62 = vunpack.i.l.bf16 %v4958_v61 }
  0xaf   : > { %3966 = vrot.lane.b32.xlu0 %v4668_v7, %s7327_s11 }
  0xb0   : > { %v3692_v6 = vpop.permute.xlu1 %3691 }
  0xb1   : > { %v3694_v13 = vunpack.i.h.bf16 %v3692_v6  ;;  %v3693_v14 = vunpack.i.l.bf16 %v3692_v6  ;;  %v3687_v17 = vpop.permute.xlu0 %3686 }
  0xb2   : > { %v3689_v19 = vunpack.i.h.bf16 %v3687_v17  ;;  %v3688_v20 = vunpack.i.l.bf16 %v3687_v17  ;;  %3981 = vrot.lane.b32.xlu1 %v4678_v10, %s7327_s11 }
  0xb3   : > { %3976 = vrot.lane.b32.xlu0 %v4659_v3, %s7327_s11  ;;  %v373_v25 = vsel %vm368_vm5, %v3693_v14, %v3694_v13  ;;  %s7599_s11 = smov 37  }
  0xb4   : > { %v4980_v31 = vpop.permute.xlu1 %3701  ;;  %v375_v32 = vsel %vm368_vm5, %v3688_v20, %v3689_v19  ;;  %v3194_v36 = vpack.c.bf16 %v373_v25, %v340_v24  ;;  %v374_v37 = vsel %vm368_vm5, %v3689_v19, %v3693_v14  ;;  %v343_v14 = vsel %vm335_vm4, %v3684_v18, %v3668_v5 }
  0xb5   : > { %v3704_v44 = vunpack.i.h.bf16 %v4980_v31  ;;  %v7320_v45 = vunpack.i.l.bf16 %v4980_v31  ;;  %v4988_v51 = vpop.permute.xlu0 %3696  ;;  %v3142_v6 = vpack.c.bf16 %v375_v32, %v342_v21  ;;  %v3196_v17 = vpack.c.bf16 %v374_v37, %v341_v26 }
  0xb6   : > { %v7319_v63 = vunpack.i.l.bf16 %v4988_v51  ;;  %3991 = vrot.lane.b32.xlu1 %v4684_v11, %s7325_s14  ;;  %3195 = vmatprep.subr.bf16.mxu1 %v3194_v36  ;;  %v5004_v21 = vsel %vm335_vm4, %v7318_v27, %v3684_v18  ;;  %v5026_v32 = vsel %vm335_vm4, %v3674_v58, %v7317_v62  ;;  %v5042_v58 = vpack.i.bf16 %v4671_v8, %v4662_v4 }
  0xb7   : > { %3986 = vrot.lane.b32.xlu0 %v4668_v7, %s7325_s14  ;;  %3143 = vmatprep.subr.bf16.mxu0 %v3142_v6  ;;  %v376_v19 = vsel %vm368_vm5, %v3704_v44, %v3688_v20  ;;  %v5010_v24 = vsel %vm368_vm5, %v7320_v45, %v3704_v44  ;;  %7497 = vst [vmem:[#allocation5_spill] sm:$0xff] %v5026_v32 }
  0xb8   : > { %v5016_v5 = vsel %vm368_vm5, %v3694_v13, %v7319_v63  ;;  %3197 = vmatpush1.bf16.msra.mxu1 %v3196_v17  ;;  %v5018_v20 = vpop.permute.xlu1 %3711  ;;  %v3144_v25 = vpack.c.bf16 %v376_v19, %v343_v14 }
  0xb9   : > { %7496 = vst [vmem:[#allocation4_spill] sm:$0xff] %v5016_v5  ;;  %v3707_v26 = vpop.permute.xlu0 %3706  ;;  %v3714_v44 = vunpack.i.h.bf16 %v5018_v20  ;;  %v3713_v6 = vunpack.i.l.bf16 %v5018_v20  ;;  %v4025_v20 = vpack.i.bf16 %v4649_v0, %v4674_v9 }
  0xba   : > { %4001 = vrot.lane.b32.xlu1 %v4678_v10, %s7325_s14  ;;  %3145 = vmatpush1.bf16.msra.mxu0 %v3144_v25  ;;  %v3709_v17 = vunpack.i.h.bf16 %v3707_v26  ;;  %v3708_v14 = vunpack.i.l.bf16 %v3707_v26 }
  0xbb   : > { %3996 = vrot.lane.b32.xlu0 %v4659_v3, %s7325_s14  ;;  %s4609_s14 = smov 18  }
  0xbc   : > { %v5034_v36 = vpop.permute.xlu1 %3721  ;;  %v407_v63 = vsel %vm7451_vm6, %v3709_v17, %v3713_v6 }
  0xbd   : > { %v5036_v37 = vpop.permute.xlu0 %3716  ;;  %v3724_v26 = vunpack.i.h.bf16 %v5034_v36 }
  0xbe   : > { %4011 = vrot.lane.b32.xlu1 %v4684_v11, %s4606_s15 }
  0xbf   : > { %4006 = vrot.lane.b32.xlu0 %v4668_v7, %s4606_s15  ;;  %v408_v7 = vsel %vm7451_vm6, %v3708_v14, %v3709_v17 }
  0xc0   : > { %v3732_v19 = vpop.permute.xlu1 %3731 }
  0xc1   : > { %v3734_v25 = vunpack.i.h.bf16 %v3732_v19  ;;  %v3733_v11 = vunpack.i.l.bf16 %v3732_v19  ;;  %v3727_v13 = vpop.permute.xlu0 %3726  ;;  %v406_v19 = vsel %vm7451_vm6, %v3713_v6, %v3714_v44  ;;  %v7331_v6 = vunpack.i.l.bf16 %v5036_v37 }
  0xc2   : > { %v3729_v62 = vunpack.i.h.bf16 %v3727_v13  ;;  %v3728_v18 = vunpack.i.l.bf16 %v3727_v13  ;;  %4021 = vrot.lane.b32.xlu1 %v5042_v58, %s4607_s16  ;;  %v7332_v13 = vunpack.i.l.bf16 %v5034_v36 }
  0xc3   : > { %4016 = vrot.lane.b32.xlu0 %v4659_v3, %s4606_s15  ;;  %v439_v27 = vsel %vm434_vm7, %v3733_v11, %v3734_v25 }
  0xc4   : > { %v5070_v55 = vpop.permute.xlu1 %3741  ;;  %v441_v45 = vsel %vm434_vm7, %v3728_v18, %v3729_v62  ;;  %v3198_v3 = vpack.c.bf16 %v439_v27, %v406_v19  ;;  %v440_v34 = vsel %vm434_vm7, %v3729_v62, %v3733_v11  ;;  %v409_v27 = vsel %vm7451_vm6, %v3724_v26, %v3708_v14 }
  0xc5   : > { %v3744_v50 = vunpack.i.h.bf16 %v5070_v55  ;;  %v7334_v22 = vunpack.i.l.bf16 %v5070_v55  ;;  %v5078_v35 = vpop.permute.xlu0 %3736  ;;  %v3146_v48 = vpack.c.bf16 %v441_v45, %v408_v7  ;;  %v3200_v52 = vpack.c.bf16 %v440_v34, %v407_v63 }
  0xc6   : > { %v7333_v17 = vunpack.i.l.bf16 %v5078_v35  ;;  %4031 = vrot.lane.b32.xlu1 %v5052_v59, %s4607_s16  ;;  %3199 = vmatprep.subr.bf16.mxu1 %v3198_v3  ;;  %v5093_v34 = vsel %vm7451_vm6, %v7332_v13, %v3724_v26 }
  0xc7   : > { %4026 = vrot.lane.b32.xlu0 %v4025_v20, %s4607_s16  ;;  %3147 = vmatprep.subr.bf16.mxu0 %v3146_v48  ;;  %v442_v62 = vsel %vm434_vm7, %v3744_v50, %v3728_v18  ;;  %7498 = vst [vmem:[#allocation6_spill] sm:$0xff] %v5093_v34  ;;  %v5099_v45 = vsel %vm434_vm7, %v7334_v22, %v3744_v50 }
  0xc8   : > { %7499 = vst [vmem:[#allocation7_spill] sm:$0xff] %v5099_v45  ;;  %v5105_v48 = vsel %vm434_vm7, %v3734_v25, %v7333_v17  ;;  %3201 = vmatpush1.bf16.msra.mxu1 %v3200_v52  ;;  %v5107_v63 = vpop.permute.xlu1 %3751  ;;  %v3148_v18 = vpack.c.bf16 %v442_v62, %v409_v27  ;;  %v5115_v50 = vsel %vm7451_vm6, %v3714_v44, %v7331_v6  ;;  %v176_v44 = vld [vmem:[%s7314_s1] sm:$0xff] }
  0xc9   : > { %7500 = vst [vmem:[#allocation8_spill] sm:$0xff] %v5105_v48  ;;  %v3747_v11 = vpop.permute.xlu0 %3746  ;;  %7501 = vst [vmem:[#allocation9_spill] sm:$0xff] %v5115_v50  ;;  %v3754_v7 = vunpack.i.h.bf16 %v5107_v63  ;;  %v5133_v27 = vcombine.high %v176_v44, %v176_v44  ;;  %v3753_v62 = vunpack.i.l.bf16 %v5107_v63 }
  0xca   : > { %4041 = vrot.lane.b32.xlu1 %v4025_v20, %s4608_s17  ;;  %3149 = vmatpush1.bf16.msra.mxu0 %v3148_v18  ;;  %v3749_v19 = vunpack.i.h.bf16 %v3747_v11  ;;  %v3748_v3 = vunpack.i.l.bf16 %v3747_v11 }
  0xcb   : > { %4036 = vrot.lane.b32.xlu0 %v5042_v58, %s4608_s17  ;;  %3115 = vmatprep.mubr.msk.f32.mxu1 %vm1271_vm10, %v5133_v27 }
  0xcc   : > { %v5122_v25 = vpop.permute.xlu1 %3761  ;;  %3114 = vmatprep.mubr.msk.f32.mxu0 %vm1271_vm10, %v5133_v27  ;;  %v474_v44 = vsel %vm7441_vm8, %v3748_v3, %v3749_v19  ;;  %v473_v22 = vsel %vm7441_vm8, %v3749_v19, %v3753_v62 }
  0xcd   : > { %7502 = vst [vmem:[#allocation10_spill] sm:$0xff] %v5122_v25  ;;  %v5124_v26 = vpop.permute.xlu0 %3756  ;;  %v3764_v63 = vunpack.i.h.bf16 %v5122_v25  ;;  %v7343_v48 = vunpack.i.l.bf16 %v5122_v25 }
  0xce   : > { %4051 = vrot.lane.b32.xlu1 %v4025_v20, %s4609_s14  ;;  %v7342_v32 = vunpack.i.l.bf16 %v5124_v26 }
  0xcf   : > { %4046 = vrot.lane.b32.xlu0 %v5042_v58, %s4609_s14 }
  0xd0   : > { %v3772_v18 = vpop.permute.xlu1 %3771 }
  0xd1   : > { %v3774_v20 = vunpack.i.h.bf16 %v3772_v18  ;;  %v3773_v52 = vunpack.i.l.bf16 %v3772_v18  ;;  %v3767_v14 = vpop.permute.xlu0 %3766  ;;  %v472_v18 = vsel %vm7441_vm8, %v3753_v62, %v3754_v7 }
  0xd2   : > { %v3769_v58 = vunpack.i.h.bf16 %v3767_v14  ;;  %v3768_v11 = vunpack.i.l.bf16 %v3767_v14  ;;  %4061 = vrot.lane.b32.xlu1 %v5052_v59, %s4609_s14 }
  0xd3   : > { %4056 = vrot.lane.b32.xlu0 %v5052_v59, %s4608_s17  ;;  %v505_v6 = vsel %vm7439_vm9, %v3773_v52, %v3774_v20 }
  0xd4   : > { %v5153_v13 = vpop.permute.xlu1 %3781  ;;  %v507_v14 = vsel %vm7439_vm9, %v3768_v11, %v3769_v58  ;;  %v3202_v17 = vpack.c.bf16 %v505_v6, %v472_v18  ;;  %v506_v59 = vsel %vm7439_vm9, %v3769_v58, %v3773_v52  ;;  %v475_v52 = vsel %vm7441_vm8, %v3764_v63, %v3748_v3 }
  0xd5   : > { %v3784_v28 = vunpack.i.h.bf16 %v5153_v13  ;;  %v7345_v43 = vunpack.i.l.bf16 %v5153_v13  ;;  %v5163_v29 = vpop.permute.xlu0 %3776  ;;  %v3150_v39 = vpack.c.bf16 %v507_v14, %v474_v44  ;;  %v3204_v50 = vpack.c.bf16 %v506_v59, %v473_v22 }
  0xd6   : > { %v7344_v6 = vunpack.i.l.bf16 %v5163_v29  ;;  %1024 = vrot.lane.b32.xlu1 %v4671_v8, %s4610_s10  ;;  %3203 = vmatprep.subr.bf16.mxu1 %v3202_v17 }
  0xd7   : > { %1022 = vrot.lane.b32.xlu0 %v4662_v4, %s4610_s10  ;;  %3151 = vmatprep.subr.bf16.mxu0 %v3150_v39  ;;  %v508_v22 = vsel %vm7439_vm9, %v3784_v28, %v3768_v11  ;;  %v5188_v4 = vsel %vm7441_vm8, %v7343_v48, %v3764_v63  ;;  %v5194_v39 = vsel %vm7439_vm9, %v7345_v43, %v3784_v28 }
  0xd8   : > { %v5180_v19 = vsel %vm7439_vm9, %v3774_v20, %v7344_v6  ;;  %3205 = vmatpush1.bf16.msra.mxu1 %v3204_v50  ;;  %v5182_v62 = vpop.permute.xlu1 %3791  ;;  %v3152_v8 = vpack.c.bf16 %v508_v22, %v475_v52  ;;  %7504 = vst [vmem:[#allocation12_spill] sm:$0xff] %v5188_v4  ;;  %7505 = vst [vmem:[#allocation13_spill] sm:$0xff] %v5194_v39  ;;  %v5202_v50 = vsel %vm7441_vm8, %v3754_v7, %v7342_v32 }
  0xd9   : > { %7503 = vst [vmem:[#allocation11_spill] sm:$0xff] %v5180_v19  ;;  %v3787_v17 = vpop.permute.xlu0 %3786  ;;  %7506 = vst [vmem:[#allocation14_spill] sm:$0xff] %v5202_v50  ;;  %v3794_v11 = vunpack.i.h.bf16 %v5182_v62  ;;  %v3793_v7 = vunpack.i.l.bf16 %v5182_v62 }
  0xda   : > { %1028 = vrot.lane.b32.xlu1 %v4649_v0, %s4610_s10  ;;  %3153 = vmatpush1.bf16.msra.mxu0 %v3152_v8  ;;  %v3789_v63 = vunpack.i.h.bf16 %v3787_v17  ;;  %v3788_v0 = vunpack.i.l.bf16 %v3787_v17 }
  0xdb   : > { %1026 = vrot.lane.b32.xlu0 %v4674_v9, %s4610_s10  ;;  %v538_v62 = vsel %vm7442_vm11, %v3793_v7, %v3794_v11 }
  0xdc   : > { %v5210_v20 = vpop.permute.xlu1 %3801  ;;  %v540_v8 = vsel %vm7442_vm11, %v3788_v0, %v3789_v63 }
  0xdd   : > { %7507 = vst [vmem:[#allocation15_spill] sm:$0xff] %v5210_v20  ;;  %v5212_v58 = vpop.permute.xlu0 %3796  ;;  %v3804_v59 = vunpack.i.h.bf16 %v5210_v20 }
  0xde   : > { %4066 = vrot.lane.b32.xlu1 %v4678_v10, %s4606_s15 }
  0xdf   : > { %1020 = vrot.lane.b32.xlu0 %v4655_v2, %s4610_s10 }
  0xe0   : > { %v3812_v9 = vpop.permute.xlu1 %3811 }
  0xe1   : > { %v3814_v44 = vunpack.i.h.bf16 %v3812_v9  ;;  %v3813_v18 = vunpack.i.l.bf16 %v3812_v9  ;;  %v3807_v14 = vpop.permute.xlu0 %3806  ;;  %v539_v9 = vsel %vm7442_vm11, %v3789_v63, %v3793_v7 }
  0xe2   : > { %v3809_v52 = vunpack.i.h.bf16 %v3807_v14  ;;  %v3808_v22 = vunpack.i.l.bf16 %v3807_v14  ;;  %4076 = vrot.lane.b32.xlu1 %v4678_v10, %s4608_s17 }
  0xe3   : > { %4071 = vrot.lane.b32.xlu0 %v4678_v10, %s4607_s16  ;;  %v571_v17 = vsel %vm7440_vm12, %v3813_v18, %v3814_v44 }
  0xe4   : > { %v5237_v28 = vpop.permute.xlu1 %3821  ;;  %v573_v3 = vsel %vm7440_vm12, %v3808_v22, %v3809_v52  ;;  %v3206_v32 = vpack.c.bf16 %v571_v17, %v538_v62  ;;  %v572_v48 = vsel %vm7440_vm12, %v3809_v52, %v3813_v18  ;;  %v541_v62 = vsel %vm7442_vm11, %v3804_v59, %v3788_v0 }
  0xe5   : > { %7508 = vst [vmem:[#allocation16_spill] sm:$0xff] %v5237_v28  ;;  %v3824_v6 = vunpack.i.h.bf16 %v5237_v28  ;;  %v7347_v43 = vunpack.i.l.bf16 %v5237_v28  ;;  %v5245_v2 = vpop.permute.xlu0 %3816  ;;  %v3154_v7 = vpack.c.bf16 %v573_v3, %v540_v8  ;;  %v3208_v63 = vpack.c.bf16 %v572_v48, %v539_v9  ;;  %v5257_v3 = vld [vmem:[%s4646_s18 + $0x50] sm:$0xff]  ;;  %v5260_v48 = vld [vmem:[%s4646_s18 + $0x58] sm:$0xff]  ;;  %v5287_v8 = vld [vmem:[%s4646_s18 + $0x48] sm:$0xff] }
  0xe6   : > { %v7346_v14 = vunpack.i.l.bf16 %v5245_v2  ;;  %1030 = vrot.lane.b32.xlu1 %v4652_v1, %s4610_s10  ;;  %3207 = vmatprep.subr.bf16.mxu1 %v3206_v32  ;;  %v7509_v52 = vunpack.i.l.bf16 %v5210_v20  ;;  %v7514_v17 = vunpack.i.l.bf16 %v5212_v58 }
  0xe7   : > { %4081 = vrot.lane.b32.xlu0 %v4678_v10, %s4609_s14  ;;  %3155 = vmatprep.subr.bf16.mxu0 %v3154_v7  ;;  %v574_v18 = vsel %vm7440_vm12, %v3824_v6, %v3808_v22  ;;  %v5272_v10 = vsel %vm7440_vm12, %v7347_v43, %v3824_v6  ;;  %v5311_v6 = vld [vmem:[%s4646_s18 + $0x30] sm:$0xff]  ;;  %v4561_v43 = vld [vmem:[%s4646_s18 + $0x18] sm:$0xff] }
  0xe8   : > { %v5266_v1 = vsel %vm7442_vm11, %v7509_v52, %v3804_v59  ;;  %7511 = vst [vmem:[#allocation18_spill] sm:$0xff] %v5272_v10  ;;  %v5278_v32 = vsel %vm7440_vm12, %v3814_v44, %v7346_v14  ;;  %3209 = vmatpush1.bf16.msra.mxu1 %v3208_v63  ;;  %v5280_v0 = vpop.permute.xlu1 %3831  ;;  %v3156_v22 = vpack.c.bf16 %v574_v18, %v541_v62  ;;  %v5284_v59 = vld [vmem:[%s4646_s18 + $0x40] sm:$0xff]  ;;  %v5300_v52 = vld [vmem:[%s4646_s18 + $0x38] sm:$0xff]  ;;  %7517 = vst [vmem:[#allocation23_spill] sm:$0xff] %v5311_v6 }
  0xe9   : > { %7510 = vst [vmem:[#allocation17_spill] sm:$0xff] %v5266_v1  ;;  %7512 = vst [vmem:[#allocation19_spill] sm:$0xff] %v5278_v32  ;;  %v5295_v44 = vsel %vm7442_vm11, %v3794_v11, %v7514_v17  ;;  %v7354_v9 = vunpack.i.h.bf16 %v5280_v0  ;;  %v3833_v7 = vunpack.i.l.bf16 %v5280_v0  ;;  %v3827_v63 = vpop.permute.xlu0 %3826  ;;  %v5306_v11 = vpack.i.bf16 %v5260_v48, %v5257_v3 }
  0xea   : > { %7513 = vst [vmem:[#allocation20_spill] sm:$0xff] %v5280_v0  ;;  %7515 = vst [vmem:[#allocation21_spill] sm:$0xff] %v5295_v44  ;;  %v3829_v62 = vunpack.i.h.bf16 %v3827_v63  ;;  %v3828_v18 = vunpack.i.l.bf16 %v3827_v63  ;;  %1034 = vrot.lane.b32.xlu1 %v5300_v52, %s4610_s10  ;;  %3157 = vmatpush1.bf16.msra.mxu0 %v3156_v22  ;;  %v5317_v63 = vpack.i.bf16 %v5287_v8, %v5284_v59 }
  0xeb   : > { %7516 = vst [vmem:[#allocation22_spill] sm:$0xff] %v5300_v52  ;;  %1032 = vrot.lane.b32.xlu0 %v5311_v6, %s4610_s10  ;;  %v604_v22 = vsel %vm7435_vm13, %v3833_v7, %v7354_v9  ;;  %v4562_v6 = vld [vmem:[%s4646_s18 + $0x8] sm:$0xff]  ;;  %v4563_v9 = vld [vmem:[%s4646_s18 + $0x10] sm:$0xff] }
  0xec   : > { %v5323_v14 = vpop.permute.xlu1 %3841  ;;  %v606_v17 = vsel %vm7435_vm13, %v3828_v18, %v3829_v62  ;;  %v3210_v44 = vpack.c.bf16 %v4561_v43, %v604_v22  ;;  %v605_v32 = vsel %vm7435_vm13, %v3829_v62, %v3833_v7  ;;  %v5344_v7 = vld [vmem:[%s4646_s18 + $0x60] sm:$0xff]  ;;  %v3125_v62 = vld [vmem:[%s4646_s18 + $0x78] sm:$0xff] }
  0xed   : > { %7518 = vst [vmem:[#allocation24_spill] sm:$0xff] %v5323_v14  ;;  %v7356_v50 = vunpack.i.h.bf16 %v5323_v14  ;;  %v5331_v19 = vpop.permute.xlu0 %3836  ;;  %v3158_v1 = vpack.c.bf16 %v4562_v6, %v606_v17  ;;  %v3212_v10 = vpack.c.bf16 %v4563_v9, %v605_v32  ;;  %v4564_v17 = vld [vmem:[%s4646_s18] sm:$0xff] }
  0xee   : > { %7519 = vst [vmem:[#allocation25_spill] sm:$0xff] %v5331_v19  ;;  %4091 = vrot.lane.b32.xlu1 %v5306_v11, %s4585_s19  ;;  %3211 = vmatprep.subr.bf16.mxu1 %v3210_v44  ;;  %v5351_v44 = vpack.i.bf16 %v5344_v7, %v3125_v62 }
  0xef   : > { %4086 = vrot.lane.b32.xlu0 %v5317_v63, %s4585_s19  ;;  %3159 = vmatprep.subr.bf16.mxu0 %v3158_v1  ;;  %v607_v43 = vsel %vm7435_vm13, %v7356_v50, %v3828_v18  ;;  %vm1036_vm13 = vcmp.lt.s32.totalorder %v4804_v15, 17 }
  0xf0   : > { %3213 = vmatpush1.bf16.msra.mxu1 %v3212_v10  ;;  %v3852_v6 = vpop.permute.xlu1 %3851  ;;  %v3160_v32 = vpack.c.bf16 %v4564_v17, %v607_v43 }
  0xf1   : > { %v3847_v9 = vpop.permute.xlu0 %3846  ;;  %v3853_v10 = vunpack.i.l.bf16 %v3852_v6  ;;  %v3854_v0 = vunpack.i.h.bf16 %v3852_v6 }
  0xf2   : > { %4101 = vrot.lane.b32.xlu1 %v5306_v11, %s4586_s20  ;;  %3161 = vmatpush1.bf16.msra.mxu0 %v3160_v32  ;;  %v3849_v22 = vunpack.i.h.bf16 %v3847_v9  ;;  %v3848_v43 = vunpack.i.l.bf16 %v3847_v9 }
  0xf3   : > { %4096 = vrot.lane.b32.xlu0 %v5317_v63, %s4586_s20 }
  0xf4   : > { %v5355_v1 = vpop.permute.xlu1 %3861  ;;  %v646_v9 = vsel %vm7372_vm14, %v3849_v22, %v3853_v10  ;;  %v647_v20 = vsel %vm7372_vm14, %v3848_v43, %v3849_v22 }
  0xf5   : > { %7520 = vst [vmem:[#allocation26_spill] sm:$0xff] %v5355_v1  ;;  %v5357_v18 = vpop.permute.xlu0 %3856  ;;  %v7524_v22 = vunpack.i.h.bf16 %v5355_v1 }
  0xf6   : > { %7521 = vst [vmem:[#allocation27_spill] sm:$0xff] %v5357_v18  ;;  %4111 = vrot.lane.b32.xlu1 %v5351_v44, %s4586_s20  ;;  %v3858_v28 = vunpack.i.l.bf16 %v5357_v18 }
  0xf7   : > { %4106 = vrot.lane.b32.xlu0 %v5351_v44, %s4585_s19 }
  0xf8   : > { %v3872_v62 = vpop.permute.xlu1 %3871 }
  0xf9   : > { %v3873_v17 = vunpack.i.l.bf16 %v3872_v62  ;;  %v3867_v32 = vpop.permute.xlu0 %3866  ;;  %v3874_v39 = vunpack.i.h.bf16 %v3872_v62  ;;  %v7374_v62 = vunpack.i.h.bf16 %v5357_v18 }
  0xfa   : > { %v3869_v50 = vunpack.i.h.bf16 %v3867_v32  ;;  %v3868_v52 = vunpack.i.l.bf16 %v3867_v32  ;;  %4121 = vrot.lane.b32.xlu1 %v5306_v11, %s4587_s21 }
  0xfb   : > { %4116 = vrot.lane.b32.xlu0 %v5317_v63, %s4587_s21 }
  0xfc   : > { %v5373_v5 = vpop.permute.xlu1 %3881  ;;  %v679_v32 = vsel %vm7373_vm15, %v3869_v50, %v3873_v17  ;;  %v680_v6 = vsel %vm7373_vm15, %v3868_v52, %v3869_v50  ;;  %v678_v50 = vsel %vm7373_vm15, %v3873_v17, %v3874_v39 }
  0xfd   : > { %7522 = vst [vmem:[#allocation28_spill] sm:$0xff] %v5373_v5  ;;  %v7371_v4 = vunpack.i.h.bf16 %v5373_v5  ;;  %v5383_v19 = vpop.permute.xlu0 %3876  ;;  %v3162_v14 = vpack.c.bf16 %v679_v32, %v646_v9  ;;  %v3164_v34 = vpack.c.bf16 %v680_v6, %v647_v20  ;;  %v5397_v9 = vsel %vm7372_vm14, %v7524_v22, %v3848_v43 }
  0xfe   : > { %7523 = vst [vmem:[#allocation29_spill] sm:$0xff] %v5383_v19  ;;  %v7370_v45 = vunpack.i.h.bf16 %v5383_v19  ;;  %v3878_v25 = vunpack.i.l.bf16 %v5383_v19  ;;  %4131 = vrot.lane.b32.xlu1 %v5306_v11, %s4588_s22  ;;  %7525 = vst [vmem:[#allocation30_spill] sm:$0xff] %v5397_v9  ;;  %v644_v32 = vsel %vm7372_vm14, %v3854_v0, %v3858_v28 }
  0xff   : > { %4126 = vrot.lane.b32.xlu0 %v5317_v63, %s4588_s22  ;;  %3163 = vmatprep.subr.bf16.mxu0 %v3162_v14  ;;  %v5403_v20 = vsel %vm7373_vm15, %v7371_v4, %v3868_v52  ;;  %v5423_v52 = vsel %vm7372_vm14, %v3858_v28, %v7374_v62 }
 0x100   : > { %7526 = vst [vmem:[#allocation31_spill] sm:$0xff] %v5403_v20  ;;  %v5409_v14 = vsel %vm7373_vm15, %v3878_v25, %v7370_v45  ;;  %3165 = vmatpush1.bf16.msra.mxu0 %v3164_v34  ;;  %v5411_v17 = vpop.permute.xlu1 %3891  ;;  %v677_v43 = vsel %vm7373_vm15, %v3874_v39, %v3878_v25  ;;  %7528 = vst [vmem:[#allocation33_spill] sm:$0xff] %v5423_v52  ;;  %v645_v34 = vsel %vm7372_vm14, %v3853_v10, %v3854_v0 }
 0x101   : > { %7527 = vst [vmem:[#allocation32_spill] sm:$0xff] %v5409_v14  ;;  %v3887_v22 = vpop.permute.xlu0 %3886  ;;  %v3214_v45 = vpack.c.bf16 %v677_v43, %v644_v32  ;;  %v3216_v4 = vpack.c.bf16 %v678_v50, %v645_v34  ;;  %v3893_v0 = vunpack.i.l.bf16 %v5411_v17  ;;  %vm7387_vm14 = vcmp.lt.s32.totalorder %v4804_v15, 118 }
 0x102   : > { %4141 = vrot.lane.b32.xlu1 %v5351_v44, %s4588_s22  ;;  %v3889_v10 = vunpack.i.h.bf16 %v3887_v22  ;;  %v3888_v50 = vunpack.i.l.bf16 %v3887_v22  ;;  %vm7388_vm15 = vcmp.lt.s32.totalorder %v4804_v15, 117  ;;  %v3894_v25 = vunpack.i.h.bf16 %v5411_v17 }
 0x103   : > { %4136 = vrot.lane.b32.xlu0 %v5351_v44, %s4587_s21  ;;  %3215 = vmatprep.subr.bf16.mxu1 %v3214_v45 }
 0x104   : > { %3217 = vmatpush1.bf16.msra.mxu1 %v3216_v4  ;;  %v5433_v39 = vpop.permute.xlu1 %3901  ;;  %v712_v22 = vsel %vm7387_vm14, %v3889_v10, %v3893_v0  ;;  %v713_v9 = vsel %vm7387_vm14, %v3888_v50, %v3889_v10 }
 0x105   : > { %7529 = vst [vmem:[#allocation34_spill] sm:$0xff] %v5433_v39  ;;  %v5435_v28 = vpop.permute.xlu0 %3896 }
 0x106   : > { %7530 = vst [vmem:[#allocation35_spill] sm:$0xff] %v5435_v28  ;;  %4151 = vrot.lane.b32.xlu1 %v5306_v11, %s4589_s23  ;;  %v3898_v52 = vunpack.i.l.bf16 %v5435_v28 }
 0x107   : > { %4146 = vrot.lane.b32.xlu0 %v5317_v63, %s4589_s23 }
 0x108   : > { %v3912_v32 = vpop.permute.xlu1 %3911 }
 0x109   : > { %v3913_v43 = vunpack.i.l.bf16 %v3912_v32  ;;  %v3907_v45 = vpop.permute.xlu0 %3906  ;;  %v3914_v62 = vunpack.i.h.bf16 %v3912_v32  ;;  %v7389_v32 = vunpack.i.h.bf16 %v5435_v28 }
 0x10a   : > { %v3909_v4 = vunpack.i.h.bf16 %v3907_v45  ;;  %v3908_v34 = vunpack.i.l.bf16 %v3907_v45  ;;  %4161 = vrot.lane.b32.xlu1 %v5306_v11, %s4590_s24 }
 0x10b   : > { %4156 = vrot.lane.b32.xlu0 %v5317_v63, %s4590_s24  ;;  %v744_v10 = vsel %vm7388_vm15, %v3913_v43, %v3914_v62 }
 0x10c   : > { %v5453_v14 = vpop.permute.xlu1 %3921  ;;  %v745_v45 = vsel %vm7388_vm15, %v3909_v4, %v3913_v43  ;;  %v746_v17 = vsel %vm7388_vm15, %v3908_v34, %v3909_v4  ;;  %v7533_v4 = vunpack.i.h.bf16 %v5433_v39 }
 0x10d   : > { %7531 = vst [vmem:[#allocation36_spill] sm:$0xff] %v5453_v14  ;;  %v7385_v6 = vunpack.i.h.bf16 %v5453_v14  ;;  %v5463_v20 = vpop.permute.xlu0 %3916  ;;  %v3166_v18 = vpack.c.bf16 %v745_v45, %v712_v22  ;;  %v3168_v19 = vpack.c.bf16 %v746_v17, %v713_v9  ;;  %v710_v45 = vsel %vm7387_vm14, %v3894_v25, %v3898_v52 }
 0x10e   : > { %7532 = vst [vmem:[#allocation37_spill] sm:$0xff] %v5463_v20  ;;  %v7386_v1 = vunpack.i.h.bf16 %v5463_v20  ;;  %v3918_v5 = vunpack.i.l.bf16 %v5463_v20  ;;  %4171 = vrot.lane.b32.xlu1 %v5351_v44, %s4590_s24  ;;  %v5477_v22 = vsel %vm7387_vm14, %v7533_v4, %v3888_v50 }
 0x10f   : > { %4166 = vrot.lane.b32.xlu0 %v5351_v44, %s4589_s23  ;;  %3167 = vmatprep.subr.bf16.mxu0 %v3166_v18  ;;  %7534 = vst [vmem:[#allocation38_spill] sm:$0xff] %v5477_v22  ;;  %v5483_v9 = vsel %vm7388_vm15, %v7385_v6, %v3908_v34  ;;  %v5503_v34 = vsel %vm7387_vm14, %v3898_v52, %v7389_v32 }
 0x110   : > { %7535 = vst [vmem:[#allocation39_spill] sm:$0xff] %v5483_v9  ;;  %v5489_v18 = vsel %vm7388_vm15, %v3918_v5, %v7386_v1  ;;  %3169 = vmatpush1.bf16.msra.mxu0 %v3168_v19  ;;  %v5491_v43 = vpop.permute.xlu1 %3931  ;;  %v743_v50 = vsel %vm7388_vm15, %v3914_v62, %v3918_v5  ;;  %7537 = vst [vmem:[#allocation41_spill] sm:$0xff] %v5503_v34  ;;  %v711_v19 = vsel %vm7387_vm14, %v3893_v0, %v3894_v25 }
 0x111   : > { %7536 = vst [vmem:[#allocation40_spill] sm:$0xff] %v5489_v18  ;;  %v3927_v4 = vpop.permute.xlu0 %3926  ;;  %v3218_v6 = vpack.c.bf16 %v743_v50, %v710_v45  ;;  %v3220_v1 = vpack.c.bf16 %v744_v10, %v711_v19  ;;  %v3933_v25 = vunpack.i.l.bf16 %v5491_v43  ;;  %vm7403_vm14 = vcmp.lt.s32.totalorder %v4804_v15, 39 }
 0x112   : > { %4181 = vrot.lane.b32.xlu1 %v5306_v11, %s4591_s25  ;;  %v3929_v0 = vunpack.i.h.bf16 %v3927_v4  ;;  %v3928_v10 = vunpack.i.l.bf16 %v3927_v4  ;;  %vm7402_vm15 = vcmp.lt.s32.totalorder %v4804_v15, 38  ;;  %v3934_v5 = vunpack.i.h.bf16 %v5491_v43 }
 0x113   : > { %4176 = vrot.lane.b32.xlu0 %v5317_v63, %s4591_s25  ;;  %3219 = vmatprep.subr.bf16.mxu1 %v3218_v6 }
 0x114   : > { %3221 = vmatpush1.bf16.msra.mxu1 %v3220_v1  ;;  %v5513_v62 = vpop.permute.xlu1 %3941  ;;  %v778_v4 = vsel %vm7403_vm14, %v3929_v0, %v3933_v25  ;;  %v779_v22 = vsel %vm7403_vm14, %v3928_v10, %v3929_v0 }
 0x115   : > { %7538 = vst [vmem:[#allocation42_spill] sm:$0xff] %v5513_v62  ;;  %v5515_v52 = vpop.permute.xlu0 %3936 }
 0x116   : > { %7539 = vst [vmem:[#allocation43_spill] sm:$0xff] %v5515_v52  ;;  %4191 = vrot.lane.b32.xlu1 %v5306_v11, %s4592_s26  ;;  %v3938_v34 = vunpack.i.l.bf16 %v5515_v52 }
 0x117   : > { %4186 = vrot.lane.b32.xlu0 %v5317_v63, %s4592_s26 }
 0x118   : > { %v3952_v45 = vpop.permute.xlu1 %3951 }
 0x119   : > { %v3953_v50 = vunpack.i.l.bf16 %v3952_v45  ;;  %v3947_v6 = vpop.permute.xlu0 %3946  ;;  %v3954_v32 = vunpack.i.h.bf16 %v3952_v45  ;;  %v7404_v45 = vunpack.i.h.bf16 %v5515_v52 }
 0x11a   : > { %v3949_v1 = vunpack.i.h.bf16 %v3947_v6  ;;  %v3948_v19 = vunpack.i.l.bf16 %v3947_v6  ;;  %4201 = vrot.lane.b32.xlu1 %v5351_v44, %s4592_s26 }
 0x11b   : > { %4196 = vrot.lane.b32.xlu0 %v5351_v44, %s4591_s25  ;;  %v810_v0 = vsel %vm7402_vm15, %v3953_v50, %v3954_v32 }
 0x11c   : > { %v5533_v18 = vpop.permute.xlu1 %3961  ;;  %v811_v6 = vsel %vm7402_vm15, %v3949_v1, %v3953_v50  ;;  %v812_v43 = vsel %vm7402_vm15, %v3948_v19, %v3949_v1  ;;  %v7542_v1 = vunpack.i.h.bf16 %v5513_v62 }
 0x11d   : > { %7540 = vst [vmem:[#allocation44_spill] sm:$0xff] %v5533_v18  ;;  %v7401_v17 = vunpack.i.h.bf16 %v5533_v18  ;;  %v5543_v9 = vpop.permute.xlu0 %3956  ;;  %v3170_v28 = vpack.c.bf16 %v811_v6, %v778_v4  ;;  %v3172_v20 = vpack.c.bf16 %v812_v43, %v779_v22  ;;  %v776_v6 = vsel %vm7403_vm14, %v3934_v5, %v3938_v34 }
 0x11e   : > { %7541 = vst [vmem:[#allocation45_spill] sm:$0xff] %v5543_v9  ;;  %v7400_v39 = vunpack.i.h.bf16 %v5543_v9  ;;  %v3958_v14 = vunpack.i.l.bf16 %v5543_v9  ;;  %4211 = vrot.lane.b32.xlu1 %v5306_v11, %s4593_s27  ;;  %v5557_v4 = vsel %vm7403_vm14, %v7542_v1, %v3928_v10 }
 0x11f   : > { %4206 = vrot.lane.b32.xlu0 %v5317_v63, %s4593_s27  ;;  %3171 = vmatprep.subr.bf16.mxu0 %v3170_v28  ;;  %7543 = vst [vmem:[#allocation46_spill] sm:$0xff] %v5557_v4  ;;  %v5563_v22 = vsel %vm7402_vm15, %v7401_v17, %v3948_v19  ;;  %v5583_v19 = vsel %vm7403_vm14, %v3938_v34, %v7404_v45 }
 0x120   : > { %7544 = vst [vmem:[#allocation47_spill] sm:$0xff] %v5563_v22  ;;  %v5569_v28 = vsel %vm7402_vm15, %v3958_v14, %v7400_v39  ;;  %3173 = vmatpush1.bf16.msra.mxu0 %v3172_v20  ;;  %v5571_v50 = vpop.permute.xlu1 %3971  ;;  %v809_v10 = vsel %vm7402_vm15, %v3954_v32, %v3958_v14  ;;  %7546 = vst [vmem:[#allocation49_spill] sm:$0xff] %v5583_v19  ;;  %v777_v20 = vsel %vm7403_vm14, %v3933_v25, %v3934_v5 }
 0x121   : > { %7545 = vst [vmem:[#allocation48_spill] sm:$0xff] %v5569_v28  ;;  %v3967_v1 = vpop.permute.xlu0 %3966  ;;  %v3222_v39 = vpack.c.bf16 %v809_v10, %v776_v6  ;;  %v3224_v17 = vpack.c.bf16 %v810_v0, %v777_v20  ;;  %v3973_v5 = vunpack.i.l.bf16 %v5571_v50  ;;  %vm7418_vm15 = vcmp.lt.s32.totalorder %v4804_v15, 37 }
 0x122   : > { %4221 = vrot.lane.b32.xlu1 %v5306_v11, %s4594_s28  ;;  %v3969_v25 = vunpack.i.h.bf16 %v3967_v1  ;;  %v3968_v0 = vunpack.i.l.bf16 %v3967_v1  ;;  %vm7417_vm14 = vcmp.lt.s32.totalorder %v4804_v15, 29  ;;  %v3974_v14 = vunpack.i.h.bf16 %v5571_v50 }
 0x123   : > { %4216 = vrot.lane.b32.xlu0 %v5317_v63, %s4594_s28  ;;  %3223 = vmatprep.subr.bf16.mxu1 %v3222_v39 }
 0x124   : > { %3225 = vmatpush1.bf16.msra.mxu1 %v3224_v17  ;;  %v5593_v32 = vpop.permute.xlu1 %3981  ;;  %v844_v1 = vsel %vm7418_vm15, %v3969_v25, %v3973_v5  ;;  %v845_v4 = vsel %vm7418_vm15, %v3968_v0, %v3969_v25 }
 0x125   : > { %v5595_v34 = vpop.permute.xlu0 %3976 }
 0x126   : > { %7547 = vst [vmem:[#allocation50_spill] sm:$0xff] %v5595_v34  ;;  %4231 = vrot.lane.b32.xlu1 %v5351_v44, %s4594_s28  ;;  %v3978_v19 = vunpack.i.l.bf16 %v5595_v34 }
 0x127   : > { %4226 = vrot.lane.b32.xlu0 %v5351_v44, %s4593_s27 }
 0x128   : > { %v3992_v6 = vpop.permute.xlu1 %3991 }
 0x129   : > { %v3993_v10 = vunpack.i.l.bf16 %v3992_v6  ;;  %v3987_v39 = vpop.permute.xlu0 %3986  ;;  %v3994_v45 = vunpack.i.h.bf16 %v3992_v6  ;;  %v7419_v6 = vunpack.i.h.bf16 %v5595_v34 }
 0x12a   : > { %v3989_v17 = vunpack.i.h.bf16 %v3987_v39  ;;  %v3988_v20 = vunpack.i.l.bf16 %v3987_v39  ;;  %4241 = vrot.lane.b32.xlu1 %v5306_v11, %s4595_s29 }
 0x12b   : > { %4236 = vrot.lane.b32.xlu0 %v5317_v63, %s4595_s29  ;;  %v876_v25 = vsel %vm7417_vm14, %v3993_v10, %v3994_v45 }
 0x12c   : > { %v5613_v28 = vpop.permute.xlu1 %4001  ;;  %v877_v39 = vsel %vm7417_vm14, %v3989_v17, %v3993_v10  ;;  %v878_v50 = vsel %vm7417_vm14, %v3988_v20, %v3989_v17  ;;  %v7548_v17 = vunpack.i.h.bf16 %v5593_v32 }
 0x12d   : > { %v7416_v43 = vunpack.i.h.bf16 %v5613_v28  ;;  %v5623_v22 = vpop.permute.xlu0 %3996  ;;  %v3174_v52 = vpack.c.bf16 %v877_v39, %v844_v1  ;;  %v3176_v9 = vpack.c.bf16 %v878_v50, %v845_v4  ;;  %v842_v39 = vsel %vm7418_vm15, %v3974_v14, %v3978_v19 }
 0x12e   : > { %v7415_v62 = vunpack.i.h.bf16 %v5623_v22  ;;  %v3998_v18 = vunpack.i.l.bf16 %v5623_v22  ;;  %4251 = vrot.lane.b32.xlu1 %v5306_v11, %s4596_s30  ;;  %v5637_v1 = vsel %vm7418_vm15, %v7548_v17, %v3968_v0 }
 0x12f   : > { %4246 = vrot.lane.b32.xlu0 %v5317_v63, %s4596_s30  ;;  %3175 = vmatprep.subr.bf16.mxu0 %v3174_v52  ;;  %7549 = vst [vmem:[#allocation51_spill] sm:$0xff] %v5637_v1  ;;  %v5643_v4 = vsel %vm7417_vm14, %v7416_v43, %v3988_v20  ;;  %v5661_v20 = vsel %vm7418_vm15, %v3978_v19, %v7419_v6 }
 0x130   : > { %7550 = vst [vmem:[#allocation52_spill] sm:$0xff] %v5643_v4  ;;  %v5649_v52 = vsel %vm7417_vm14, %v3998_v18, %v7415_v62  ;;  %3177 = vmatpush1.bf16.msra.mxu0 %v3176_v9  ;;  %v4012_v10 = vpop.permute.xlu1 %4011  ;;  %v875_v0 = vsel %vm7417_vm14, %v3994_v45, %v3998_v18  ;;  %7552 = vst [vmem:[#allocation54_spill] sm:$0xff] %v5661_v20  ;;  %v843_v9 = vsel %vm7418_vm15, %v3973_v5, %v3974_v14 }
 0x131   : > { %7551 = vst [vmem:[#allocation53_spill] sm:$0xff] %v5649_v52  ;;  %v5663_v17 = vpop.permute.xlu0 %4006  ;;  %v3226_v62 = vpack.c.bf16 %v875_v0, %v842_v39  ;;  %v3228_v43 = vpack.c.bf16 %v876_v25, %v843_v9  ;;  %v4013_v45 = vunpack.i.l.bf16 %v4012_v10  ;;  %vm7427_vm14 = vcmp.lt.s32.totalorder %v4804_v15, 28 }
 0x132   : > { %7553 = vst [vmem:[#allocation55_spill] sm:$0xff] %v5663_v17  ;;  %4261 = vrot.lane.b32.xlu1 %v5351_v44, %s4596_s30  ;;  %v4009_v50 = vunpack.i.h.bf16 %v5663_v17  ;;  %vm7426_vm15 = vcmp.lt.s32.totalorder %v4804_v15, 27  ;;  %v4014_v25 = vunpack.i.h.bf16 %v4012_v10  ;;  %v5682_v0 = vpack.i.bf16 %v5257_v3, %v5287_v8 }
 0x133   : > { %4256 = vrot.lane.b32.xlu0 %v5351_v44, %s4595_s29  ;;  %3227 = vmatprep.subr.bf16.mxu1 %v3226_v62 }
 0x134   : > { %3229 = vmatpush1.bf16.msra.mxu1 %v3228_v43  ;;  %v4022_v19 = vpop.permute.xlu1 %4021  ;;  %v910_v9 = vsel %vm7427_vm14, %v4009_v50, %v4013_v45 }
 0x135   : > { %v4024_v14 = vunpack.i.h.bf16 %v4022_v19  ;;  %v4023_v5 = vunpack.i.l.bf16 %v4022_v19  ;;  %v5676_v39 = vpop.permute.xlu0 %4016 }
 0x136   : > { %7554 = vst [vmem:[#allocation56_spill] sm:$0xff] %v5676_v39  ;;  %4271 = vrot.lane.b32.xlu1 %v5306_v11, %s4597_s4  ;;  %v4018_v43 = vunpack.i.l.bf16 %v5676_v39 }
 0x137   : > { %4266 = vrot.lane.b32.xlu0 %v5317_v63, %s4597_s4  ;;  %v943_v10 = vsel %vm7426_vm15, %v4023_v5, %v4024_v14  ;;  %v5701_v63 = vpack.i.bf16 %v5344_v7, %v5260_v48  ;;  %v909_v48 = vsel %vm7427_vm14, %v4013_v45, %v4014_v25 }
 0x138   : > { %v5692_v19 = vpop.permute.xlu1 %4031  ;;  %v3178_v11 = vpack.c.bf16 %v943_v10, %v910_v9  ;;  %v7556_v9 = vunpack.i.l.bf16 %v5663_v17 }
 0x139   : > { %7555 = vst [vmem:[#allocation57_spill] sm:$0xff] %v5692_v19  ;;  %v7425_v3 = vunpack.i.h.bf16 %v5692_v19  ;;  %v7423_v6 = vunpack.i.l.bf16 %v5692_v19  ;;  %v4027_v62 = vpop.permute.xlu0 %4026 }
 0x13a   : > { %v4029_v20 = vunpack.i.h.bf16 %v4027_v62  ;;  %v4028_v52 = vunpack.i.l.bf16 %v4027_v62  ;;  %4281 = vrot.lane.b32.xlu1 %v5682_v0, %s4598_s5  ;;  %3179 = vmatprep.subr.bf16.mxu0 %v3178_v11  ;;  %v911_v10 = vsel %vm7427_vm14, %v7556_v9, %v4009_v50  ;;  %v908_v11 = vsel %vm7427_vm14, %v4014_v25, %v4018_v43 }
 0x13b   : > { %4276 = vrot.lane.b32.xlu0 %v5351_v44, %s4597_s4  ;;  %v944_v62 = vsel %vm7426_vm15, %v7423_v6, %v4023_v5  ;;  %v7558_v9 = vunpack.i.h.bf16 %v5676_v39 }
 0x13c   : > { %v5721_v44 = vsel %vm7426_vm15, %v4029_v20, %v7425_v3  ;;  %v4042_v18 = vpop.permute.xlu1 %4041  ;;  %v3180_v1 = vpack.c.bf16 %v944_v62, %v911_v10  ;;  %v941_v50 = vsel %vm7426_vm15, %v4028_v52, %v4029_v20  ;;  %v942_v5 = vsel %vm7426_vm15, %v4024_v14, %v4028_v52 }
 0x13d   : > { %7557 = vst [vmem:[#allocation58_spill] sm:$0xff] %v5721_v44  ;;  %v5731_v6 = vsel %vm7427_vm14, %v4018_v43, %v7558_v9  ;;  %v4037_v45 = vpop.permute.xlu0 %4036  ;;  %v3230_v25 = vpack.c.bf16 %v941_v50, %v908_v11  ;;  %v3232_v4 = vpack.c.bf16 %v942_v5, %v909_v48  ;;  %v4044_v20 = vunpack.i.h.bf16 %v4042_v18 }
 0x13e   : > { %7559 = vst [vmem:[#allocation59_spill] sm:$0xff] %v5731_v6  ;;  %4291 = vrot.lane.b32.xlu1 %v5682_v0, %s4599_s6  ;;  %3181 = vmatpush1.bf16.msra.mxu0 %v3180_v1  ;;  %v4039_v62 = vunpack.i.h.bf16 %v4037_v45  ;;  %v4038_v3 = vunpack.i.l.bf16 %v4037_v45  ;;  %v4043_v52 = vunpack.i.l.bf16 %v4042_v18  ;;  %vm1003_vm15 = vcmp.lt.s32.totalorder %v4804_v15, 18 }
 0x13f   : > { %4286 = vrot.lane.b32.xlu0 %v5701_v63, %s4598_s5  ;;  %3231 = vmatprep.subr.bf16.mxu1 %v3230_v25  ;;  %vm970_vm14 = vcmp.lt.s32.totalorder %v4804_v15, 19 }
 0x140   : > { %3233 = vmatpush1.bf16.msra.mxu1 %v3232_v4  ;;  %v4052_v14 = vpop.permute.xlu1 %4051  ;;  %v976_v18 = vsel %vm970_vm14, %v4038_v3, %v4039_v62  ;;  %v974_v4 = vsel %vm970_vm14, %v4043_v52, %v4044_v20 }
 0x141   : > { %v4054_v43 = vunpack.i.h.bf16 %v4052_v14  ;;  %v4053_v11 = vunpack.i.l.bf16 %v4052_v14  ;;  %v4047_v1 = vpop.permute.xlu0 %4046  ;;  %v975_v14 = vsel %vm970_vm14, %v4039_v62, %v4043_v52 }
 0x142   : > { %v4049_v48 = vunpack.i.h.bf16 %v4047_v1  ;;  %v4048_v50 = vunpack.i.l.bf16 %v4047_v1  ;;  %1999 = vrot.lane.b32.xlu1 %v5284_v59, %s4598_s5 }
 0x143   : > { %4296 = vrot.lane.b32.xlu0 %v5701_v63, %s4599_s6  ;;  %v1007_v5 = vsel %vm1003_vm15, %v4053_v11, %v4054_v43 }
 0x144   : > { %v5751_v9 = vpop.permute.xlu1 %4061  ;;  %v1009_v45 = vsel %vm1003_vm15, %v4048_v50, %v4049_v48  ;;  %v3234_v25 = vpack.c.bf16 %v1007_v5, %v974_v4  ;;  %v1008_v1 = vsel %vm1003_vm15, %v4049_v48, %v4053_v11  ;;  %v3619_v48 = vunpack.i.h.bf16 %v4836_v40 }
 0x145   : > { %v7436_v10 = vunpack.i.h.bf16 %v5751_v9  ;;  %v4063_v6 = vunpack.i.l.bf16 %v5751_v9  ;;  %v5761_v44 = vpop.permute.xlu0 %4056  ;;  %v3182_v19 = vpack.c.bf16 %v1009_v45, %v976_v18  ;;  %v3236_v39 = vpack.c.bf16 %v1008_v1, %v975_v14 }
 0x146   : > { %v4059_v17 = vunpack.i.h.bf16 %v5761_v44  ;;  %v4058_v34 = vunpack.i.l.bf16 %v5761_v44  ;;  %4301 = vrot.lane.b32.xlu1 %v5682_v0, %s7437_s7  ;;  %3235 = vmatprep.subr.bf16.mxu1 %v3234_v25  ;;  %v7560_v5 = vunpack.i.l.bf16 %v4826_v33  ;;  %v3659_v25 = vunpack.i.h.bf16 %v4912_v30 }
 0x147   : > { %v5771_v62 = vsel %vm1003_vm15, %v4054_v43, %v7436_v10  ;;  %2031 = vrot.lane.b32.xlu0 %v5284_v59, %s4599_s6  ;;  %3183 = vmatprep.subr.bf16.mxu0 %v3182_v19  ;;  %v1010_v52 = vsel %vm1003_vm15, %v4063_v6, %v4048_v50 }
 0x148   : > { %v5784_v11 = vsel %vm970_vm14, %v4044_v20, %v4059_v17  ;;  %3237 = vmatpush1.bf16.msra.mxu1 %v3236_v39  ;;  %v1025_v43 = vpop.permute.xlu1 %1024  ;;  %v977_v19 = vsel %vm970_vm14, %v4058_v34, %v4038_v3  ;;  %v3599_v3 = vunpack.i.h.bf16 %v4798_v12  ;;  %v238_v45 = vsel %vm236_vm1, %v3619_v48, %v7560_v5 }
 0x149   : > { %v1023_v18 = vpop.permute.xlu0 %1022  ;;  %v3184_v4 = vpack.c.bf16 %v1010_v52, %v977_v19  ;;  %v7561_v19 = vunpack.i.l.bf16 %v4806_v16  ;;  %v7563_v16 = vunpack.i.l.bf16 %v4904_v23  ;;  %v7565_v23 = vunpack.i.l.bf16 %v4798_v12 }
 0x14a   : > { %4311 = vrot.lane.b32.xlu1 %v5682_v0, %s4601_s8  ;;  %v1042_v20 = vsel %vm1036_vm13, %v1023_v18, %v1025_v43 }
 0x14b   : > { %4306 = vrot.lane.b32.xlu0 %v5701_v63, %s7437_s7  ;;  %3185 = vmatpush1.bf16.msra.mxu0 %v3184_v4  ;;  %v205_v33 = vsel %vm203_vm0, %v3599_v3, %v7561_v19  ;;  %v3639_v4 = vunpack.i.h.bf16 %v4882_v57  ;;  %v3699_v19 = vunpack.i.h.bf16 %v4988_v51 }
 0x14c   : > { %1326 = vmatprep.subr.mxu0 %v1042_v20  ;;  %v5799_v39 = vpop.permute.xlu1 %1028  ;;  %v7562_v20 = vunpack.i.l.bf16 %v4836_v40  ;;  %v5840_v40 = vld [vmem:[%s7314_s1] sm:$0xff] }
 0x14d   : > { %v1027_v14 = vpop.permute.xlu0 %1026 }
 0x14e   : > { %2063 = vrot.lane.b32.xlu1 %v5284_v59, %s7437_s7  ;;  %v1040_v1 = vsel %vm1036_vm13, %v1027_v14, %v5799_v39  ;;  %v1041_v52 = vsel %vm1036_vm13, %v1025_v43, %v1027_v14  ;;  %v239_v5 = vsel %vm236_vm1, %v7562_v20, %v3619_v48  ;;  %v3292_v43 = vpack.c.bf16 %v238_v45, %v205_v33  ;;  %s7574_s7 = smov 38  }
 0x14f   : > { %4316 = vrot.lane.b32.xlu0 %v5701_v63, %s4601_s8  ;;  %1397 = vmatprep.subr.mxu1 %v1040_v1  ;;  %v304_v14 = vsel %vm302_vm3, %v3659_v25, %v7563_v16  ;;  %v7564_v1 = vpack.c.bf16 %v4857_v47, %v4851_v46  ;;  %v206_v48 = vsel %vm203_vm0, %v7565_v23, %v3599_v3  ;;  %v7566_v45 = vunpack.i.l.bf16 %v4912_v30 }
 0x150   : > { %1398 = vmatpush1.msra.mxu1 %v1041_v52  ;;  %v5825_v50 = vpop.permute.xlu1 %4066  ;;  %v3238_v47 = vpack.c.bf16 %v239_v5, %v206_v48  ;;  %v7567_v33 = vunpack.i.l.bf16 %v4880_v56  ;;  %v3679_v3 = vunpack.i.h.bf16 %v4958_v61  ;;  %v7570_v5 = vunpack.i.l.bf16 %v4980_v31 }
 0x151   : > { %v5832_v10 = vpop.permute.xlu0 %1020  ;;  %3291 = vmatprep.subr.bf16.mxu1 %v7564_v1  ;;  %1410 = vmatmul.mubr.f32.vlgmr.msra.gmra.mrb[0].mxu1 %v5840_v40  ;;  %v305_v52 = vsel %vm302_vm3, %v7566_v45, %v3659_v25  ;;  %v7569_v25 = vunpack.i.l.bf16 %v4882_v57  ;;  %v3739_v16 = vunpack.i.h.bf16 %v5078_v35  ;;  %v3719_v57 = vunpack.i.h.bf16 %v5036_v37 }
 0x152   : > { %3293 = vmatpush1.bf16.msra.mxu1 %v3292_v43  ;;  %4321 = vrot.lane.b32.xlu1 %v5682_v0, %s7443_s9  ;;  %v1043_v46 = vsel %vm1036_vm13, %v5832_v10, %v1023_v18  ;;  %v271_v12 = vsel %vm269_vm2, %v3639_v4, %v7567_v33  ;;  %v7568_v18 = vpack.c.bf16 %v4934_v41, %v4928_v38  ;;  %v7572_v31 = vunpack.i.l.bf16 %v4988_v51 }
 0x153   : > { %2095 = vrot.lane.b32.xlu0 %v5284_v59, %s4601_s8  ;;  %1327 = vmatpush1.msra.mxu0 %v1043_v46  ;;  %v272_v56 = vsel %vm269_vm2, %v7569_v25, %v3639_v4  ;;  %v3296_v20 = vpack.c.bf16 %v304_v14, %v271_v12  ;;  %v370_v43 = vsel %vm368_vm5, %v3699_v19, %v7570_v5  ;;  %v7573_v14 = vunpack.i.l.bf16 %v4956_v60 }
 0x154   : > { %3295 = vmatprep.subr.bf16.mxu1 %v7568_v18  ;;  %3239 = vmatprep.subr.bf16.mxu0 %v3238_v47  ;;  %v5866_v30 = vpop.permute.xlu1 %4076  ;;  %v3242_v38 = vpack.c.bf16 %v305_v52, %v272_v56  ;;  %v7571_v41 = vpack.c.bf16 %v4864_v49, %v4872_v54  ;;  %v371_v4 = vsel %vm368_vm5, %v7572_v31, %v3699_v19  ;;  %v3779_v48 = vunpack.i.h.bf16 %v5163_v29 }
 0x155   : > { %v5877_v1 = vpop.permute.xlu0 %4071  ;;  %1339 = vmatmul.mubr.f32.vlgmr.msra.gmra.mrb[0].mxu0 %v5840_v40  ;;  %3117 = vmatprep.mubr.msk.f32.mxu1 %vm1271_vm10, %v5133_v27  ;;  %v337_v23 = vsel %vm335_vm4, %v3679_v3, %v7573_v14  ;;  %v3759_v49 = vunpack.i.h.bf16 %v5124_v26  ;;  %v7575_v54 = vpack.c.bf16 %v5010_v24, %v5004_v21  ;;  %v7576_v60 = vunpack.i.l.bf16 %v4958_v61 }
 0x156   : > { %3241 = vmatpush1.bf16.msra.mxu0 %v7571_v41  ;;  %3297 = vmatpush1.bf16.msra.mxu1 %v3296_v20  ;;  %v3300_v46 = vpack.c.bf16 %v370_v43, %v337_v23  ;;  %v7577_v47 = vunpack.i.l.bf16 %v5070_v55  ;;  %v7578_v12 = vunpack.i.l.bf16 %v5078_v35  ;;  %v7579_v61 = vunpack.i.l.bf16 %v5034_v36  ;;  %v7587_v43 = vld [vmem:[#allocation6_spill] sm:$0xff] }
 0x157   : > { %3243 = vmatprep.subr.bf16.mxu0 %v3242_v38  ;;  %4331 = vrot.lane.b32.xlu1 %v5682_v0, %s7574_s7  ;;  %v338_v19 = vsel %vm335_vm4, %v7576_v60, %v3679_v3  ;;  %v3799_v55 = vunpack.i.h.bf16 %v5212_v58  ;;  %v7580_v3 = vpack.c.bf16 %v4940_v42, %v4948_v53  ;;  %v7581_v35 = vunpack.i.l.bf16 %v5036_v37  ;;  %v7584_v37 = vld [vmem:[#allocation10_spill] sm:$0xff] }
 0x158   : > { %4326 = vrot.lane.b32.xlu0 %v5701_v63, %s7443_s9  ;;  %3299 = vmatprep.subr.bf16.mxu1 %v7575_v54  ;;  %v5903_v51 = vpop.permute.xlu1 %1030  ;;  %v436_v45 = vsel %vm434_vm7, %v3739_v16, %v7577_v47  ;;  %v3246_v33 = vpack.c.bf16 %v371_v4, %v338_v19  ;;  %v437_v21 = vsel %vm434_vm7, %v7578_v12, %v3739_v16  ;;  %v7582_v25 = vunpack.i.l.bf16 %v5153_v13  ;;  %v7586_v13 = vld [vmem:[#allocation7_spill] sm:$0xff]  ;;  %v7590_v4 = vld [vmem:[#allocation25_spill] sm:$0xff] }
 0x159   : > { %v5913_v52 = vpop.permute.xlu0 %4081  ;;  %3116 = vmatprep.mubr.msk.f32.mxu0 %vm1271_vm10, %v5133_v27  ;;  %v403_v24 = vsel %vm7451_vm6, %v3719_v57, %v7579_v61  ;;  %v404_v18 = vsel %vm7451_vm6, %v7581_v35, %v3719_v57  ;;  %v3819_v56 = vunpack.i.h.bf16 %v5245_v2  ;;  %v7583_v42 = vunpack.i.l.bf16 %v5163_v29  ;;  %v7589_v29 = vld [vmem:[#allocation24_spill] sm:$0xff]  ;;  %v7592_v19 = vld [vmem:[#allocation15_spill] sm:$0xff] }
 0x15a   : > { %3245 = vmatpush1.bf16.msra.mxu0 %v7580_v3  ;;  %3301 = vmatpush1.bf16.msra.mxu1 %v3300_v46  ;;  %v502_v36 = vsel %vm7439_vm9, %v3779_v48, %v7582_v25  ;;  %v7585_v20 = vunpack.i.l.bf16 %v7584_v37  ;;  %v7588_v16 = vpack.c.bf16 %v7586_v13, %v7587_v43  ;;  %v3250_v57 = vpack.c.bf16 %v437_v21, %v404_v18  ;;  %v7601_v18 = vld [vmem:[#allocation13_spill] sm:$0xff]  ;;  %v7602_v25 = vld [vmem:[#allocation12_spill] sm:$0xff] }
 0x15b   : > { %3247 = vmatprep.subr.bf16.mxu0 %v3246_v33  ;;  %2127 = vrot.lane.b32.xlu1 %v5284_v59, %s7443_s9  ;;  %v503_v53 = vsel %vm7439_vm9, %v7583_v42, %v3779_v48  ;;  %v3304_v41 = vpack.c.bf16 %v436_v45, %v403_v24  ;;  %v3843_v31 = vunpack.i.l.bf16 %v7589_v29  ;;  %v3839_v14 = vunpack.i.h.bf16 %v7590_v4  ;;  %v7594_v33 = vld [vmem:[#allocation4_spill] sm:$0xff]  ;;  %v7595_v45 = vld [vmem:[#allocation5_spill] sm:$0xff]  ;;  %s7617_s9 = smov 29  }
 0x15c   : > { %v469_v5 = vsel %vm7441_vm8, %v3759_v49, %v7585_v20  ;;  %4336 = vrot.lane.b32.xlu0 %v5701_v63, %s7574_s7  ;;  %3303 = vmatprep.subr.bf16.mxu1 %v7588_v16  ;;  %v5953_v38 = vpop.permute.xlu1 %1034  ;;  %v3838_v23 = vunpack.i.l.bf16 %v7590_v4  ;;  %v7591_v54 = vunpack.i.l.bf16 %v5124_v26  ;;  %v7593_v46 = vunpack.i.l.bf16 %v7592_v19  ;;  %v7597_v24 = vld [vmem:[#allocation16_spill] sm:$0xff]  ;;  %v7616_v19 = vld [vmem:[#allocation26_spill] sm:$0xff] }
 0x15d   : > { %v5958_v48 = vpop.permute.xlu0 %1032  ;;  %v7596_v12 = vpack.c.bf16 %v7594_v33, %v7595_v45  ;;  %v3308_v61 = vpack.c.bf16 %v502_v36, %v469_v5  ;;  %v7598_v3 = vunpack.i.l.bf16 %v7597_v24  ;;  %v7603_v36 = vpack.c.bf16 %v7601_v18, %v7602_v25  ;;  %v7611_v43 = vld [vmem:[#allocation28_spill] sm:$0xff]  ;;  %v6024_v33 = vld [vmem:[%s4646_s18 + $0x50] sm:$0xff]  ;;  %v7622_v24 = vld [vmem:[#allocation23_spill] sm:$0xff] }
 0x15e   : > { %v470_v60 = vsel %vm7441_vm8, %v7591_v54, %v3759_v49  ;;  %v535_v47 = vsel %vm7442_vm11, %v3799_v55, %v7593_v46  ;;  %3305 = vmatpush1.bf16.msra.mxu1 %v3304_v41  ;;  %v7600_v49 = vunpack.i.l.bf16 %v5245_v2  ;;  %v7605_v2 = vunpack.i.h.bf16 %v7589_v29  ;;  %v7614_v41 = vld [vmem:[#allocation9_spill] sm:$0xff]  ;;  %v6013_v54 = vld [vmem:[%s4646_s18 + $0x58] sm:$0xff] }
 0x15f   : > { %3249 = vmatpush1.bf16.msra.mxu0 %v7596_v12  ;;  %v3254_v21 = vpack.c.bf16 %v503_v53, %v470_v60  ;;  %v568_v26 = vsel %vm7440_vm12, %v3819_v56, %v7598_v3  ;;  %4341 = vrot.lane.b32.xlu1 %v5682_v0, %s7599_s11  ;;  %v7604_v53 = vunpack.i.l.bf16 %v5212_v58  ;;  %vm7606_vm9 = vcmp.lt.s32.totalorder %v4804_v15, 1 }
 0x160   : > { %3251 = vmatprep.subr.bf16.mxu0 %v3250_v57  ;;  %v569_v35 = vsel %vm7440_vm12, %v7600_v49, %v3819_v56  ;;  %2159 = vrot.lane.b32.xlu0 %v5284_v59, %s7574_s7  ;;  %v5986_v42 = vpop.permute.xlu1 %4091  ;;  %v600_v20 = vsel %vm7606_vm9, %v3843_v31, %v7605_v2  ;;  %vm7607_vm12 = vmmov %vm7606_vm9  ;;  %v7608_v56 = vld [vmem:[#allocation20_spill] sm:$0xff]  ;;  %v3883_v58 = vunpack.i.l.bf16 %v7611_v43  ;;  %v3312_v4 = vpack.c.bf16 %v568_v26, %v535_v47  ;;  %v7620_v47 = vld [vmem:[#allocation17_spill] sm:$0xff] }
 0x161   : > { %3307 = vmatprep.subr.bf16.mxu1 %v7603_v36  ;;  %v536_v37 = vsel %vm7442_vm11, %v7604_v53, %v3799_v55  ;;  %v601_v59 = vsel %vm7607_vm12, %v3839_v14, %v3843_v31  ;;  %v7609_v5 = vunpack.i.h.bf16 %v7608_v56  ;;  %vm7610_vm8 = vmmov %vm7606_vm9  ;;  %v6005_v16 = vpop.permute.xlu0 %4086  ;;  %v7613_v57 = vld [vmem:[#allocation8_spill] sm:$0xff]  ;;  %v6017_v60 = vpack.i.bf16 %v5344_v7, %v6013_v54  ;;  %v7619_v7 = vld [vmem:[#allocation18_spill] sm:$0xff] }
 0x162   : > { %vm7612_vm11 = vmmov %vm7610_vm8  ;;  %v7615_v29 = vpack.c.bf16 %v7613_v57, %v7614_v41  ;;  %3309 = vmatpush1.bf16.msra.mxu1 %v3308_v61  ;;  %v3258_v31 = vpack.c.bf16 %v569_v35, %v536_v37  ;;  %v3863_v46 = vunpack.i.l.bf16 %v7616_v19  ;;  %v6028_v45 = vpack.i.bf16 %v6024_v33, %v5287_v8  ;;  %v4569_v26 = vld [vmem:[%s4646_s18 + $0x20] sm:$0xff]  ;;  %v7626_v36 = vld [vmem:[#allocation29_spill] sm:$0xff] }
 0x163   : > { %v6002_v13 = vsel %vm7610_vm8, %v7609_v5, %v3838_v23  ;;  %v602_v55 = vsel %vm7612_vm11, %v3838_v23, %v3839_v14  ;;  %4351 = vrot.lane.b32.xlu1 %v5682_v0, %s7617_s9  ;;  %v7618_v14 = vld [vmem:[#allocation22_spill] sm:$0xff]  ;;  %v7621_v12 = vpack.c.bf16 %v7619_v7, %v7620_v47  ;;  %v4568_v0 = vld [vmem:[%s4646_s18 + $0x28] sm:$0xff]  ;;  %v3316_v3 = vpack.c.bf16 %v7622_v24, %v601_v59  ;;  %v7625_v35 = vld [vmem:[#allocation36_spill] sm:$0xff] }
 0x164   : > { %3253 = vmatpush1.bf16.msra.mxu0 %v7615_v29  ;;  %v3314_v23 = vpack.c.bf16 %v7618_v14, %v600_v20  ;;  %4346 = vrot.lane.b32.xlu0 %v5701_v63, %s7599_s11  ;;  %v3262_v61 = vpack.c.bf16 %v4568_v0, %v602_v55  ;;  %v3264_v8 = vpack.c.bf16 %v4569_v26, %v6002_v13  ;;  %v7623_v49 = vunpack.i.h.bf16 %v7611_v43  ;;  %v7631_v59 = vld [vmem:[#allocation11_spill] sm:$0xff]  ;;  %v7632_v56 = vld [vmem:[#allocation14_spill] sm:$0xff]  ;;  %v6060_v13 = vld [vmem:[%s4646_s18 + $0x48] sm:$0xff] }
 0x165   : > { %3255 = vmatprep.subr.bf16.mxu0 %v3254_v21  ;;  %3311 = vmatprep.subr.bf16.mxu1 %v7621_v12  ;;  %v6035_v21 = vpop.permute.xlu1 %4101  ;;  %vm7624_vm8 = vcmp.lt.s32.totalorder %v4804_v15, 119  ;;  %v3923_v18 = vunpack.i.l.bf16 %v7625_v35  ;;  %v6046_v25 = vpop.permute.xlu0 %4096  ;;  %v7627_v53 = vunpack.i.h.bf16 %v7626_v36  ;;  %v7629_v2 = vunpack.i.h.bf16 %v7616_v19  ;;  %v3123_v55 = vld [vmem:[%s4646_s18 + $0x68] sm:$0xff]  ;;  %v3124_v57 = vld [vmem:[%s4646_s18 + $0x70] sm:$0xff]  ;;  %v6070_v29 = vld [vmem:[%s4646_s18 + $0x40] sm:$0xff] }
 0x166   : > { %v674_v63 = vsel %vm7624_vm8, %v3883_v58, %v7623_v49  ;;  %vm7628_vm9 = vmmov %vm7624_vm8  ;;  %vm7630_vm11 = vcmp.lt.s32.totalorder %v4804_v15, 127  ;;  %v7633_v5 = vpack.c.bf16 %v7631_v59, %v7632_v56  ;;  %3313 = vmatpush1.bf16.msra.mxu1 %v3312_v4  ;;  %v6064_v43 = vpack.i.bf16 %v6024_v33, %v6060_v13  ;;  %v7634_v41 = vld [vmem:[#allocation34_spill] sm:$0xff]  ;;  %v7635_v19 = vld [vmem:[#allocation27_spill] sm:$0xff] }
 0x167   : > { %v675_v37 = vsel %vm7628_vm9, %v7627_v53, %v3883_v58  ;;  %v641_v20 = vsel %vm7630_vm11, %v3863_v46, %v7629_v2  ;;  %v3903_v58 = vunpack.i.l.bf16 %v7634_v41  ;;  %2191 = vrot.lane.b32.xlu1 %v6070_v29, %s7599_s11  ;;  %v7636_v14 = vunpack.i.h.bf16 %v7635_v19  ;;  %vm7637_vm12 = vmmov %vm7630_vm11  ;;  %3315 = vmatprep.subr.bf16.mxu1 %v3314_v23  ;;  %v7638_v26 = vld [vmem:[#allocation37_spill] sm:$0xff]  ;;  %v7644_v59 = vld [vmem:[#allocation19_spill] sm:$0xff] }
 0x168   : > { %3257 = vmatpush1.bf16.msra.mxu0 %v7633_v5  ;;  %4356 = vrot.lane.b32.xlu0 %v6017_v60, %s7617_s9  ;;  %v3320_v12 = vpack.c.bf16 %v674_v63, %v641_v20  ;;  %v7639_v49 = vunpack.i.h.bf16 %v7638_v26  ;;  %vm7640_vm8 = vcmp.lt.s32.totalorder %v4804_v15, 117  ;;  %v7641_v53 = vunpack.i.h.bf16 %v7625_v35  ;;  %v7645_v56 = vld [vmem:[#allocation21_spill] sm:$0xff]  ;;  %v7649_v35 = vld [vmem:[#allocation42_spill] sm:$0xff] }
 0x169   : > { %3259 = vmatprep.subr.bf16.mxu0 %v3258_v31  ;;  %v642_v4 = vsel %vm7637_vm12, %v7636_v14, %v3863_v46  ;;  %v6080_v7 = vpop.permute.xlu1 %4111  ;;  %v4104_v31 = vunpack.i.h.bf16 %v6035_v21  ;;  %v6084_v24 = vpop.permute.xlu0 %4106  ;;  %v6090_v46 = vpack.i.bf16 %v3124_v57, %v3123_v55  ;;  %vm7642_vm9 = vmmov %vm7640_vm8  ;;  %v4094_v2 = vunpack.i.h.bf16 %v5986_v42 }
 0x16a   : > { %v3266_v47 = vpack.c.bf16 %v675_v37, %v642_v4  ;;  %v7448_v0 = vunpack.i.h.bf16 %v6080_v7  ;;  %v741_v36 = vsel %vm7640_vm8, %v7639_v49, %v3923_v18  ;;  %v740_v23 = vsel %vm7642_vm9, %v3923_v18, %v7641_v53  ;;  %v7643_v37 = vld [vmem:[#allocation44_spill] sm:$0xff]  ;;  %3317 = vmatpush1.bf16.msra.mxu1 %v3316_v3  ;;  %v7650_v3 = vld [vmem:[#allocation35_spill] sm:$0xff]  ;;  %v7654_v49 = vld [vmem:[#allocation30_spill] sm:$0xff] }
 0x16b   : > { %v3963_v63 = vunpack.i.l.bf16 %v7643_v37  ;;  %v7445_v20 = vunpack.i.h.bf16 %v6084_v24  ;;  %v7646_v5 = vpack.c.bf16 %v7644_v59, %v7645_v56  ;;  %v7647_v19 = vunpack.i.h.bf16 %v7634_v41  ;;  %4361 = vrot.lane.b32.xlu1 %v6028_v45, %s4606_s15 }
 0x16c   : > { %vm7648_vm11 = vcmp.lt.s32.totalorder %v4804_v15, 118  ;;  %v3943_v57 = vunpack.i.l.bf16 %v7649_v35  ;;  %v6113_v18 = vsel %vm236_vm1, %v4104_v31, %v7448_v0  ;;  %v7651_v14 = vunpack.i.h.bf16 %v7650_v3  ;;  %2223 = vrot.lane.b32.xlu0 %v6070_v29, %s7617_s9 }
 0x16d   : > { %3261 = vmatpush1.bf16.msra.mxu0 %v7646_v5  ;;  %v707_v55 = vsel %vm7648_vm11, %v3903_v58, %v7647_v19  ;;  %vm7652_vm12 = vmmov %vm7648_vm11  ;;  %v4003_v4 = vunpack.i.l.bf16 %v5613_v28  ;;  %v6128_v26 = vsel %vm203_vm0, %v4094_v2, %v7445_v20  ;;  %v6135_v59 = vpop.permute.xlu1 %4121  ;;  %v6137_v56 = vpop.permute.xlu0 %4116  ;;  %v7656_v3 = vunpack.i.h.bf16 %v7649_v35  ;;  %v7676_v19 = vld [vmem:[#allocation33_spill] sm:$0xff] }
 0x16e   : > { %3263 = vmatprep.subr.bf16.mxu0 %v3262_v61  ;;  %v708_v41 = vsel %vm7652_vm12, %v7651_v14, %v3903_v58  ;;  %v7653_v61 = vld [vmem:[#allocation31_spill] sm:$0xff]  ;;  %v3324_v5 = vpack.c.bf16 %v740_v23, %v707_v55  ;;  %vm7657_vm8 = vcmp.lt.s32.totalorder %v4804_v15, 39  ;;  %v7658_v20 = vunpack.i.h.bf16 %v7643_v37 }
 0x16f   : > { %v7655_v53 = vpack.c.bf16 %v7653_v61, %v7654_v49  ;;  %v3270_v58 = vpack.c.bf16 %v741_v36, %v708_v41  ;;  %v773_v14 = vsel %vm7657_vm8, %v3943_v57, %v7656_v3  ;;  %vm7659_vm9 = vcmp.lt.s32.totalorder %v4804_v15, 38  ;;  %v7660_v36 = vld [vmem:[#allocation45_spill] sm:$0xff]  ;;  %4371 = vrot.lane.b32.xlu1 %v6028_v45, %s4607_s16  ;;  %v7663_v55 = vld [vmem:[#allocation43_spill] sm:$0xff]  ;;  %vm7665_vm12 = vmmov %vm7657_vm8 }
 0x170   : > { %v806_v61 = vsel %vm7659_vm9, %v3963_v63, %v7658_v20  ;;  %v3983_v49 = vunpack.i.l.bf16 %v5593_v32  ;;  %v7661_v41 = vunpack.i.h.bf16 %v7660_v36  ;;  %vm7662_vm11 = vmmov %vm7659_vm9  ;;  %v7664_v35 = vunpack.i.h.bf16 %v7663_v55  ;;  %4366 = vrot.lane.b32.xlu0 %v6017_v60, %s4606_s15 }
 0x171   : > { %3319 = vmatprep.subr.bf16.mxu1 %v7655_v53  ;;  %3265 = vmatpush1.bf16.msra.mxu0 %v3264_v8  ;;  %v7666_v20 = vunpack.i.h.bf16 %v5613_v28  ;;  %vm7667_vm8 = vcmp.lt.s32.totalorder %v4804_v15, 29  ;;  %v4068_v53 = vunpack.i.l.bf16 %v5825_v50  ;;  %v6171_v3 = vpop.permute.xlu1 %4131  ;;  %v4079_v36 = vunpack.i.h.bf16 %v5866_v30  ;;  %v6179_v55 = vpop.permute.xlu0 %4126 }
 0x172   : > { %3321 = vmatpush1.bf16.msra.mxu1 %v3320_v12  ;;  %v807_v23 = vsel %vm7662_vm11, %v7661_v41, %v3963_v63  ;;  %3267 = vmatprep.subr.bf16.mxu0 %v3266_v47  ;;  %v774_v37 = vsel %vm7665_vm12, %v7664_v35, %v3943_v57  ;;  %v4069_v12 = vunpack.i.h.bf16 %v5825_v50  ;;  %v7668_v47 = vld [vmem:[#allocation39_spill] sm:$0xff]  ;;  %v7669_v63 = vld [vmem:[#allocation38_spill] sm:$0xff]  ;;  %v7671_v57 = vunpack.i.h.bf16 %v5623_v22  ;;  %vm7672_vm9 = vmmov %vm7667_vm8 }
 0x173   : > { %v872_v8 = vsel %vm7667_vm8, %v4003_v4, %v7666_v20  ;;  %v7670_v45 = vpack.c.bf16 %v7668_v47, %v7669_v63  ;;  %v4078_v41 = vunpack.i.l.bf16 %v5866_v30  ;;  %v3274_v50 = vpack.c.bf16 %v807_v23, %v774_v37  ;;  %2255 = vrot.lane.b32.xlu1 %v6070_v29, %s4606_s15  ;;  %v7683_v37 = vld [vmem:[#allocation46_spill] sm:$0xff] }
 0x174   : > { %v873_v28 = vsel %vm7672_vm9, %v7671_v57, %v4003_v4  ;;  %v3328_v35 = vpack.c.bf16 %v806_v61, %v773_v14  ;;  %v7673_v20 = vunpack.i.h.bf16 %v5593_v32  ;;  %vm7674_vm11 = vcmp.lt.s32.totalorder %v4804_v15, 37  ;;  %v7678_v57 = vld [vmem:[#allocation50_spill] sm:$0xff]  ;;  %4376 = vrot.lane.b32.xlu0 %v6017_v60, %s4607_s16 }
 0x175   : > { %3323 = vmatprep.subr.bf16.mxu1 %v7670_v45  ;;  %v4074_v63 = vunpack.i.h.bf16 %v5877_v1  ;;  %v4073_v22 = vunpack.i.l.bf16 %v5877_v1  ;;  %v7675_v45 = vld [vmem:[#allocation32_spill] sm:$0xff]  ;;  %v7679_v30 = vunpack.i.h.bf16 %v7678_v57  ;;  %vm7680_vm12 = vmmov %vm7674_vm11  ;;  %vm7681_vm8 = vcmp.lt.s32.totalorder %v4804_v15, 28 }
 0x176   : > { %v839_v47 = vsel %vm7674_vm11, %v3983_v49, %v7673_v20  ;;  %v7677_v4 = vpack.c.bf16 %v7675_v45, %v7676_v19  ;;  %3325 = vmatpush1.bf16.msra.mxu1 %v3324_v5  ;;  %v6196_v32 = vsel %vm7681_vm8, %v4068_v53, %v4069_v12  ;;  %v4084_v14 = vunpack.i.h.bf16 %v5913_v52  ;;  %v6211_v45 = vpop.permute.xlu1 %4141  ;;  %vm7687_vm9 = vmmov %vm7681_vm8 }
 0x177   : > { %v840_v23 = vsel %vm7680_vm12, %v7679_v30, %v3983_v49  ;;  %v3332_v61 = vpack.c.bf16 %v872_v8, %v839_v47  ;;  %v6203_v5 = vsel %vm970_vm14, %v4078_v41, %v4079_v36  ;;  %v4083_v19 = vunpack.i.l.bf16 %v5913_v52  ;;  %v7682_v49 = vld [vmem:[#allocation47_spill] sm:$0xff]  ;;  %vm7690_vm11 = vmmov %vm7681_vm8  ;;  %4381 = vrot.lane.b32.xlu1 %v6064_v43, %s4608_s17 }
 0x178   : > { %3269 = vmatpush1.bf16.msra.mxu0 %v7677_v4  ;;  %v3278_v1 = vpack.c.bf16 %v873_v28, %v840_v23  ;;  %v7684_v20 = vpack.c.bf16 %v7682_v49, %v7683_v37  ;;  %v7688_v28 = vld [vmem:[#allocation56_spill] sm:$0xff]  ;;  %v7450_v52 = vunpack.i.h.bf16 %v6171_v3  ;;  %v7446_v30 = vunpack.i.h.bf16 %v6211_v45  ;;  %v6223_v23 = vpop.permute.xlu0 %4136  ;;  %2287 = vrot.lane.b32.xlu0 %v6070_v29, %s4607_s16 }
 0x179   : > { %3271 = vmatprep.subr.bf16.mxu0 %v3270_v58  ;;  %v7685_v58 = vld [vmem:[#allocation55_spill] sm:$0xff]  ;;  %v7689_v47 = vunpack.i.h.bf16 %v7688_v28  ;;  %v6229_v49 = vsel %vm970_vm14, %v4079_v36, %v4058_v34  ;;  %vm7691_vm12 = vcmp.lt.s32.totalorder %v4804_v15, 27  ;;  %v7449_v37 = vunpack.i.h.bf16 %v6135_v59  ;;  %v7695_v34 = vld [vmem:[#allocation57_spill] sm:$0xff] }
 0x17a   : > { %3327 = vmatprep.subr.bf16.mxu1 %v7684_v20  ;;  %v7686_v4 = vunpack.i.l.bf16 %v7685_v58  ;;  %v7447_v20 = vunpack.i.h.bf16 %v6223_v23  ;;  %v7692_v58 = vld [vmem:[#allocation40_spill] sm:$0xff]  ;;  %v7696_v36 = vunpack.i.l.bf16 %v7695_v34  ;;  %vm7697_vm8 = vmmov %vm7691_vm12 }
 0x17b   : > { %v906_v57 = vsel %vm7690_vm11, %v7689_v47, %v4068_v53  ;;  %v938_v53 = vsel %vm7691_vm12, %v4073_v22, %v4074_v63  ;;  %3329 = vmatpush1.bf16.msra.mxu1 %v3328_v35  ;;  %v4103_v47 = vunpack.i.l.bf16 %v6035_v21  ;;  %4391 = vrot.lane.b32.xlu1 %v6064_v43, %s4609_s14  ;;  %vm7716_vm11 = vcmp.lt.s32.totalorder %v4804_v15, 89 }
 0x17c   : > { %v912_v8 = vsel %vm7687_vm9, %v4069_v12, %v7686_v4  ;;  %v6235_v12 = vsel %vm970_vm14, %v4059_v17, %v4078_v41  ;;  %v7693_v4 = vld [vmem:[#allocation41_spill] sm:$0xff]  ;;  %v945_v44 = vsel %vm7697_vm8, %v4074_v63, %v7696_v36  ;;  %v6254_v17 = vsel %vm302_vm3, %v7450_v52, %v7446_v30  ;;  %vm7699_vm9 = vmmov %vm7697_vm8  ;;  %4386 = vrot.lane.b32.xlu0 %v6017_v60, %s4608_s17 }
 0x17d   : > { %v7694_v28 = vpack.c.bf16 %v7692_v58, %v7693_v4  ;;  %v7698_v41 = vunpack.i.h.bf16 %v7695_v34  ;;  %v1011_v63 = vsel %vm1003_vm15, %v4084_v14, %v4063_v6  ;;  %v4099_v58 = vunpack.i.h.bf16 %v6046_v25  ;;  %v7701_v4 = vld [vmem:[#allocation51_spill] sm:$0xff]  ;;  %v6281_v6 = vpop.permute.xlu1 %4151  ;;  %vm7717_vm12 = vmmov %vm7716_vm11 }
 0x17e   : > { %v7703_v34 = vunpack.i.h.bf16 %v5751_v9  ;;  %v4098_v30 = vunpack.i.l.bf16 %v6046_v25  ;;  %v3334_v0 = vpack.c.bf16 %v945_v44, %v912_v8  ;;  %v7704_v9 = vld [vmem:[#allocation48_spill] sm:$0xff]  ;;  %v4088_v25 = vunpack.i.l.bf16 %v6005_v16  ;;  %vm7718_vm8 = vmmov %vm7716_vm11 }
 0x17f   : > { %3273 = vmatpush1.bf16.msra.mxu0 %v7694_v28  ;;  %v939_v35 = vsel %vm7699_vm9, %v7698_v41, %v4073_v22  ;;  %v7700_v22 = vld [vmem:[#allocation52_spill] sm:$0xff]  ;;  %v1004_v41 = vsel %vm1003_vm15, %v4083_v19, %v4084_v14  ;;  %v3336_v14 = vpack.c.bf16 %v938_v53, %v6196_v32  ;;  %v6316_v32 = vsel %vm236_vm1, %v4099_v58, %v4103_v47 }
 0x180   : > { %3275 = vmatprep.subr.bf16.mxu0 %v3274_v50  ;;  %v6274_v50 = vsel %vm269_vm2, %v7449_v37, %v7447_v20  ;;  %v7702_v28 = vpack.c.bf16 %v7700_v22, %v7701_v4  ;;  %v6287_v36 = vsel %vm1003_vm15, %v7703_v34, %v4083_v19  ;;  %v6292_v20 = vpop.permute.xlu0 %4146  ;;  %v4093_v4 = vunpack.i.l.bf16 %v5986_v42  ;;  %v7705_v37 = vld [vmem:[#allocation49_spill] sm:$0xff]  ;;  %2319 = vrot.lane.b32.xlu1 %v6070_v29, %s4608_s17 }
 0x181   : > { %v7706_v52 = vpack.c.bf16 %v7704_v9, %v7705_v37  ;;  %v3282_v34 = vpack.c.bf16 %v939_v35, %v906_v57  ;;  %v3338_v19 = vpack.c.bf16 %v1011_v63, %v6229_v49  ;;  %v3286_v8 = vpack.c.bf16 %v6287_v36, %v6235_v12  ;;  %v6321_v43 = vpop.permute.xlu1 %4161  ;;  %v7708_v12 = vld [vmem:[#allocation54_spill] sm:$0xff]  ;;  %4396 = vrot.lane.b32.xlu0 %v6017_v60, %s4609_s14 }
 0x182   : > { %3331 = vmatprep.subr.bf16.mxu1 %v7702_v28  ;;  %v4089_v28 = vunpack.i.h.bf16 %v6005_v16  ;;  %v7480_v16 = vunpack.i.l.bf16 %v6080_v7  ;;  %v1044_v49 = vsel %vm1036_vm13, %v5953_v38, %v5832_v10  ;;  %v6343_v21 = vsel %vm236_vm1, %v4098_v30, %v4099_v58 }
 0x183   : > { %3277 = vmatpush1.bf16.msra.mxu0 %v7706_v52  ;;  %3333 = vmatpush1.bf16.msra.mxu1 %v3332_v61  ;;  %v6312_v52 = vsel %vm1036_vm13, %v5799_v39, %v5903_v51  ;;  %v6328_v39 = vsel %vm236_vm1, %v4103_v47, %v4104_v31  ;;  %v7478_v61 = vunpack.i.l.bf16 %v6084_v24  ;;  %v1037_v10 = vsel %vm1036_vm13, %v5958_v48, %v5953_v38 }
 0x184   : > { %3279 = vmatprep.subr.bf16.mxu0 %v3278_v1  ;;  %3335 = vmatprep.subr.bf16.mxu1 %v3334_v0  ;;  %v3340_v1 = vpack.c.bf16 %v1004_v41, %v6203_v5  ;;  %v6331_v57 = vpop.permute.xlu0 %4156  ;;  %v1038_v0 = vsel %vm1036_vm13, %v5903_v51, %v5958_v48  ;;  %v6347_v31 = vsel %vm203_vm0, %v4089_v28, %v4093_v4  ;;  %v7707_v5 = vld [vmem:[#allocation53_spill] sm:$0xff]  ;;  %v4133_v48 = vunpack.i.l.bf16 %v6171_v3 }
 0x185   : > { %v7709_v53 = vpack.c.bf16 %v7707_v5, %v7708_v12  ;;  %v1595_v51 = vsel %vm203_vm0, %v4093_v4, %v4094_v2  ;;  %v3396_v44 = vpack.c.bf16 %v6316_v32, %v6347_v31  ;;  %v6367_v35 = vsel %vm203_vm0, %v4088_v25, %v4089_v28  ;;  %v6379_v2 = vpop.permute.xlu1 %4171  ;;  %4401 = vrot.lane.b32.xlu1 %v6090_v46, %s4585_s19  ;;  %s7739_s19 = smov 118  }
 0x186   : > { %v3394_v37 = vpack.c.bf16 %v6328_v39, %v1595_v51  ;;  %v6373_v38 = vsel %vm236_vm1, %v7480_v16, %v4098_v30  ;;  %v4129_v42 = vunpack.i.h.bf16 %v6179_v55  ;;  %v3342_v63 = vpack.c.bf16 %v6343_v21, %v6367_v35  ;;  %2351 = vrot.lane.b32.xlu0 %v6070_v29, %s4609_s14 }
 0x187   : > { %3281 = vmatpush1.bf16.msra.mxu0 %v7709_v53  ;;  %3337 = vmatpush1.bf16.msra.mxu1 %v3336_v14  ;;  %v6387_v47 = vsel %vm203_vm0, %v7478_v61, %v4088_v25  ;;  %v4128_v30 = vunpack.i.l.bf16 %v6179_v55  ;;  %v4164_v58 = vunpack.i.h.bf16 %v6321_v43  ;;  %v7472_v36 = vunpack.i.h.bf16 %v6379_v2  ;;  %v7711_v14 = vld [vmem:[#allocation59_spill] sm:$0xff] }
 0x188   : > { %3283 = vmatprep.subr.bf16.mxu0 %v3282_v34  ;;  %3339 = vmatprep.subr.bf16.mxu1 %v3338_v19  ;;  %v6392_v41 = vpop.permute.xlu0 %4166  ;;  %v7476_v60 = vunpack.i.l.bf16 %v6211_v45  ;;  %v7477_v4 = vunpack.i.l.bf16 %v6223_v23  ;;  %v4154_v28 = vunpack.i.h.bf16 %v6281_v6  ;;  %v7710_v34 = vld [vmem:[#allocation58_spill] sm:$0xff]  ;;  %v4123_v55 = vunpack.i.l.bf16 %v6135_v59 }
 0x189   : > { %v7473_v9 = vunpack.i.h.bf16 %v6392_v41  ;;  %v7712_v25 = vpack.c.bf16 %v7710_v34, %v7711_v14  ;;  %v4119_v19 = vunpack.i.h.bf16 %v6137_v56  ;;  %v4118_v39 = vunpack.i.l.bf16 %v6137_v56  ;;  %2385 = vrot.lane.b32.xlu1 %v6060_v13, %s4610_s10 }
 0x18a   : > { %v6408_v21 = vsel %vm368_vm5, %v4164_v58, %v7472_v36  ;;  %v6414_v5 = vsel %vm302_vm3, %v4129_v42, %v4133_v48  ;;  %v7713_v12 = vunpack.i.h.bf16 %v6171_v3  ;;  %v4159_v51 = vunpack.i.h.bf16 %v6331_v57  ;;  %4406 = vrot.lane.b32.xlu0 %v6090_v46, %s4586_s20  ;;  %s7744_s20 = smov 39  }
 0x18b   : > { %3285 = vmatpush1.bf16.msra.mxu0 %v7712_v25  ;;  %3341 = vmatpush1.bf16.msra.mxu1 %v3340_v1  ;;  %v4163_v1 = vunpack.i.l.bf16 %v6321_v43  ;;  %v6421_v56 = vsel %vm335_vm4, %v4154_v28, %v7473_v9  ;;  %v4158_v43 = vunpack.i.l.bf16 %v6331_v57  ;;  %v1693_v34 = vsel %vm302_vm3, %v4128_v30, %v4129_v42 }
 0x18c   : > { %3287 = vmatprep.subr.bf16.mxu0 %v3286_v8  ;;  %1539 = vmatprep.subr.mxu1 %v1044_v49  ;;  %v6425_v8 = vpop.permute.xlu1 %4181  ;;  %v1691_v53 = vsel %vm302_vm3, %v4133_v48, %v7713_v12  ;;  %v6433_v35 = vpop.permute.xlu0 %4176  ;;  %v6443_v3 = vsel %vm302_vm3, %v7476_v60, %v4128_v30  ;;  %v6449_v49 = vsel %vm269_vm2, %v7477_v4, %v4118_v39  ;;  %v4153_v57 = vunpack.i.l.bf16 %v6281_v6  ;;  %v2955_v60 = vld [vmem:[%s7315_s2] sm:$0xff] }
 0x18d   : > { %v4149_v48 = vunpack.i.h.bf16 %v6292_v20  ;;  %v7714_v42 = vpack.c.bf16 %v5771_v62, %v5784_v11  ;;  %v1660_v25 = vsel %vm269_vm2, %v4119_v19, %v4123_v55  ;;  %v4148_v30 = vunpack.i.l.bf16 %v6292_v20  ;;  %2389 = vrot.lane.b32.xlu1 %v6013_v54, %s4610_s10 }
 0x18e   : > { %v7715_v12 = vunpack.i.h.bf16 %v6135_v59  ;;  %v3344_v14 = vpack.c.bf16 %v6373_v38, %v6387_v47  ;;  %v1661_v20 = vsel %vm269_vm2, %v4118_v39, %v4119_v19  ;;  %v3348_v38 = vpack.c.bf16 %v6443_v3, %v6449_v49  ;;  %2387 = vrot.lane.b32.xlu0 %v6024_v33, %s4610_s10 }
 0x18f   : > { %3289 = vmatpush1.bf16.msra.mxu0 %v7714_v42  ;;  %1540 = vmatpush1.msra.mxu1 %v1037_v10  ;;  %v3346_v10 = vpack.c.bf16 %v1693_v34, %v1661_v20  ;;  %v1724_v47 = vsel %vm335_vm4, %v4149_v48, %v4153_v57  ;;  %v1723_v39 = vsel %vm335_vm4, %v4153_v57, %v4154_v28  ;;  %v7471_v32 = vunpack.i.l.bf16 %v6392_v41 }
 0x190   : > { %1468 = vmatprep.subr.mxu0 %v1038_v0  ;;  %v1659_v6 = vsel %vm269_vm2, %v4123_v55, %v7715_v12  ;;  %3395 = vmatprep.subr.bf16.mxu1 %v3394_v37  ;;  %v4192_v62 = vpop.permute.xlu1 %4191  ;;  %v1755_v0 = vsel %vm368_vm5, %v4163_v1, %v4164_v58  ;;  %v4187_v59 = vpop.permute.xlu0 %4186  ;;  %v3400_v55 = vpack.c.bf16 %v6414_v5, %v1660_v25  ;;  %v4184_v31 = vunpack.i.h.bf16 %v6425_v8 }
 0x191   : > { %v3398_v11 = vpack.c.bf16 %v1691_v53, %v1659_v6  ;;  %1552 = vmatmul.mubr.f32.vlgmr.msra.gmra.mrb[2].mxu1 %v5840_v40  ;;  %v1757_v37 = vsel %vm368_vm5, %v4158_v43, %v4159_v51  ;;  %v4194_v58 = vunpack.i.h.bf16 %v4192_v62  ;;  %v4193_v19 = vunpack.i.l.bf16 %v4192_v62  ;;  %2383 = vrot.lane.b32.xlu1 %v6070_v29, %s4610_s10 }
 0x192   : > { %3397 = vmatpush1.bf16.msra.mxu1 %v3396_v44  ;;  %v1756_v5 = vsel %vm368_vm5, %v4159_v51, %v4163_v1  ;;  %v7470_v53 = vunpack.i.l.bf16 %v6379_v2  ;;  %v3402_v34 = vpack.c.bf16 %v1755_v0, %v1723_v39  ;;  %v1725_v3 = vsel %vm335_vm4, %v4148_v30, %v4149_v48  ;;  %3127 = vmatprep.mubr.msk.f32.mxu1 %vm1271_vm10, %v5133_v27 }
 0x193   : > { %1469 = vmatpush1.msra.mxu0 %v6312_v52  ;;  %3399 = vmatprep.subr.bf16.mxu1 %v3398_v11  ;;  %v4183_v52 = vunpack.i.l.bf16 %v6425_v8  ;;  %v3350_v28 = vpack.c.bf16 %v1757_v37, %v1725_v3  ;;  %v4189_v1 = vunpack.i.h.bf16 %v4187_v59  ;;  %v4188_v51 = vunpack.i.l.bf16 %v4187_v59  ;;  %v6537_v11 = vld [vmem:[%s4646_s18 + $0x60] sm:$0xff] }
 0x194   : > { %3343 = vmatprep.subr.bf16.mxu0 %v3342_v63  ;;  %v6499_v44 = vpop.permute.xlu1 %4201  ;;  %v4179_v63 = vunpack.i.h.bf16 %v6433_v35  ;;  %1481 = vmatmul.mubr.f32.vlgmr.msra.gmra.mrb[2].mxu0 %v5840_v40  ;;  %v6504_v57 = vpop.permute.xlu0 %4196  ;;  %v1819_v25 = vsel %vm434_vm7, %v4193_v19, %v4194_v58  ;;  %v1758_v40 = vsel %vm368_vm5, %v7470_v53, %v4158_v43  ;;  %v3404_v12 = vpack.c.bf16 %v1756_v5, %v1724_v47 }
 0x195   : > { %v7466_v49 = vunpack.i.h.bf16 %v6499_v44  ;;  %3345 = vmatpush1.bf16.msra.mxu0 %v3344_v14  ;;  %v7462_v8 = vunpack.i.l.bf16 %v6499_v44  ;;  %v7467_v48 = vunpack.i.h.bf16 %v6504_v57  ;;  %v7465_v42 = vunpack.i.l.bf16 %v6504_v57  ;;  %2391 = vrot.lane.b32.xlu0 %v6537_v11, %s4610_s10 }
 0x196   : > { %3401 = vmatpush1.bf16.msra.mxu1 %v3400_v55  ;;  %3347 = vmatprep.subr.bf16.mxu0 %v3346_v10  ;;  %v1726_v6 = vsel %vm335_vm4, %v7471_v32, %v4148_v30  ;;  %v4178_v62 = vunpack.i.l.bf16 %v6433_v35  ;;  %v1787_v30 = vsel %vm7451_vm6, %v4183_v52, %v4184_v31  ;;  %v1788_v35 = vsel %vm7451_vm6, %v4179_v63, %v4183_v52 }
 0x197   : > { %v6521_v14 = vsel %vm434_vm7, %v4194_v58, %v7466_v49  ;;  %3403 = vmatprep.subr.bf16.mxu1 %v3402_v34  ;;  %v6532_v43 = vsel %vm7451_vm6, %v4184_v31, %v7467_v48  ;;  %v1820_v0 = vsel %vm434_vm7, %v4189_v1, %v4193_v19  ;;  %v3406_v10 = vpack.c.bf16 %v1819_v25, %v1787_v30 }
 0x198   : > { %v4212_v20 = vpop.permute.xlu1 %4211  ;;  %v4207_v59 = vpop.permute.xlu0 %4206  ;;  %3126 = vmatprep.mubr.msk.f32.mxu0 %vm1271_vm10, %v5133_v27  ;;  %v1822_v37 = vsel %vm434_vm7, %v7462_v8, %v4188_v51  ;;  %v1790_v47 = vsel %vm7451_vm6, %v7465_v42, %v4178_v62  ;;  %v1821_v58 = vsel %vm434_vm7, %v4188_v51, %v4189_v1  ;;  %4416 = vrot.lane.b32.xlu1 %v6090_v46, %s4588_s22  ;;  %vm7719_vm9 = vcmp.lt.s32.totalorder %v4804_v15, 11 }
 0x199   : > { %3349 = vmatpush1.bf16.msra.mxu0 %v3348_v38  ;;  %v4214_v19 = vunpack.i.h.bf16 %v4212_v20  ;;  %v4213_v39 = vunpack.i.l.bf16 %v4212_v20  ;;  %v4209_v5 = vunpack.i.h.bf16 %v4207_v59  ;;  %v4208_v34 = vunpack.i.l.bf16 %v4207_v59  ;;  %4411 = vrot.lane.b32.xlu0 %v6090_v46, %s4587_s21 }
 0x19a   : > { %3405 = vmatpush1.bf16.msra.mxu1 %v3404_v12  ;;  %3351 = vmatprep.subr.bf16.mxu0 %v3350_v28  ;;  %v3352_v3 = vpack.c.bf16 %v1758_v40, %v1726_v6  ;;  %v1789_v38 = vsel %vm7451_vm6, %v4178_v62, %v4179_v63  ;;  %v3408_v31 = vpack.c.bf16 %v1820_v0, %v1788_v35  ;;  %vm7720_vm6 = vmmov %vm7719_vm9 }
 0x19b   : > { %3407 = vmatprep.subr.bf16.mxu1 %v3406_v10  ;;  %v3354_v25 = vpack.c.bf16 %v1821_v58, %v1789_v38  ;;  %v3356_v30 = vpack.c.bf16 %v1822_v37, %v1790_v47  ;;  %v1852_v59 = vsel %vm7716_vm11, %v4209_v5, %v4213_v39  ;;  %v1853_v40 = vsel %vm7717_vm12, %v4208_v34, %v4209_v5  ;;  %vm7721_vm11 = vmmov %vm7720_vm6 }
 0x19c   : > { %v4222_v52 = vpop.permute.xlu1 %4221  ;;  %v4217_v51 = vpop.permute.xlu0 %4216  ;;  %v1851_v63 = vsel %vm7718_vm8, %v4213_v39, %v4214_v19  ;;  %4426 = vrot.lane.b32.xlu1 %v6090_v46, %s4590_s24  ;;  %vm7722_vm12 = vmmov %vm7720_vm6  ;;  %s3133_s24 = sshll.u32 %s7906_s13, 6 }
 0x19d   : > { %v4224_v1 = vunpack.i.h.bf16 %v4222_v52  ;;  %v4223_v28 = vunpack.i.l.bf16 %v4222_v52  ;;  %3353 = vmatpush1.bf16.msra.mxu0 %v3352_v3  ;;  %v4219_v12 = vunpack.i.h.bf16 %v4217_v51  ;;  %v4218_v20 = vunpack.i.l.bf16 %v4217_v51  ;;  %4421 = vrot.lane.b32.xlu0 %v6090_v46, %s4589_s23 }
 0x19e   : > { %3409 = vmatpush1.bf16.msra.mxu1 %v3408_v31  ;;  %3355 = vmatprep.subr.bf16.mxu0 %v3354_v25 }
 0x19f   : > { %v1883_v6 = vsel %vm7719_vm9, %v4223_v28, %v4224_v1  ;;  %v1884_v62 = vsel %vm7720_vm6, %v4219_v12, %v4223_v28  ;;  %v1885_v0 = vsel %vm7721_vm11, %v4218_v20, %v4219_v12  ;;  %vm7723_vm9 = vmmov %vm7718_vm8  ;;  %vm7724_vm11 = vcmp.lt.s32.totalorder %v4804_v15, 10 }
 0x1a0   : > { %v6581_v35 = vpop.permute.xlu1 %4231  ;;  %v3410_v10 = vpack.c.bf16 %v1883_v6, %v1851_v63  ;;  %v3412_v37 = vpack.c.bf16 %v1884_v62, %v1852_v59  ;;  %v6587_v39 = vpop.permute.xlu0 %4226  ;;  %v3358_v5 = vpack.c.bf16 %v1885_v0, %v1853_v40  ;;  %4436 = vrot.lane.b32.xlu1 %v6090_v46, %s4592_s26 }
 0x1a1   : > { %v7454_v47 = vunpack.i.h.bf16 %v6581_v35  ;;  %v7452_v58 = vunpack.i.l.bf16 %v6581_v35  ;;  %3357 = vmatpush1.bf16.msra.mxu0 %v3356_v30  ;;  %v7461_v3 = vunpack.i.h.bf16 %v6587_v39  ;;  %v7453_v38 = vunpack.i.l.bf16 %v6587_v39  ;;  %4431 = vrot.lane.b32.xlu0 %v6090_v46, %s4591_s25 }
 0x1a2   : > { %3411 = vmatprep.subr.bf16.mxu1 %v3410_v10  ;;  %3359 = vmatprep.subr.bf16.mxu0 %v3358_v5 }
 0x1a3   : > { %v6595_v31 = vsel %vm7720_vm6, %v4224_v1, %v7454_v47  ;;  %v1886_v52 = vsel %vm7722_vm12, %v7452_v58, %v4218_v20  ;;  %3413 = vmatpush1.bf16.msra.mxu1 %v3412_v37  ;;  %v6605_v25 = vsel %vm7718_vm8, %v4214_v19, %v7461_v3  ;;  %v1854_v28 = vsel %vm7723_vm9, %v7453_v38, %v4208_v34  ;;  %vm7725_vm6 = vmmov %vm7724_vm11 }
 0x1a4   : > { %v4242_v1 = vpop.permute.xlu1 %4241  ;;  %v3360_v12 = vpack.c.bf16 %v1886_v52, %v1854_v28  ;;  %v4237_v20 = vpop.permute.xlu0 %4236  ;;  %4446 = vrot.lane.b32.xlu1 %v6090_v46, %s4594_s28  ;;  %vm7726_vm12 = vmmov %vm7725_vm6  ;;  %vm7727_vm8 = vcmp.lt.s32.totalorder %v4804_v15, 9 }
 0x1a5   : > { %v4244_v30 = vunpack.i.h.bf16 %v4242_v1  ;;  %v4243_v19 = vunpack.i.l.bf16 %v4242_v1  ;;  %v4239_v59 = vunpack.i.h.bf16 %v4237_v20  ;;  %v4238_v40 = vunpack.i.l.bf16 %v4237_v20  ;;  %4441 = vrot.lane.b32.xlu0 %v6090_v46, %s4593_s27  ;;  %vm7728_vm9 = vmmov %vm7727_vm8  ;;  %s7296_s27 = scalar_lea.vmem %s7316_s3, %s3133_s24 }
 0x1a6   : > { %3361 = vmatpush1.bf16.msra.mxu0 %v3360_v12 }
 0x1a7   : > { %v1916_v37 = vsel %vm7724_vm11, %v4239_v59, %v4243_v19  ;;  %v1917_v5 = vsel %vm7725_vm6, %v4238_v40, %v4239_v59  ;;  %v1915_v52 = vsel %vm7726_vm12, %v4243_v19, %v4244_v30  ;;  %vm7729_vm11 = vmmov %vm7727_vm8 }
 0x1a8   : > { %v4252_v34 = vpop.permute.xlu1 %4251  ;;  %v4247_v62 = vpop.permute.xlu0 %4246  ;;  %4456 = vrot.lane.b32.xlu1 %v6090_v46, %s4596_s30  ;;  %vm7730_vm6 = vmmov %vm7727_vm8 }
 0x1a9   : > { %v4254_v63 = vunpack.i.h.bf16 %v4252_v34  ;;  %v4253_v6 = vunpack.i.l.bf16 %v4252_v34  ;;  %v4249_v0 = vunpack.i.h.bf16 %v4247_v62  ;;  %v4248_v10 = vunpack.i.l.bf16 %v4247_v62  ;;  %4451 = vrot.lane.b32.xlu0 %v6090_v46, %s4595_s29  ;;  %vm7731_vm12 = vmmov %vm7730_vm6 }
 0x1ab   : > { %v1947_v28 = vsel %vm7727_vm8, %v4253_v6, %v4254_v63  ;;  %v1948_v1 = vsel %vm7728_vm9, %v4249_v0, %v4253_v6  ;;  %v1949_v20 = vsel %vm7729_vm11, %v4248_v10, %v4249_v0  ;;  %vm7732_vm8 = vcmp.lt.s32.totalorder %v4804_v15, 10 }
 0x1ac   : > { %v6635_v12 = vpop.permute.xlu1 %4261  ;;  %v3414_v59 = vpack.c.bf16 %v1947_v28, %v1915_v52  ;;  %v3416_v34 = vpack.c.bf16 %v1948_v1, %v1916_v37  ;;  %v6641_v51 = vpop.permute.xlu0 %4256  ;;  %v3362_v6 = vpack.c.bf16 %v1949_v20, %v1917_v5  ;;  %vm7733_vm9 = vmmov %vm7732_vm8  ;;  %4466 = vrot.lane.b32.xlu1 %v6090_v46, %s4598_s5  ;;  %vm7734_vm11 = vcmp.lt.s32.totalorder %v4804_v15, 1 }
 0x1ad   : > { %v7457_v19 = vunpack.i.h.bf16 %v6635_v12  ;;  %v7455_v62 = vunpack.i.l.bf16 %v6635_v12  ;;  %v7460_v58 = vunpack.i.h.bf16 %v6641_v51  ;;  %v7456_v38 = vunpack.i.l.bf16 %v6641_v51  ;;  %4461 = vrot.lane.b32.xlu0 %v6090_v46, %s4597_s4 }
 0x1ae   : > { %3415 = vmatprep.subr.bf16.mxu1 %v3414_v59  ;;  %3363 = vmatprep.subr.bf16.mxu0 %v3362_v6  ;;  %v6678_v6 = vld [vmem:[%s4646_s18 + $0x78] sm:$0xff] }
 0x1af   : > { %v6649_v47 = vsel %vm7730_vm6, %v4254_v63, %v7457_v19  ;;  %v1950_v0 = vsel %vm7731_vm12, %v7455_v62, %v4248_v10  ;;  %3417 = vmatpush1.bf16.msra.mxu1 %v3416_v34  ;;  %v6659_v37 = vsel %vm7732_vm8, %v4244_v30, %v7460_v58  ;;  %v1918_v63 = vsel %vm7733_vm9, %v7456_v38, %v4238_v40  ;;  %vm7735_vm6 = vmmov %vm7734_vm11 }
 0x1b0   : > { %v4272_v10 = vpop.permute.xlu1 %4271  ;;  %v3364_v52 = vpack.c.bf16 %v1950_v0, %v1918_v63  ;;  %v4267_v1 = vpop.permute.xlu0 %4266  ;;  %4471 = vrot.lane.b32.xlu1 %v6090_v46, %s4599_s6  ;;  %vm7736_vm12 = vmmov %vm7735_vm6 }
 0x1b1   : > { %v4274_v28 = vunpack.i.h.bf16 %v4272_v10  ;;  %v4273_v30 = vunpack.i.l.bf16 %v4272_v10  ;;  %v4269_v20 = vunpack.i.h.bf16 %v4267_v1  ;;  %v4268_v59 = vunpack.i.l.bf16 %v4267_v1  ;;  %2013 = vrot.lane.b32.xlu0 %v6678_v6, %s4598_s5  ;;  %vm7737_vm8 = vmmov %vm7735_vm6 }
 0x1b2   : > { %3365 = vmatpush1.bf16.msra.mxu0 %v3364_v52  ;;  %vm7738_vm9 = vmmov %vm7735_vm6 }
 0x1b3   : > { %v1979_v40 = vsel %vm7734_vm11, %v4273_v30, %v4274_v28  ;;  %v1980_v34 = vsel %vm7735_vm6, %v4269_v20, %v4273_v30  ;;  %v1981_v63 = vsel %vm7736_vm12, %v4268_v59, %v4269_v20  ;;  %vm7740_vm11 = vcmp.lt.s32.totalorder %v4804_v15, 127 }
 0x1b4   : > { %v4282_v0 = vpop.permute.xlu1 %4281  ;;  %v3418_v10 = vpack.c.bf16 %v6013_v54, %v1979_v40  ;;  %v3420_v52 = vpack.c.bf16 %v6024_v33, %v1980_v34  ;;  %v6686_v1 = vpop.permute.xlu0 %4276  ;;  %v3366_v30 = vpack.c.bf16 %v6060_v13, %v1981_v63  ;;  %4476 = vrot.lane.b32.xlu1 %v6090_v46, %s7739_s19  ;;  %vm7741_vm6 = vcmp.lt.s32.totalorder %v4804_v15, 119  ;;  %vm7742_vm12 = vmmov %vm7740_vm11 }
 0x1b5   : > { %v7459_v5 = vunpack.i.h.bf16 %v6686_v1  ;;  %v7458_v62 = vunpack.i.l.bf16 %v6686_v1  ;;  %v4284_v38 = vunpack.i.h.bf16 %v4282_v0  ;;  %v4283_v19 = vunpack.i.l.bf16 %v4282_v0  ;;  %2045 = vrot.lane.b32.xlu0 %v6678_v6, %s4599_s6 }
 0x1b6   : > { %3419 = vmatprep.subr.bf16.mxu1 %v3418_v10  ;;  %3367 = vmatprep.subr.bf16.mxu0 %v3366_v30 }
 0x1b7   : > { %3421 = vmatpush1.bf16.msra.mxu1 %v3420_v52  ;;  %v6695_v54 = vsel %vm7737_vm8, %v4274_v28, %v7459_v5  ;;  %v1982_v33 = vsel %vm7738_vm9, %v7458_v62, %v4268_v59  ;;  %v2020_v63 = vsel %vm7740_vm11, %v4283_v19, %v4284_v38  ;;  %vm7743_vm8 = vmmov %vm7741_vm6 }
 0x1b8   : > { %v4292_v13 = vpop.permute.xlu1 %4291  ;;  %v3368_v20 = vpack.c.bf16 %v6070_v29, %v1982_v33  ;;  %v6706_v0 = vpop.permute.xlu0 %4286  ;;  %4481 = vrot.lane.b32.xlu1 %v6090_v46, %s4601_s8  ;;  %vm7745_vm9 = vmmov %vm7740_vm11 }
 0x1b9   : > { %v4294_v40 = vunpack.i.h.bf16 %v4292_v13  ;;  %v4293_v34 = vunpack.i.l.bf16 %v4292_v13  ;;  %v4288_v28 = vunpack.i.l.bf16 %v6706_v0  ;;  %v7464_v10 = vunpack.i.h.bf16 %v6706_v0  ;;  %2077 = vrot.lane.b32.xlu0 %v6678_v6, %s7739_s19  ;;  %vm7746_vm11 = vmmov %vm7741_vm6 }
 0x1ba   : > { %3369 = vmatpush1.bf16.msra.mxu0 %v3368_v20 }
 0x1bb   : > { %v2052_v59 = vsel %vm7741_vm6, %v4293_v34, %v4294_v40  ;;  %v2019_v20 = vsel %vm7742_vm12, %v4284_v38, %v4288_v28  ;;  %vm7747_vm6 = vmmov %vm7745_vm9 }
 0x1bc   : > { %v6718_v29 = vpop.permute.xlu1 %1999  ;;  %v3370_v52 = vpack.c.bf16 %v2052_v59, %v2020_v63  ;;  %v6720_v30 = vpop.permute.xlu0 %4296  ;;  %4486 = vrot.lane.b32.xlu1 %v6090_v46, %s7744_s20  ;;  %v2018_v59 = vsel %vm7745_vm9, %v4288_v28, %v7464_v10  ;;  %vm7748_vm12 = vmmov %vm7743_vm8  ;;  %vm7750_vm9 = vcmp.lt.s32.totalorder %v4804_v15, 117 }
 0x1bd   : > { %v7463_v33 = vunpack.i.h.bf16 %v6720_v30  ;;  %v4298_v13 = vunpack.i.l.bf16 %v6720_v30  ;;  %2109 = vrot.lane.b32.xlu0 %v6678_v6, %s4601_s8  ;;  %v2021_v58 = vsel %vm7747_vm6, %v6718_v29, %v4283_v19  ;;  %vm7752_vm6 = vmmov %vm7750_vm9 }
 0x1be   : > { %3371 = vmatprep.subr.bf16.mxu0 %v3370_v52 }
 0x1bf   : > { %v2051_v62 = vsel %vm7743_vm8, %v4294_v40, %v4298_v13  ;;  %v2050_v38 = vsel %vm7746_vm11, %v4298_v13, %v7463_v33  ;;  %vm7749_vm8 = vcmp.lt.s32.totalorder %v4804_v15, 118 }
 0x1c0   : > { %v4302_v63 = vpop.permute.xlu1 %4301  ;;  %v3424_v52 = vpack.c.bf16 %v2051_v62, %v2019_v20  ;;  %v6740_v5 = vpop.permute.xlu0 %2031  ;;  %v3422_v40 = vpack.c.bf16 %v2050_v38, %v2018_v59  ;;  %4491 = vrot.lane.b32.xlu1 %v6090_v46, %s7574_s7  ;;  %vm7751_vm11 = vmmov %vm7749_vm8 }
 0x1c1   : > { %v2053_v3 = vsel %vm7748_vm12, %v6740_v5, %v4293_v34  ;;  %v4304_v55 = vunpack.i.h.bf16 %v4302_v63  ;;  %v4303_v8 = vunpack.i.l.bf16 %v4302_v63  ;;  %2141 = vrot.lane.b32.xlu0 %v6678_v6, %s7744_s20  ;;  %vm7753_vm12 = vmmov %vm7749_vm8 }
 0x1c2   : > { %v3372_v28 = vpack.c.bf16 %v2053_v3, %v2021_v58  ;;  %3423 = vmatprep.subr.bf16.mxu1 %v3422_v40 }
 0x1c3   : > { %3425 = vmatpush1.bf16.msra.mxu1 %v3424_v52  ;;  %v2084_v34 = vsel %vm7749_vm8, %v4303_v8, %v4304_v55  ;;  %vm7754_vm8 = vmmov %vm7752_vm6 }
 0x1c4   : > { %v4312_v62 = vpop.permute.xlu1 %4311  ;;  %v6752_v59 = vpop.permute.xlu0 %4306  ;;  %3373 = vmatpush1.bf16.msra.mxu0 %v3372_v28  ;;  %4496 = vrot.lane.b32.xlu1 %v6090_v46, %s7599_s11 }
 0x1c5   : > { %v4314_v13 = vunpack.i.h.bf16 %v4312_v62  ;;  %v4313_v20 = vunpack.i.l.bf16 %v4312_v62  ;;  %v4308_v19 = vunpack.i.l.bf16 %v6752_v59  ;;  %v7468_v3 = vunpack.i.h.bf16 %v6752_v59  ;;  %2173 = vrot.lane.b32.xlu0 %v6678_v6, %s7574_s7 }
 0x1c7   : > { %v2116_v58 = vsel %vm7750_vm9, %v4313_v20, %v4314_v13  ;;  %v2083_v62 = vsel %vm7751_vm11, %v4304_v55, %v4308_v19  ;;  %vm7755_vm9 = vmmov %vm7751_vm11 }
 0x1c8   : > { %v6764_v63 = vpop.permute.xlu1 %2063  ;;  %v3374_v38 = vpack.c.bf16 %v2116_v58, %v2084_v34  ;;  %v6766_v52 = vpop.permute.xlu0 %4316  ;;  %4501 = vrot.lane.b32.xlu1 %v6090_v46, %s7617_s9  ;;  %v2082_v58 = vsel %vm7753_vm12, %v4308_v19, %v7468_v3  ;;  %vm7756_vm11 = vmmov %vm7752_vm6  ;;  %vm7758_vm12 = vcmp.lt.s32.totalorder %v4804_v15, 38 }
 0x1c9   : > { %v7469_v40 = vunpack.i.h.bf16 %v6766_v52  ;;  %v4318_v28 = vunpack.i.l.bf16 %v6766_v52  ;;  %2205 = vrot.lane.b32.xlu0 %v6678_v6, %s7599_s11  ;;  %v2085_v42 = vsel %vm7755_vm9, %v6764_v63, %v4303_v8  ;;  %vm7760_vm9 = vmmov %vm7758_vm12 }
 0x1ca   : > { %3375 = vmatprep.subr.bf16.mxu0 %v3374_v38 }
 0x1cb   : > { %v2115_v33 = vsel %vm7752_vm6, %v4314_v13, %v4318_v28  ;;  %v2114_v55 = vsel %vm7754_vm8, %v4318_v28, %v7469_v40  ;;  %vm7757_vm6 = vcmp.lt.s32.totalorder %v4804_v15, 39 }
 0x1cc   : > { %v4322_v34 = vpop.permute.xlu1 %4321  ;;  %v3428_v38 = vpack.c.bf16 %v2115_v33, %v2083_v62  ;;  %v6786_v10 = vpop.permute.xlu0 %2095  ;;  %v3426_v13 = vpack.c.bf16 %v2114_v55, %v2082_v58  ;;  %4506 = vrot.lane.b32.xlu1 %v6090_v46, %s4606_s15  ;;  %vm7759_vm8 = vmmov %vm7757_vm6 }
 0x1cd   : > { %v2117_v49 = vsel %vm7756_vm11, %v6786_v10, %v4313_v20  ;;  %v4324_v19 = vunpack.i.h.bf16 %v4322_v34  ;;  %v4323_v3 = vunpack.i.l.bf16 %v4322_v34  ;;  %2237 = vrot.lane.b32.xlu0 %v6678_v6, %s7617_s9  ;;  %vm7761_vm11 = vmmov %vm7757_vm6 }
 0x1ce   : > { %v3376_v48 = vpack.c.bf16 %v2117_v49, %v2085_v42  ;;  %3427 = vmatprep.subr.bf16.mxu1 %v3426_v13 }
 0x1cf   : > { %3429 = vmatpush1.bf16.msra.mxu1 %v3428_v38  ;;  %v2148_v49 = vsel %vm7757_vm6, %v4323_v3, %v4324_v19  ;;  %vm7762_vm6 = vmmov %vm7760_vm9 }
 0x1d0   : > { %v4332_v33 = vpop.permute.xlu1 %4331  ;;  %3377 = vmatpush1.bf16.msra.mxu0 %v3376_v48  ;;  %v6798_v8 = vpop.permute.xlu0 %4326  ;;  %4511 = vrot.lane.b32.xlu1 %v6090_v46, %s4607_s16 }
 0x1d1   : > { %v4334_v28 = vunpack.i.h.bf16 %v4332_v33  ;;  %v4333_v62 = vunpack.i.l.bf16 %v4332_v33  ;;  %2269 = vrot.lane.b32.xlu0 %v6678_v6, %s4606_s15  ;;  %v7474_v20 = vunpack.i.h.bf16 %v6798_v8  ;;  %v4328_v48 = vunpack.i.l.bf16 %v6798_v8 }
 0x1d3   : > { %v2180_v42 = vsel %vm7758_vm12, %v4333_v62, %v4334_v28  ;;  %v2147_v33 = vsel %vm7759_vm8, %v4324_v19, %v4328_v48  ;;  %vm7763_vm12 = vmmov %vm7759_vm8 }
 0x1d4   : > { %v6810_v34 = vpop.permute.xlu1 %2127  ;;  %v3378_v58 = vpack.c.bf16 %v2180_v42, %v2148_v49  ;;  %v6812_v55 = vpop.permute.xlu0 %4336  ;;  %4516 = vrot.lane.b32.xlu1 %v6090_v46, %s4608_s17  ;;  %v2146_v42 = vsel %vm7761_vm11, %v4328_v48, %v7474_v20  ;;  %vm7764_vm8 = vmmov %vm7762_vm6  ;;  %vm7767_vm11 = vcmp.lt.s32.totalorder %v4804_v15, 29 }
 0x1d5   : > { %v7475_v38 = vunpack.i.h.bf16 %v6812_v55  ;;  %v4338_v13 = vunpack.i.l.bf16 %v6812_v55  ;;  %2301 = vrot.lane.b32.xlu0 %v6678_v6, %s4607_s16  ;;  %v2149_v19 = vsel %vm7763_vm12, %v6810_v34, %v4323_v3  ;;  %vm7771_vm12 = vmmov %vm7767_vm11 }
 0x1d6   : > { %3379 = vmatprep.subr.bf16.mxu0 %v3378_v58 }
 0x1d7   : > { %v2179_v40 = vsel %vm7760_vm9, %v4334_v28, %v4338_v13  ;;  %v2178_v58 = vsel %vm7762_vm6, %v4338_v13, %v7475_v38  ;;  %v4611_v13 = vmov 0   ;;  %vm7766_vm9 = vcmp.lt.s32.totalorder %v4804_v15, 37 }
 0x1d8   : > { %v4342_v49 = vpop.permute.xlu1 %4341  ;;  %v3432_v53 = vpack.c.bf16 %v2179_v40, %v2147_v33  ;;  %v6832_v32 = vpop.permute.xlu0 %2159  ;;  %v3430_v36 = vpack.c.bf16 %v2178_v58, %v2146_v42  ;;  %4521 = vrot.lane.b32.xlu1 %v6090_v46, %s4609_s14  ;;  %4525 = vset.pattern.permute.xlu0 %v4611_v13  ;;  %v6868_v13 = vld [vmem:[%s4646_s18 + $0x70] sm:$0xff]  ;;  %vm7770_vm6 = vmmov %vm7766_vm9 }
 0x1d9   : > { %v2181_v28 = vsel %vm7764_vm8, %v6832_v32, %v4333_v62  ;;  %v4344_v9 = vunpack.i.h.bf16 %v4342_v49  ;;  %v4343_v48 = vunpack.i.l.bf16 %v4342_v49  ;;  %2333 = vrot.lane.b32.xlu0 %v6678_v6, %s4608_s17  ;;  %v6847_v62 = vld [vmem:[%s4646_s18 + $0x68] sm:$0xff]  ;;  %vm7772_vm8 = vmmov %vm7770_vm6 }
 0x1da   : > { %v3380_v20 = vpack.c.bf16 %v2181_v28, %v2149_v19  ;;  %3431 = vmatprep.subr.bf16.mxu1 %v3430_v36 }
 0x1db   : > { %3433 = vmatpush1.bf16.msra.mxu1 %v3432_v53  ;;  %v2212_v46 = vsel %vm7766_vm9, %v4343_v48, %v4344_v9  ;;  %vm7773_vm9 = vmmov %vm7767_vm11 }
 0x1dc   : > { %v4352_v40 = vpop.permute.xlu1 %4351  ;;  %v6844_v42 = vpop.permute.xlu0 %4346  ;;  %3381 = vmatpush1.bf16.msra.mxu0 %v3380_v20  ;;  %2393 = vrot.lane.b32.xlu1 %v6847_v62, %s4610_s10 }
 0x1dd   : > { %v4354_v3 = vunpack.i.h.bf16 %v4352_v40  ;;  %v4353_v33 = vunpack.i.l.bf16 %v4352_v40  ;;  %7765 = vst [vmem:[#allocation10_spill] sm:$0xff] %v6844_v42  ;;  %2365 = vrot.lane.b32.xlu0 %v6678_v6, %s4609_s14  ;;  %v7479_v53 = vunpack.i.h.bf16 %v6844_v42  ;;  %v4348_v49 = vunpack.i.l.bf16 %v6844_v42 }
 0x1df   : > { %v2244_v36 = vsel %vm7767_vm11, %v4353_v33, %v4354_v3  ;;  %v2211_v38 = vsel %vm7770_vm6, %v4344_v9, %v4348_v49  ;;  %vm7775_vm11 = vmmov %vm7770_vm6 }
 0x1e0   : > { %v6859_v58 = vpop.permute.xlu1 %2191  ;;  %v3382_v20 = vpack.c.bf16 %v2244_v36, %v2212_v46  ;;  %v6861_v19 = vpop.permute.xlu0 %4356  ;;  %2397 = vrot.lane.b32.xlu1 %v6678_v6, %s4610_s10  ;;  %vm7776_vm6 = vmmov %vm7773_vm9 }
 0x1e1   : > { %7768 = vst [vmem:[#allocation7_spill] sm:$0xff] %v6859_v58  ;;  %7769 = vst [vmem:[#allocation6_spill] sm:$0xff] %v6861_v19  ;;  %v7482_v28 = vunpack.i.h.bf16 %v6861_v19  ;;  %v4358_v40 = vunpack.i.l.bf16 %v6861_v19  ;;  %2395 = vrot.lane.b32.xlu0 %v6868_v13, %s4610_s10 }
 0x1e2   : > { %3383 = vmatprep.subr.bf16.mxu0 %v3382_v20  ;;  %v2210_v20 = vsel %vm7772_vm8, %v4348_v49, %v7479_v53  ;;  %vm7779_vm8 = vcmp.lt.s32.totalorder %v4804_v15, 27 }
 0x1e3   : > { %v2243_v46 = vsel %vm7771_vm12, %v4354_v3, %v4358_v40  ;;  %v2242_v22 = vsel %vm7773_vm9, %v4358_v40, %v7482_v28  ;;  %v2213_v3 = vsel %vm7775_vm11, %v6859_v58, %v4343_v48  ;;  %vm7778_vm12 = vcmp.lt.s32.totalorder %v4804_v15, 28  ;;  %vm7782_vm11 = vmmov %vm7779_vm8 }
 0x1e4   : > { %v4362_v36 = vpop.permute.xlu1 %4361  ;;  %v3436_v4 = vpack.c.bf16 %v2243_v46, %v2211_v38  ;;  %v6887_v9 = vpop.permute.xlu0 %2223  ;;  %v3434_v61 = vpack.c.bf16 %v2242_v22, %v2210_v20  ;;  %vm7781_vm9 = vmmov %vm7778_vm12 }
 0x1e5   : > { %7774 = vst [vmem:[#allocation24_spill] sm:$0xff] %v6887_v9  ;;  %v2245_v49 = vsel %vm7776_vm6, %v6887_v9, %v4353_v33  ;;  %v4364_v53 = vunpack.i.h.bf16 %v4362_v36  ;;  %v4363_v16 = vunpack.i.l.bf16 %v4362_v36  ;;  %2958 = vperm.xlu0 %4525, %v2955_v60   ;;  %vm7783_vm6 = vmmov %vm7781_vm9 }
 0x1e6   : > { %v3384_v19 = vpack.c.bf16 %v2245_v49, %v2213_v3  ;;  %3435 = vmatprep.subr.bf16.mxu1 %v3434_v61 }
 0x1e7   : > { %3437 = vmatpush1.bf16.msra.mxu1 %v3436_v4  ;;  %v2276_v22 = vsel %vm7778_vm12, %v4363_v16, %v4364_v53  ;;  %vm7784_vm12 = vmmov %vm7779_vm8 }
 0x1e8   : > { %v4372_v40 = vpop.permute.xlu1 %4371  ;;  %v6895_v46 = vpop.permute.xlu0 %4366  ;;  %3385 = vmatpush1.bf16.msra.mxu0 %v3384_v19 }
 0x1e9   : > { %v4374_v28 = vunpack.i.h.bf16 %v4372_v40  ;;  %v4373_v38 = vunpack.i.l.bf16 %v4372_v40  ;;  %7777 = vst [vmem:[#allocation25_spill] sm:$0xff] %v6895_v46  ;;  %v7487_v33 = vunpack.i.h.bf16 %v6895_v46  ;;  %v4368_v36 = vunpack.i.l.bf16 %v6895_v46 }
 0x1eb   : > { %v2308_v48 = vsel %vm7779_vm8, %v4373_v38, %v4374_v28  ;;  %v2275_v19 = vsel %vm7781_vm9, %v4364_v53, %v4368_v36  ;;  %v2274_v9 = vsel %vm7783_vm6, %v4368_v36, %v7487_v33  ;;  %vm7786_vm8 = vmmov %vm7783_vm6  ;;  %vm7824_vm6 = vcmp.lt.s32.totalorder %v4804_v15, 9 }
 0x1ec   : > { %v6903_v20 = vpop.permute.xlu1 %2255  ;;  %v3386_v61 = vpack.c.bf16 %v2308_v48, %v2276_v22  ;;  %v6905_v60 = vpop.permute.xlu0 %4376  ;;  %vm7787_vm9 = vmmov %vm7782_vm11 }
 0x1ed   : > { %7780 = vst [vmem:[#allocation15_spill] sm:$0xff] %v6905_v60  ;;  %v7489_v4 = vunpack.i.h.bf16 %v6905_v60  ;;  %v4378_v3 = vunpack.i.l.bf16 %v6905_v60  ;;  %v2277_v53 = vsel %vm7786_vm8, %v6903_v20, %v4363_v16 }
 0x1ee   : > { %3387 = vmatprep.subr.bf16.mxu0 %v3386_v61 }
 0x1ef   : > { %v2307_v49 = vsel %vm7782_vm11, %v4374_v28, %v4378_v3  ;;  %v2306_v22 = vsel %vm7784_vm12, %v4378_v3, %v7489_v4  ;;  %vm7825_vm12 = vcmp.lt.s32.totalorder %v4804_v15, 10 }
 0x1f0   : > { %v4382_v40 = vpop.permute.xlu1 %4381  ;;  %v3440_v48 = vpack.c.bf16 %v2307_v49, %v2275_v19  ;;  %v6921_v58 = vpop.permute.xlu0 %2287  ;;  %v3438_v61 = vpack.c.bf16 %v2306_v22, %v2274_v9  ;;  %vm7828_vm8 = vmmov %vm7825_vm12 }
 0x1f1   : > { %7785 = vst [vmem:[#allocation4_spill] sm:$0xff] %v6921_v58  ;;  %v2309_v28 = vsel %vm7787_vm9, %v6921_v58, %v4373_v38  ;;  %v4384_v46 = vunpack.i.h.bf16 %v4382_v40  ;;  %v4383_v42 = vunpack.i.l.bf16 %v4382_v40  ;;  %vm7830_vm9 = vmmov %vm7824_vm6 }
 0x1f2   : > { %v3388_v36 = vpack.c.bf16 %v2309_v28, %v2277_v53  ;;  %3439 = vmatprep.subr.bf16.mxu1 %v3438_v61 }
 0x1f3   : > { %3441 = vmatpush1.bf16.msra.mxu1 %v3440_v48  ;;  %v2340_v9 = vsel %vm970_vm14, %v4383_v42, %v4384_v46 }
 0x1f4   : > { %v4392_v33 = vpop.permute.xlu1 %4391  ;;  %v6929_v19 = vpop.permute.xlu0 %4386  ;;  %3389 = vmatpush1.bf16.msra.mxu0 %v3388_v36 }
 0x1f5   : > { %v4394_v60 = vunpack.i.h.bf16 %v4392_v33  ;;  %v4393_v3 = vunpack.i.l.bf16 %v4392_v33  ;;  %7788 = vst [vmem:[#allocation5_spill] sm:$0xff] %v6929_v19  ;;  %v7492_v49 = vunpack.i.h.bf16 %v6929_v19  ;;  %v4388_v38 = vunpack.i.l.bf16 %v6929_v19 }
 0x1f7   : > { %v2372_v16 = vsel %vm1003_vm15, %v4393_v3, %v4394_v60  ;;  %v2339_v53 = vsel %vm970_vm14, %v4384_v46, %v4388_v38  ;;  %v2338_v4 = vsel %vm970_vm14, %v4388_v38, %v7492_v49 }
 0x1f8   : > { %v6937_v40 = vpop.permute.xlu1 %2319  ;;  %v3390_v22 = vpack.c.bf16 %v2372_v16, %v2340_v9  ;;  %v6939_v48 = vpop.permute.xlu0 %4396 }
 0x1f9   : > { %7789 = vst [vmem:[#allocation16_spill] sm:$0xff] %v6939_v48  ;;  %v7494_v33 = vunpack.i.h.bf16 %v6939_v48  ;;  %v4398_v61 = vunpack.i.l.bf16 %v6939_v48  ;;  %v2341_v46 = vsel %vm970_vm14, %v6937_v40, %v4383_v42  ;;  %v7790_v42 = vunpack.i.h.bf16 %v6080_v7 }
 0x1fa   : > { %3391 = vmatprep.subr.bf16.mxu0 %v3390_v22 }
 0x1fb   : > { %v2371_v28 = vsel %vm1003_vm15, %v4394_v60, %v4398_v61  ;;  %v2370_v9 = vsel %vm1003_vm15, %v4398_v61, %v7494_v33 }
 0x1fc   : > { %v4402_v36 = vpop.permute.xlu1 %4401  ;;  %v3444_v16 = vpack.c.bf16 %v2371_v28, %v2339_v53  ;;  %v6955_v58 = vpop.permute.xlu0 %2351  ;;  %v3442_v22 = vpack.c.bf16 %v2370_v9, %v2338_v4 }
 0x1fd   : > { %v2373_v60 = vsel %vm1003_vm15, %v6955_v58, %v4393_v3  ;;  %v4403_v33 = vunpack.i.l.bf16 %v4402_v36  ;;  %v4404_v9 = vunpack.i.h.bf16 %v4402_v36 }
 0x1fe   : > { %v3392_v19 = vpack.c.bf16 %v2373_v60, %v2341_v46  ;;  %3443 = vmatprep.subr.bf16.mxu1 %v3442_v22 }
 0x1ff   : > { %3445 = vmatpush1.bf16.msra.mxu1 %v3444_v16 }
 0x200   : > { %v2386_v38 = vpop.permute.xlu1 %2385  ;;  %v4407_v49 = vpop.permute.xlu0 %4406  ;;  %3393 = vmatpush1.bf16.msra.mxu0 %v3392_v19  ;;  %v7792_v19 = vunpack.i.l.bf16 %v6080_v7 }
 0x201   : > { %v4408_v48 = vunpack.i.l.bf16 %v4407_v49  ;;  %v4409_v61 = vunpack.i.h.bf16 %v4407_v49 }
 0x203   : > { %v1625_v3 = vsel %vm236_vm1, %v7790_v42, %v4408_v48  ;;  %v1623_v49 = vsel %vm236_vm1, %v4409_v61, %v7792_v19  ;;  %v1624_v46 = vsel %vm236_vm1, %v4408_v48, %v4409_v61  ;;  %v7794_v48 = vunpack.i.l.bf16 %v6084_v24 }
 0x204   : > { %v2390_v53 = vpop.permute.xlu1 %2389  ;;  %v2388_v28 = vpop.permute.xlu0 %2387  ;;  %v1592_v61 = vsel %vm203_vm0, %v4403_v33, %v4404_v9 }
 0x205   : > { %v2404_v4 = vsel %vm1036_vm13, %v2386_v38, %v2388_v28  ;;  %v2403_v7 = vsel %vm1036_vm13, %v2388_v28, %v2390_v53  ;;  %v3500_v28 = vpack.c.bf16 %v1624_v46, %v1592_v61  ;;  %v7796_v46 = vunpack.i.h.bf16 %v6223_v23 }
 0x206   : > { %2683 = vmatprep.subr.mxu0 %v2404_v4  ;;  %v7793_v4 = vunpack.i.h.bf16 %v6084_v24 }
 0x208   : > { %v6969_v22 = vpop.permute.xlu1 %2383  ;;  %v6971_v16 = vpop.permute.xlu0 %2391  ;;  %v1593_v42 = vsel %vm203_vm0, %v7793_v4, %v4403_v33  ;;  %v7795_v33 = vpack.c.bf16 %v6113_v18, %v6128_v26 }
 0x209   : > { %7791 = vst [vmem:[#allocation13_spill] sm:$0xff] %v6971_v16  ;;  %v2405_v36 = vsel %vm1036_vm13, %v6969_v22, %v2386_v38  ;;  %v2402_v60 = vsel %vm1036_vm13, %v2390_v53, %v6971_v16  ;;  %v3446_v19 = vpack.c.bf16 %v1625_v3, %v1593_v42  ;;  %v1591_v38 = vsel %vm203_vm0, %v4404_v9, %v7794_v48  ;;  %v7000_v16 = vld [vmem:[%s7314_s1] sm:$0xff] }
 0x20a   : > { %2684 = vmatpush1.msra.mxu0 %v2405_v36  ;;  %2754 = vmatprep.subr.mxu1 %v2402_v60  ;;  %v3498_v53 = vpack.c.bf16 %v1623_v49, %v1591_v38  ;;  %vm7805_vm0 = vcmp.lt.s32.totalorder %v4804_v15, 91 }
 0x20b   : > { %2696 = vmatmul.mubr.f32.vlgmr.msra.gmra.mrb[4].mxu0 %v7000_v16  ;;  %2755 = vmatpush1.msra.mxu1 %v2403_v7  ;;  %vm7808_vm1 = vmmov %vm7805_vm0 }
 0x20c   : > { %3447 = vmatprep.subr.bf16.mxu0 %v3446_v19  ;;  %v4417_v3 = vpop.permute.xlu1 %4416  ;;  %v4412_v36 = vpop.permute.xlu0 %4411  ;;  %2767 = vmatmul.mubr.f32.vlgmr.msra.gmra.mrb[4].mxu1 %v7000_v16  ;;  %v7797_v19 = vunpack.i.h.bf16 %v6211_v45 }
 0x20d   : > { %v4419_v24 = vunpack.i.h.bf16 %v4417_v3  ;;  %v4418_v60 = vunpack.i.l.bf16 %v4417_v3  ;;  %v4414_v4 = vunpack.i.h.bf16 %v4412_v36  ;;  %v4413_v42 = vunpack.i.l.bf16 %v4412_v36  ;;  %3449 = vmatpush1.bf16.msra.mxu0 %v7795_v33  ;;  %3499 = vmatprep.subr.bf16.mxu1 %v3498_v53 }
 0x20e   : > { %3501 = vmatpush1.bf16.msra.mxu1 %v3500_v28  ;;  %3128 = vmatprep.mubr.msk.f32.mxu0 %vm1271_vm10, %v5133_v27  ;;  %v7798_v53 = vunpack.i.l.bf16 %v6223_v23  ;;  %v7799_v3 = vunpack.i.l.bf16 %v6211_v45  ;;  %v7801_v45 = vunpack.i.h.bf16 %v6392_v41 }
 0x20f   : > { %v1688_v9 = vsel %vm302_vm3, %v4418_v60, %v4419_v24  ;;  %v1656_v49 = vsel %vm269_vm2, %v4413_v42, %v4414_v4  ;;  %v1657_v7 = vsel %vm269_vm2, %v7796_v46, %v4413_v42  ;;  %v1689_v18 = vsel %vm302_vm3, %v7797_v19, %v4418_v60  ;;  %3129 = vmatprep.mubr.msk.f32.mxu1 %vm1271_vm10, %v5133_v27 }
 0x210   : > { %v3504_v26 = vpack.c.bf16 %v1688_v9, %v1656_v49  ;;  %v4427_v48 = vpop.permute.xlu1 %4426  ;;  %v4422_v38 = vpop.permute.xlu0 %4421  ;;  %v3450_v61 = vpack.c.bf16 %v1689_v18, %v1657_v7  ;;  %v1655_v28 = vsel %vm269_vm2, %v4414_v4, %v7798_v53  ;;  %v1687_v36 = vsel %vm302_vm3, %v4419_v24, %v7799_v3  ;;  %vm7811_vm2 = vmmov %vm7805_vm0 }
 0x211   : > { %v4429_v42 = vunpack.i.h.bf16 %v4427_v48  ;;  %v4428_v33 = vunpack.i.l.bf16 %v4427_v48  ;;  %v4424_v60 = vunpack.i.h.bf16 %v4422_v38  ;;  %v4423_v46 = vunpack.i.l.bf16 %v4422_v38 }
 0x212   : > { %3451 = vmatprep.subr.bf16.mxu0 %v3450_v61  ;;  %v3502_v27 = vpack.c.bf16 %v1687_v36, %v1655_v28  ;;  %v7800_v4 = vpack.c.bf16 %v6254_v17, %v6274_v50  ;;  %v7802_v49 = vunpack.i.h.bf16 %v6379_v2  ;;  %v7803_v61 = vunpack.i.l.bf16 %v6392_v41 }
 0x213   : > { %v1752_v9 = vsel %vm368_vm5, %v4428_v33, %v4429_v42  ;;  %v1720_v23 = vsel %vm335_vm4, %v4423_v46, %v4424_v60  ;;  %v1721_v24 = vsel %vm335_vm4, %v7801_v45, %v4423_v46  ;;  %v7804_v50 = vunpack.i.l.bf16 %v6379_v2 }
 0x214   : > { %3453 = vmatpush1.bf16.msra.mxu0 %v7800_v4  ;;  %v1753_v7 = vsel %vm368_vm5, %v7802_v49, %v4428_v33  ;;  %v3508_v19 = vpack.c.bf16 %v1752_v9, %v1720_v23  ;;  %3503 = vmatprep.subr.bf16.mxu1 %v3502_v27  ;;  %v4437_v18 = vpop.permute.xlu1 %4436  ;;  %v4432_v48 = vpop.permute.xlu0 %4431  ;;  %v1719_v17 = vsel %vm335_vm4, %v4424_v60, %v7803_v61  ;;  %v7807_v2 = vunpack.i.h.bf16 %v6504_v57 }
 0x215   : > { %v3454_v38 = vpack.c.bf16 %v1753_v7, %v1721_v24  ;;  %v1751_v53 = vsel %vm368_vm5, %v4429_v42, %v7804_v50  ;;  %3505 = vmatpush1.bf16.msra.mxu1 %v3504_v26  ;;  %v4439_v28 = vunpack.i.h.bf16 %v4437_v18  ;;  %v4438_v3 = vunpack.i.l.bf16 %v4437_v18 }
 0x216   : > { %v4434_v36 = vunpack.i.h.bf16 %v4432_v48  ;;  %v4433_v33 = vunpack.i.l.bf16 %v4432_v48  ;;  %v3506_v46 = vpack.c.bf16 %v1751_v53, %v1719_v17  ;;  %v7806_v60 = vpack.c.bf16 %v6408_v21, %v6421_v56 }
 0x217   : > { %3455 = vmatprep.subr.bf16.mxu0 %v3454_v38  ;;  %v1816_v27 = vsel %vm434_vm7, %v4438_v3, %v4439_v28  ;;  %v7809_v42 = vunpack.i.h.bf16 %v6499_v44  ;;  %v7810_v49 = vunpack.i.l.bf16 %v6504_v57  ;;  %v7812_v56 = vunpack.i.l.bf16 %v6499_v44 }
 0x218   : > { %v1784_v41 = vsel %vm7805_vm0, %v4433_v33, %v4434_v36  ;;  %3457 = vmatpush1.bf16.msra.mxu0 %v7806_v60  ;;  %v1785_v26 = vsel %vm7808_vm1, %v7807_v2, %v4433_v33  ;;  %3507 = vmatprep.subr.bf16.mxu1 %v3506_v46  ;;  %v4447_v4 = vpop.permute.xlu1 %4446  ;;  %v4442_v45 = vpop.permute.xlu0 %4441  ;;  %vm7813_vm3 = vcmp.lt.s32.totalorder %v4804_v15, 11  ;;  %vm7814_vm4 = vcmp.lt.s32.totalorder %v4804_v15, 89  ;;  %vm7832_vm0 = vmmov %vm7828_vm8 }
 0x219   : > { %v1817_v9 = vsel %vm434_vm7, %v7809_v42, %v4438_v3  ;;  %v3512_v23 = vpack.c.bf16 %v1816_v27, %v1784_v41  ;;  %v1783_v21 = vsel %vm7811_vm2, %v4434_v36, %v7810_v49  ;;  %v1815_v7 = vsel %vm434_vm7, %v4439_v28, %v7812_v56  ;;  %3509 = vmatpush1.bf16.msra.mxu1 %v3508_v19  ;;  %vm7817_vm5 = vmmov %vm7814_vm4 }
 0x21a   : > { %v3458_v24 = vpack.c.bf16 %v1817_v9, %v1785_v26  ;;  %v4449_v18 = vunpack.i.h.bf16 %v4447_v4  ;;  %v4448_v48 = vunpack.i.l.bf16 %v4447_v4  ;;  %v4444_v38 = vunpack.i.h.bf16 %v4442_v45  ;;  %vm7819_vm7 = vmmov %vm7813_vm3 }
 0x21b   : > { %v4443_v61 = vunpack.i.l.bf16 %v4442_v45  ;;  %v3510_v17 = vpack.c.bf16 %v1815_v7, %v1783_v21  ;;  %v7815_v53 = vpack.c.bf16 %v6521_v14, %v6532_v43  ;;  %v7816_v44 = vunpack.i.h.bf16 %v6587_v39  ;;  %vm7821_vm10 = vmmov %vm7814_vm4 }
 0x21c   : > { %3459 = vmatprep.subr.bf16.mxu0 %v3458_v24  ;;  %v1880_v50 = vsel %vm7813_vm3, %v4448_v48, %v4449_v18  ;;  %v7818_v28 = vunpack.i.h.bf16 %v6581_v35  ;;  %v4457_v33 = vpop.permute.xlu1 %4456  ;;  %v4452_v46 = vpop.permute.xlu0 %4451  ;;  %v7820_v41 = vunpack.i.l.bf16 %v6587_v39  ;;  %v7822_v43 = vunpack.i.l.bf16 %v6581_v35  ;;  %vm7823_vm11 = vmmov %vm7813_vm3 }
 0x21d   : > { %v1848_v57 = vsel %vm7814_vm4, %v4443_v61, %v4444_v38  ;;  %3461 = vmatpush1.bf16.msra.mxu0 %v7815_v53  ;;  %v1849_v19 = vsel %vm7817_vm5, %v7816_v44, %v4443_v61  ;;  %3511 = vmatprep.subr.bf16.mxu1 %v3510_v17  ;;  %v4459_v2 = vunpack.i.h.bf16 %v4457_v33  ;;  %v4458_v26 = vunpack.i.l.bf16 %v4457_v33  ;;  %vm7834_vm1 = vmmov %vm7824_vm6 }
 0x21e   : > { %v1881_v3 = vsel %vm7819_vm7, %v7818_v28, %v4448_v48  ;;  %v3516_v36 = vpack.c.bf16 %v1880_v50, %v1848_v57  ;;  %v1847_v14 = vsel %vm7821_vm10, %v4444_v38, %v7820_v41  ;;  %v1879_v60 = vsel %vm7823_vm11, %v4449_v18, %v7822_v43  ;;  %3513 = vmatpush1.bf16.msra.mxu1 %v3512_v23 }
 0x21f   : > { %v3462_v27 = vpack.c.bf16 %v1881_v3, %v1849_v19  ;;  %v4454_v42 = vunpack.i.h.bf16 %v4452_v46  ;;  %v4453_v9 = vunpack.i.l.bf16 %v4452_v46  ;;  %v3514_v4 = vpack.c.bf16 %v1879_v60, %v1847_v14 }
 0x220   : > { %v1944_v45 = vsel %vm7824_vm6, %v4458_v26, %v4459_v2  ;;  %v7826_v24 = vpack.c.bf16 %v6595_v31, %v6605_v25  ;;  %v7827_v35 = vunpack.i.h.bf16 %v6641_v51  ;;  %v7829_v49 = vunpack.i.h.bf16 %v6635_v12  ;;  %v4467_v56 = vpop.permute.xlu1 %4466  ;;  %v4462_v7 = vpop.permute.xlu0 %4461 }
 0x221   : > { %3463 = vmatprep.subr.bf16.mxu0 %v3462_v27  ;;  %v1912_v39 = vsel %vm7825_vm12, %v4453_v9, %v4454_v42  ;;  %3515 = vmatprep.subr.bf16.mxu1 %v3514_v4  ;;  %v7831_v48 = vunpack.i.l.bf16 %v6641_v51  ;;  %v7833_v25 = vunpack.i.l.bf16 %v6635_v12  ;;  %v4464_v17 = vunpack.i.h.bf16 %v4462_v7 }
 0x222   : > { %3465 = vmatpush1.bf16.msra.mxu0 %v7826_v24  ;;  %v1913_v23 = vsel %vm7828_vm8, %v7827_v35, %v4453_v9  ;;  %v1945_v21 = vsel %vm7830_vm9, %v7829_v49, %v4458_v26  ;;  %v3520_v61 = vpack.c.bf16 %v1944_v45, %v1912_v39  ;;  %3517 = vmatpush1.bf16.msra.mxu1 %v3516_v36  ;;  %v4463_v50 = vunpack.i.l.bf16 %v4462_v7 }
 0x223   : > { %v3466_v18 = vpack.c.bf16 %v1945_v21, %v1913_v23  ;;  %v1911_v31 = vsel %vm7832_vm0, %v4454_v42, %v7831_v48  ;;  %v1943_v38 = vsel %vm7834_vm1, %v4459_v2, %v7833_v25  ;;  %v4469_v57 = vunpack.i.h.bf16 %v4467_v56 }
 0x224   : > { %v3518_v53 = vpack.c.bf16 %v1943_v38, %v1911_v31  ;;  %v4468_v44 = vunpack.i.l.bf16 %v4467_v56  ;;  %vm7835_vm2 = vcmp.lt.s32.totalorder %v4804_v15, 1  ;;  %v7836_v51 = vpack.c.bf16 %v6649_v47, %v6659_v37  ;;  %v4472_v33 = vpop.permute.xlu1 %4471  ;;  %v2014_v46 = vpop.permute.xlu0 %2013 }
 0x225   : > { %3467 = vmatprep.subr.bf16.mxu0 %v3466_v18  ;;  %v1976_v19 = vsel %vm7835_vm2, %v4463_v50, %v4464_v17  ;;  %v7837_v12 = vunpack.i.h.bf16 %v6686_v1  ;;  %vm7838_vm3 = vmmov %vm7835_vm2  ;;  %v7839_v3 = vunpack.i.l.bf16 %v6686_v1  ;;  %v3472_v47 = vpack.c.bf16 %v6537_v11, %v6695_v54  ;;  %v1411_v24 = vpop.f32.mrb[0].mxu1 }
 0x226   : > { %3469 = vmatpush1.bf16.msra.mxu0 %v7836_v51  ;;  %vm7840_vm4 = vmmov %vm7835_vm2  ;;  %3519 = vmatprep.subr.bf16.mxu1 %v3518_v53  ;;  %v3524_v37 = vpack.c.bf16 %v6868_v13, %v1976_v19  ;;  %v4474_v14 = vunpack.i.h.bf16 %v4472_v33  ;;  %v4473_v43 = vunpack.i.l.bf16 %v4472_v33  ;;  %v7841_v1 = vunpack.i.h.bf16 %v6706_v0  ;;  %1560 = vst [vmem:[#allocation3 + $0x10] sm:$0xf] %v1411_v24  ;;  %v1413_v49 = vpop.f32.mrb[1].mxu1  ;;  %v7874_v24 = vld [vmem:[#allocation6_spill] sm:$0xff] }
 0x227   : > { %v1977_v28 = vsel %vm7838_vm3, %v7837_v12, %v4463_v50  ;;  %v1975_v36 = vsel %vm7840_vm4, %v4464_v17, %v7839_v3  ;;  %3521 = vmatpush1.bf16.msra.mxu1 %v3520_v61  ;;  %vm7842_vm5 = vcmp.lt.s32.totalorder %v4804_v15, 127  ;;  %v7843_v2 = vunpack.i.h.bf16 %v6720_v30  ;;  %1561 = vst [vmem:[#allocation3 + $0x18] sm:$0xf] %v1413_v49 }
 0x228   : > { %v3470_v27 = vpack.c.bf16 %v6847_v62, %v1977_v28  ;;  %v3522_v41 = vpack.c.bf16 %v6678_v6, %v1975_v36  ;;  %v2017_v60 = vsel %vm7842_vm5, %v7841_v1, %v4468_v44  ;;  %vm7844_vm7 = vcmp.lt.s32.totalorder %v4804_v15, 119  ;;  %vm7845_vm10 = vmmov %vm7842_vm5  ;;  %v4477_v13 = vpop.permute.xlu1 %4476  ;;  %v2046_v26 = vpop.permute.xlu0 %2045 }
 0x229   : > { %v2049_v6 = vsel %vm7844_vm7, %v7843_v2, %v4473_v43  ;;  %v2016_v11 = vsel %vm7845_vm10, %v4468_v44, %v4469_v57  ;;  %vm7846_vm11 = vmmov %vm7844_vm7  ;;  %v4479_v35 = vunpack.i.h.bf16 %v4477_v13  ;;  %v4478_v23 = vunpack.i.l.bf16 %v4477_v13  ;;  %v1340_v18 = vpop.f32.mrb[0].mxu0 }
 0x22a   : > { %3471 = vmatprep.subr.bf16.mxu0 %v3470_v27  ;;  %3523 = vmatprep.subr.bf16.mxu1 %v3522_v41  ;;  %v2048_v54 = vsel %vm7846_vm11, %v4473_v43, %v4474_v14  ;;  %v3476_v62 = vpack.c.bf16 %v2049_v6, %v2017_v60  ;;  %vm7847_vm6 = vmmov %vm7842_vm5  ;;  %v7851_v48 = vunpack.i.h.bf16 %v6752_v59  ;;  %vm7852_vm0 = vcmp.lt.s32.totalorder %v4804_v15, 118  ;;  %1558 = vst [vmem:[#allocation3] sm:$0xf] %v1340_v18  ;;  %v1342_v17 = vpop.f32.mrb[1].mxu0 }
 0x22b   : > { %3473 = vmatpush1.bf16.msra.mxu0 %v3472_v47  ;;  %v3474_v42 = vpack.c.bf16 %v2048_v54, %v2016_v11  ;;  %v2015_v0 = vsel %vm7847_vm6, %v4469_v57, %v2014_v46  ;;  %vm7848_vm12 = vmmov %vm7842_vm5  ;;  %3525 = vmatpush1.bf16.msra.mxu1 %v3524_v37  ;;  %v7853_v31 = vunpack.i.h.bf16 %v6766_v52  ;;  %vm7854_vm1 = vcmp.lt.s32.totalorder %v4804_v15, 117  ;;  %1559 = vst [vmem:[#allocation3 + $0x8] sm:$0xf] %v1342_v17 }
 0x22c   : > { %v2022_v30 = vsel %vm7848_vm12, %v2014_v46, %v6718_v29  ;;  %vm7849_vm8 = vmmov %vm7844_vm7  ;;  %v4482_v21 = vpop.permute.xlu1 %4481  ;;  %v2078_v56 = vpop.permute.xlu0 %2077  ;;  %vm7862_vm11 = vcmp.lt.s32.totalorder %v4804_v15, 39  ;;  %v7863_v37 = vunpack.i.h.bf16 %v6812_v55  ;;  %vm7864_vm6 = vcmp.lt.s32.totalorder %v4804_v15, 38 }
 0x22d   : > { %v2047_v9 = vsel %vm7849_vm8, %v4474_v14, %v2046_v26  ;;  %vm7850_vm9 = vmmov %vm7844_vm7  ;;  %3475 = vmatprep.subr.bf16.mxu0 %v3474_v42  ;;  %v4484_v29 = vunpack.i.h.bf16 %v4482_v21  ;;  %v4483_v7 = vunpack.i.l.bf16 %v4482_v21 }
 0x22e   : > { %v2054_v4 = vsel %vm7850_vm9, %v2046_v26, %v6740_v5  ;;  %v3528_v39 = vpack.c.bf16 %v2047_v9, %v2015_v0  ;;  %v2081_v5 = vsel %vm7852_vm0, %v7851_v48, %v4478_v23  ;;  %vm7855_vm2 = vmmov %vm7852_vm0  ;;  %v7880_v48 = vld [vmem:[#allocation7_spill] sm:$0xff] }
 0x22f   : > { %v3526_v45 = vpack.c.bf16 %v2054_v4, %v2022_v30  ;;  %3477 = vmatpush1.bf16.msra.mxu0 %v3476_v62  ;;  %v2113_v25 = vsel %vm7854_vm1, %v7853_v31, %v4483_v7  ;;  %v2080_v38 = vsel %vm7855_vm2, %v4478_v23, %v4479_v35  ;;  %vm7856_vm3 = vmmov %vm7854_vm1 }
 0x230   : > { %v2112_v61 = vsel %vm7856_vm3, %v4483_v7, %v4484_v29  ;;  %v3480_v50 = vpack.c.bf16 %v2113_v25, %v2081_v5  ;;  %v4487_v57 = vpop.permute.xlu1 %4486  ;;  %v2110_v53 = vpop.permute.xlu0 %2109  ;;  %vm7857_vm4 = vmmov %vm7852_vm0  ;;  %vm7873_vm3 = vcmp.lt.s32.totalorder %v4804_v15, 37  ;;  %v7883_v25 = vld [vmem:[#allocation24_spill] sm:$0xff] }
 0x231   : > { %3527 = vmatprep.subr.bf16.mxu1 %v3526_v45  ;;  %v3478_v59 = vpack.c.bf16 %v2112_v61, %v2080_v38  ;;  %v2079_v44 = vsel %vm7857_vm4, %v4479_v35, %v2078_v56  ;;  %vm7858_vm5 = vmmov %vm7852_vm0  ;;  %v4489_v3 = vunpack.i.h.bf16 %v4487_v57  ;;  %v4488_v36 = vunpack.i.l.bf16 %v4487_v57 }
 0x232   : > { %3529 = vmatpush1.bf16.msra.mxu1 %v3528_v39  ;;  %v2086_v52 = vsel %vm7858_vm5, %v2078_v56, %v6764_v63  ;;  %vm7859_vm7 = vmmov %vm7854_vm1  ;;  %v7861_v63 = vunpack.i.h.bf16 %v6798_v8  ;;  %v7875_v35 = vunpack.i.h.bf16 %v7874_v24  ;;  %vm7876_vm4 = vcmp.lt.s32.totalorder %v4804_v15, 29 }
 0x233   : > { %v2111_v19 = vsel %vm7859_vm7, %v4484_v29, %v2110_v53  ;;  %vm7860_vm10 = vmmov %vm7854_vm1  ;;  %3479 = vmatprep.subr.bf16.mxu0 %v3478_v59 }
 0x234   : > { %v2118_v51 = vsel %vm7860_vm10, %v2110_v53, %v6786_v10  ;;  %v3532_v28 = vpack.c.bf16 %v2111_v19, %v2079_v44  ;;  %3481 = vmatpush1.bf16.msra.mxu0 %v3480_v50  ;;  %v4492_v33 = vpop.permute.xlu1 %4491  ;;  %v2142_v46 = vpop.permute.xlu0 %2141  ;;  %v2145_v47 = vsel %vm7862_vm11, %v7861_v63, %v4488_v36  ;;  %vm7865_vm12 = vmmov %vm7862_vm11  ;;  %v7885_v19 = vld [vmem:[#allocation25_spill] sm:$0xff] }
 0x235   : > { %v3530_v12 = vpack.c.bf16 %v2118_v51, %v2086_v52  ;;  %v4494_v27 = vunpack.i.h.bf16 %v4492_v33  ;;  %v4493_v41 = vunpack.i.l.bf16 %v4492_v33  ;;  %v2144_v14 = vsel %vm7865_vm12, %v4488_v36, %v4489_v3  ;;  %vm7866_vm8 = vmmov %vm7864_vm6 }
 0x236   : > { %vm7867_vm9 = vmmov %vm7862_vm11  ;;  %v7886_v51 = vunpack.i.h.bf16 %v7885_v19 }
 0x237   : > { %3531 = vmatprep.subr.bf16.mxu1 %v3530_v12  ;;  %v2177_v10 = vsel %vm7864_vm6, %v7863_v37, %v4493_v41  ;;  %v2176_v43 = vsel %vm7866_vm8, %v4493_v41, %v4494_v27  ;;  %v2143_v8 = vsel %vm7867_vm9, %v4489_v3, %v2142_v46  ;;  %vm7868_vm0 = vmmov %vm7867_vm9  ;;  %vm7887_vm8 = vcmp.lt.s32.totalorder %v4804_v15, 28 }
 0x238   : > { %3533 = vmatpush1.bf16.msra.mxu1 %v3532_v28  ;;  %v3484_v1 = vpack.c.bf16 %v2177_v10, %v2145_v47  ;;  %v4497_v60 = vpop.permute.xlu1 %4496  ;;  %v2174_v2 = vpop.permute.xlu0 %2173  ;;  %v3482_v6 = vpack.c.bf16 %v2176_v43, %v2144_v14  ;;  %v2150_v55 = vsel %vm7868_vm0, %v2142_v46, %v6810_v34  ;;  %vm7869_vm1 = vmmov %vm7864_vm6  ;;  %v7871_v34 = vld [vmem:[#allocation10_spill] sm:$0xff]  ;;  %v7888_v28 = vld [vmem:[#allocation15_spill] sm:$0xff]  ;;  %vm7890_vm9 = vcmp.lt.s32.totalorder %v4804_v15, 27 }
 0x239   : > { %v2175_v11 = vsel %vm7869_vm1, %v4494_v27, %v2174_v2  ;;  %vm7870_vm2 = vmmov %vm7869_vm1  ;;  %v4499_v26 = vunpack.i.h.bf16 %v4497_v60  ;;  %v4498_v42 = vunpack.i.l.bf16 %v4497_v60  ;;  %v7872_v45 = vunpack.i.h.bf16 %v7871_v34  ;;  %v7896_v43 = vld [vmem:[#allocation4_spill] sm:$0xff] }
 0x23a   : > { %v2182_v54 = vsel %vm7870_vm2, %v2174_v2, %v6832_v32  ;;  %v3536_v13 = vpack.c.bf16 %v2175_v11, %v2143_v8  ;;  %3483 = vmatprep.subr.bf16.mxu0 %v3482_v6  ;;  %vm7877_vm5 = vmmov %vm7873_vm3  ;;  %v7889_v3 = vunpack.i.h.bf16 %v7888_v28 }
 0x23b   : > { %v3534_v62 = vpack.c.bf16 %v2182_v54, %v2150_v55  ;;  %3485 = vmatpush1.bf16.msra.mxu0 %v3484_v1  ;;  %v2209_v39 = vsel %vm7873_vm3, %v7872_v45, %v4498_v42  ;;  %v2208_v23 = vsel %vm7877_vm5, %v4498_v42, %v4499_v26  ;;  %vm7878_vm7 = vmmov %vm7876_vm4  ;;  %v7900_v42 = vld [vmem:[#allocation16_spill] sm:$0xff] }
 0x23c   : > { %v4502_v0 = vpop.permute.xlu1 %4501  ;;  %v2206_v30 = vpop.permute.xlu0 %2205  ;;  %vm7879_vm10 = vmmov %vm7873_vm3 }
 0x23d   : > { %3535 = vmatprep.subr.bf16.mxu1 %v3534_v62  ;;  %v4504_v9 = vunpack.i.h.bf16 %v4502_v0  ;;  %v4503_v4 = vunpack.i.l.bf16 %v4502_v0  ;;  %v2207_v18 = vsel %vm7879_vm10, %v4499_v26, %v2206_v30  ;;  %vm7881_vm11 = vmmov %vm7873_vm3  ;;  %v7901_v0 = vunpack.i.h.bf16 %v7900_v42 }
 0x23e   : > { %3537 = vmatpush1.bf16.msra.mxu1 %v3536_v13  ;;  %v2214_v5 = vsel %vm7881_vm11, %v2206_v30, %v7880_v48  ;;  %vm7882_vm6 = vmmov %vm7876_vm4  ;;  %v7902_v48 = vld [vmem:[#allocation13_spill] sm:$0xff] }
 0x23f   : > { %v2241_v32 = vsel %vm7876_vm4, %v7875_v35, %v4503_v4  ;;  %v2240_v49 = vsel %vm7878_vm7, %v4503_v4, %v4504_v9  ;;  %vm7884_vm12 = vmmov %vm7876_vm4 }
 0x240   : > { %v3488_v21 = vpack.c.bf16 %v2241_v32, %v2209_v39  ;;  %v4507_v56 = vpop.permute.xlu1 %4506  ;;  %v2238_v29 = vpop.permute.xlu0 %2237  ;;  %v3486_v7 = vpack.c.bf16 %v2240_v49, %v2208_v23  ;;  %vm7891_vm0 = vmmov %vm7887_vm8 }
 0x241   : > { %v2239_v31 = vsel %vm7882_vm6, %v4504_v9, %v2238_v29  ;;  %v2246_v38 = vsel %vm7884_vm12, %v2238_v29, %v7883_v25  ;;  %v4509_v50 = vunpack.i.h.bf16 %v4507_v56  ;;  %v4508_v57 = vunpack.i.l.bf16 %v4507_v56  ;;  %vm7892_vm1 = vmmov %vm7890_vm9 }
 0x242   : > { %v3538_v61 = vpack.c.bf16 %v2246_v38, %v2214_v5  ;;  %v3540_v17 = vpack.c.bf16 %v2239_v31, %v2207_v18  ;;  %3487 = vmatprep.subr.bf16.mxu0 %v3486_v7  ;;  %vm7893_vm2 = vmmov %vm7891_vm0 }
 0x243   : > { %3489 = vmatpush1.bf16.msra.mxu0 %v3488_v21  ;;  %v2273_v12 = vsel %vm7887_vm8, %v7886_v51, %v4508_v57  ;;  %v2272_v33 = vsel %vm7891_vm0, %v4508_v57, %v4509_v50  ;;  %vm7894_vm3 = vmmov %vm7891_vm0 }
 0x244   : > { %v4512_v53 = vpop.permute.xlu1 %4511  ;;  %v2270_v59 = vpop.permute.xlu0 %2269  ;;  %3539 = vmatprep.subr.bf16.mxu1 %v3538_v61  ;;  %vm7895_vm4 = vmmov %vm7892_vm1 }
 0x245   : > { %v4514_v44 = vunpack.i.h.bf16 %v4512_v53  ;;  %v4513_v52 = vunpack.i.l.bf16 %v4512_v53  ;;  %3541 = vmatpush1.bf16.msra.mxu1 %v3540_v17  ;;  %v2271_v37 = vsel %vm7893_vm2, %v4509_v50, %v2270_v59  ;;  %v2278_v10 = vsel %vm7894_vm3, %v2270_v59, %v6903_v20  ;;  %vm7897_vm5 = vmmov %vm7892_vm1  ;;  %v7898_v20 = vld [vmem:[#allocation5_spill] sm:$0xff] }
 0x246   : > { %v7899_v13 = vunpack.i.h.bf16 %v7898_v20 }
 0x247   : > { %v2305_v36 = vsel %vm7890_vm9, %v7889_v3, %v4513_v52  ;;  %v2304_v46 = vsel %vm7892_vm1, %v4513_v52, %v4514_v44 }
 0x248   : > { %v3492_v27 = vpack.c.bf16 %v2305_v36, %v2273_v12  ;;  %v4517_v41 = vpop.permute.xlu1 %4516  ;;  %v2302_v63 = vpop.permute.xlu0 %2301  ;;  %v3490_v47 = vpack.c.bf16 %v2304_v46, %v2272_v33 }
 0x249   : > { %v2303_v14 = vsel %vm7895_vm4, %v4514_v44, %v2302_v63  ;;  %v2310_v1 = vsel %vm7897_vm5, %v2302_v63, %v7896_v43  ;;  %v4519_v6 = vunpack.i.h.bf16 %v4517_v41  ;;  %v4518_v8 = vunpack.i.l.bf16 %v4517_v41 }
 0x24a   : > { %v3542_v60 = vpack.c.bf16 %v2310_v1, %v2278_v10  ;;  %v3544_v2 = vpack.c.bf16 %v2303_v14, %v2271_v37  ;;  %3491 = vmatprep.subr.bf16.mxu0 %v3490_v47 }
 0x24b   : > { %3493 = vmatpush1.bf16.msra.mxu0 %v3492_v27  ;;  %v2337_v26 = vsel %vm970_vm14, %v7899_v13, %v4518_v8  ;;  %v2336_v9 = vsel %vm970_vm14, %v4518_v8, %v4519_v6 }
 0x24c   : > { %v4522_v55 = vpop.permute.xlu1 %4521  ;;  %v2334_v11 = vpop.permute.xlu0 %2333  ;;  %3543 = vmatprep.subr.bf16.mxu1 %v3542_v60 }
 0x24d   : > { %v4524_v54 = vunpack.i.h.bf16 %v4522_v55  ;;  %v4523_v62 = vunpack.i.l.bf16 %v4522_v55  ;;  %3545 = vmatpush1.bf16.msra.mxu1 %v3544_v2  ;;  %v2335_v35 = vsel %vm970_vm14, %v4519_v6, %v2334_v11  ;;  %v2342_v32 = vsel %vm970_vm14, %v2334_v11, %v6937_v40 }
 0x24f   : > { %v2369_v30 = vsel %vm1003_vm15, %v7901_v0, %v4523_v62  ;;  %v2368_v4 = vsel %vm1003_vm15, %v4523_v62, %v4524_v54 }
 0x250   : > { %v3496_v34 = vpack.c.bf16 %v2369_v30, %v2337_v26  ;;  %v2394_v45 = vpop.permute.xlu1 %2393  ;;  %v2366_v39 = vpop.permute.xlu0 %2365  ;;  %v3494_v24 = vpack.c.bf16 %v2368_v4, %v2336_v9 }
 0x251   : > { %v2367_v23 = vsel %vm1003_vm15, %v4524_v54, %v2366_v39  ;;  %v2374_v49 = vsel %vm1003_vm15, %v2366_v39, %v6955_v58  ;;  %v2401_v5 = vsel %vm1036_vm13, %v7902_v48, %v2394_v45 }
 0x252   : > { %v3546_v21 = vpack.c.bf16 %v2374_v49, %v2342_v32  ;;  %v3548_v56 = vpack.c.bf16 %v2367_v23, %v2335_v35  ;;  %3495 = vmatprep.subr.bf16.mxu0 %v3494_v24 }
 0x253   : > { %3497 = vmatpush1.bf16.msra.mxu0 %v3496_v34 }
 0x254   : > { %v2398_v29 = vpop.permute.xlu1 %2397  ;;  %v2396_v7 = vpop.permute.xlu0 %2395  ;;  %3547 = vmatprep.subr.bf16.mxu1 %v3546_v21 }
 0x255   : > { %3549 = vmatpush1.bf16.msra.mxu1 %v3548_v56  ;;  %v2400_v18 = vsel %vm1036_vm13, %v2394_v45, %v2396_v7  ;;  %v2406_v40 = vsel %vm1036_vm13, %v2398_v29, %v6969_v22  ;;  %v2399_v58 = vsel %vm1036_vm13, %v2396_v7, %v2398_v29 }
 0x256   : > { %2825 = vmatprep.subr.mxu0 %v2400_v18  ;;  %2896 = vmatprep.subr.mxu1 %v2406_v40 }
 0x257   : > { %2826 = vmatpush1.msra.mxu0 %v2401_v5 }
 0x258   : > { %2838 = vmatmul.mubr.f32.vlgmr.msra.gmra.mrb[6].mxu0 %v7000_v16 }
 0x259   : > { %2897 = vmatpush1.msra.mxu1 %v2399_v58 }
 0x25a   : > { %2909 = vmatmul.mubr.f32.vlgmr.msra.gmra.mrb[6].mxu1 %v7000_v16 }
 0x264   : > { %v1553_v31 = vpop.f32.mrb[2].mxu1  ;;  %v7285_v16 = vpop.permute.xlu0 %2958 }
 0x265   : > { %1564 = vst [vmem:[#allocation3 + $0x30] sm:$0xf] %v1553_v31  ;;  %v1555_v25 = vpop.f32.mrb[3].mxu1 }
 0x266   : > { %1565 = vst [vmem:[#allocation3 + $0x38] sm:$0xf] %v1555_v25 }
 0x267   : > { %v1482_v22 = vpop.f32.mrb[2].mxu0 }
 0x268   : > { %1562 = vst [vmem:[#allocation3 + $0x20] sm:$0xf] %v1482_v22  ;;  %v1484_v38 = vpop.f32.mrb[3].mxu0 }
 0x269   : > { %1563 = vst [vmem:[#allocation3 + $0x28] sm:$0xf] %v1484_v38 }
 0x2de   : > { %v2697_v61 = vpop.f32.mrb[4].mxu0 }
 0x2df   : > { %v2923_v17 = vrot.slane %v2697_v61, 4  ;;  %v2699_v15 = vpop.f32.mrb[5].mxu0  ;;  %v2768_v50 = vpop.f32.mrb[4].mxu1 }
 0x2e0   : > { %v2924_v57 = vrot.slane %v2699_v15, 4  ;;  %v2925_v53 = vrot.slane %v2768_v50, 4  ;;  %v2770_v59 = vpop.f32.mrb[5].mxu1 }
 0x2e1   : > { %2939 = vst [vmem:[#allocation3] sm:$0xf0] %v2923_v17  ;;  %v2926_v44 = vrot.slane %v2770_v59, 4 }
 0x2e2   : > { %2940 = vst [vmem:[#allocation3 + $0x8] sm:$0xf0] %v2924_v57  ;;  %2941 = vst [vmem:[#allocation3 + $0x10] sm:$0xf0] %v2925_v53 }
 0x2e3   : > { %2942 = vst [vmem:[#allocation3 + $0x18] sm:$0xf0] %v2926_v44 }
 0x2e8   : > { %v2947_v52 = vld [vmem:[#allocation3] sm:$0xff] }
 0x2e9   : > { %v2948_v19 = vld [vmem:[#allocation3 + $0x8] sm:$0xff]  ;;  %v2949_v51 = vld [vmem:[#allocation3 + $0x10] sm:$0xff]  ;;  %v2961_v12 = vadd.f32 %v7285_v16, %v2947_v52 }
 0x2ea   : > { %v2950_v28 = vld [vmem:[#allocation3 + $0x18] sm:$0xff]  ;;  %v2962_v3 = vadd.f32 %v7285_v16, %v2948_v19  ;;  %v2963_v36 = vadd.f32 %v7285_v16, %v2949_v51 }
 0x2eb   : > { %v2964_v33 = vadd.f32 %v7285_v16, %v2950_v28  ;;  %v2969_v46 = vmin.f32 %v2961_v12, 20.0 }
 0x2ec   : > { %v2970_v27 = vmin.f32 %v2962_v3, 20.0  ;;  %v2971_v41 = vmin.f32 %v2963_v36, 20.0 }
 0x2ed   : > { %v2972_v63 = vmin.f32 %v2964_v33, 20.0  ;;  %v2977_v47 = vmul.f32 1.442695, %v2969_v46 }
 0x2ee   : > { %v2979_v37 = vmul.f32 1.442695, %v2970_v27  ;;  %v2981_v10 = vmul.f32 1.442695, %v2971_v41 }
 0x2ef   : > { %4527 = vpow2.f32 %v2977_v47  ;;  %v2983_v14 = vmul.f32 1.442695, %v2972_v63 }
 0x2f0   : > { %4529 = vpow2.f32 %v2979_v37 }
 0x2f1   : > { %4531 = vpow2.f32 %v2981_v10 }
 0x2f2   : > { %4533 = vpow2.f32 %v2983_v14 }
 0x2f9   : > { %v4528_v43 = vpop.eup %4527 }
 0x2fa   : > { %v4530_v1 = vpop.eup %4529  ;;  %v2993_v60 = vadd.f32 2.0, %v4528_v43 }
 0x2fb   : > { %v4532_v2 = vpop.eup %4531  ;;  %v2994_v6 = vadd.f32 2.0, %v4530_v1 }
 0x2fc   : > { %v4534_v8 = vpop.eup %4533  ;;  %v2995_v55 = vadd.f32 2.0, %v4532_v2  ;;  %v3001_v11 = vmul.f32 %v4528_v43, %v2993_v60 }
 0x2fd   : > { %v2996_v54 = vadd.f32 2.0, %v4534_v8  ;;  %v3002_v62 = vmul.f32 %v4530_v1, %v2994_v6 }
 0x2fe   : > { %v3003_v20 = vmul.f32 %v4532_v2, %v2995_v55  ;;  %v3009_v13 = vadd.f32 2.0, %v3001_v11 }
 0x2ff   : > { %v3004_v26 = vmul.f32 %v4534_v8, %v2996_v54  ;;  %v3010_v42 = vadd.f32 2.0, %v3002_v62 }
 0x300   : > { %v3011_v0 = vadd.f32 2.0, %v3003_v20  ;;  %4535 = vrcp.f32 %v3009_v13 }
 0x301   : > { %v3012_v30 = vadd.f32 2.0, %v3004_v26  ;;  %4537 = vrcp.f32 %v3010_v42 }
 0x302   : > { %4539 = vrcp.f32 %v3011_v0 }
 0x303   : > { %4541 = vrcp.f32 %v3012_v30 }
 0x30a   : > { %v4536_v9 = vpop.eup %4535 }
 0x30b   : > { %v4538_v4 = vpop.eup %4537  ;;  %v3025_v34 = vmul.f32 %v4536_v9, %v3001_v11 }
 0x30c   : > { %v4540_v45 = vpop.eup %4539  ;;  %v3026_v39 = vmul.f32 %v4538_v4, %v3002_v62 }
 0x30d   : > { %v4542_v24 = vpop.eup %4541  ;;  %v3027_v35 = vmul.f32 %v4540_v45, %v3003_v20  ;;  %v3033_v32 = vmul.f32 %v3025_v34, %v2961_v12 }
 0x30e   : > { %v3028_v23 = vmul.f32 %v4542_v24, %v3004_v26  ;;  %v3034_v49 = vmul.f32 %v3026_v39, %v2962_v3 }
 0x30f   : > { %v3035_v21 = vmul.f32 %v3027_v35, %v2963_v36  ;;  %3041 = vst [vmem:[%s7296_s27] sm:$0xff] %v3033_v32 }
 0x310   : > { %v3036_v56 = vmul.f32 %v3028_v23, %v2964_v33  ;;  %3042 = vst [vmem:[%s7296_s27 + $0x8] sm:$0xff] %v3034_v49 }
 0x311   : > { %3043 = vst [vmem:[%s7296_s27 + $0x10] sm:$0xff] %v3035_v21 }
 0x312   : > { %3044 = vst [vmem:[%s7296_s27 + $0x18] sm:$0xff] %v3036_v56 }
 0x32b   : > { %v2839_v29 = vpop.f32.mrb[6].mxu0 }
 0x32c   : > { %v2927_v7 = vrot.slane %v2839_v29, 4  ;;  %v2841_v18 = vpop.f32.mrb[7].mxu0 }
 0x32d   : > { %v2928_v40 = vrot.slane %v2841_v18, 4  ;;  %v2910_v48 = vpop.f32.mrb[6].mxu1 }
 0x32e   : > { %2943 = vst [vmem:[#allocation3 + $0x20] sm:$0xf0] %v2927_v7  ;;  %v2929_v5 = vrot.slane %v2910_v48, 4  ;;  %v2912_v58 = vpop.f32.mrb[7].mxu1 }
 0x32f   : > { %2944 = vst [vmem:[#allocation3 + $0x28] sm:$0xf0] %v2928_v40  ;;  %v2930_v31 = vrot.slane %v2912_v58, 4 }
 0x330   : > { %2945 = vst [vmem:[#allocation3 + $0x30] sm:$0xf0] %v2929_v5 }
 0x331   : > { %2946 = vst [vmem:[#allocation3 + $0x38] sm:$0xf0] %v2930_v31 }
 0x335   : > { %v2951_v25 = vld [vmem:[#allocation3 + $0x20] sm:$0xff] }
 0x336   : > { %v2965_v22 = vadd.f32 %v7285_v16, %v2951_v25  ;;  %v2952_v38 = vld [vmem:[#allocation3 + $0x28] sm:$0xff] }
 0x337   : > { %v2966_v61 = vadd.f32 %v7285_v16, %v2952_v38  ;;  %v2953_v17 = vld [vmem:[#allocation3 + $0x30] sm:$0xff] }
 0x338   : > { %v2973_v15 = vmin.f32 %v2965_v22, 20.0  ;;  %v2967_v50 = vadd.f32 %v7285_v16, %v2953_v17  ;;  %v2954_v57 = vld [vmem:[#allocation3 + $0x38] sm:$0xff] }
 0x339   : > { %v2974_v53 = vmin.f32 %v2966_v61, 20.0  ;;  %v2968_v59 = vadd.f32 %v7285_v16, %v2954_v57 }
 0x33a   : > { %v2985_v44 = vmul.f32 1.442695, %v2973_v15  ;;  %v2975_v52 = vmin.f32 %v2967_v50, 20.0 }
 0x33b   : > { %v2987_v19 = vmul.f32 1.442695, %v2974_v53  ;;  %v2976_v51 = vmin.f32 %v2968_v59, 20.0 }
 0x33c   : > { %4543 = vpow2.f32 %v2985_v44  ;;  %v2989_v12 = vmul.f32 1.442695, %v2975_v52 }
 0x33d   : > { %4545 = vpow2.f32 %v2987_v19  ;;  %v2991_v28 = vmul.f32 1.442695, %v2976_v51 }
 0x33e   : > { %4547 = vpow2.f32 %v2989_v12 }
 0x33f   : > { %4549 = vpow2.f32 %v2991_v28 }
 0x346   : > { %v4544_v3 = vpop.eup %4543 }
 0x347   : > { %v4546_v36 = vpop.eup %4545  ;;  %v2997_v33 = vadd.f32 2.0, %v4544_v3 }
 0x348   : > { %v4548_v46 = vpop.eup %4547  ;;  %v2998_v27 = vadd.f32 2.0, %v4546_v36 }
 0x349   : > { %v4550_v41 = vpop.eup %4549  ;;  %v3005_v63 = vmul.f32 %v4544_v3, %v2997_v33  ;;  %v2999_v47 = vadd.f32 2.0, %v4548_v46 }
 0x34a   : > { %v3006_v37 = vmul.f32 %v4546_v36, %v2998_v27  ;;  %v3000_v16 = vadd.f32 2.0, %v4550_v41 }
 0x34b   : > { %v3013_v10 = vadd.f32 2.0, %v3005_v63  ;;  %v3007_v14 = vmul.f32 %v4548_v46, %v2999_v47 }
 0x34c   : > { %v3014_v43 = vadd.f32 2.0, %v3006_v37  ;;  %v3008_v1 = vmul.f32 %v4550_v41, %v3000_v16 }
 0x34d   : > { %4551 = vrcp.f32 %v3013_v10  ;;  %v3015_v60 = vadd.f32 2.0, %v3007_v14 }
 0x34e   : > { %4553 = vrcp.f32 %v3014_v43  ;;  %v3016_v2 = vadd.f32 2.0, %v3008_v1 }
 0x34f   : > { %4555 = vrcp.f32 %v3015_v60 }
 0x350   : > { %4557 = vrcp.f32 %v3016_v2 }
 0x357   : > { %v4552_v6 = vpop.eup %4551 }
 0x358   : > { %v4554_v8 = vpop.eup %4553  ;;  %v3029_v55 = vmul.f32 %v4552_v6, %v3005_v63 }
 0x359   : > { %v4556_v11 = vpop.eup %4555  ;;  %v3030_v54 = vmul.f32 %v4554_v8, %v3006_v37 }
 0x35a   : > { %v4558_v62 = vpop.eup %4557  ;;  %v3037_v20 = vmul.f32 %v3029_v55, %v2965_v22  ;;  %v3031_v13 = vmul.f32 %v4556_v11, %v3007_v14 }
 0x35b   : > { %v3038_v26 = vmul.f32 %v3030_v54, %v2966_v61  ;;  %v3032_v42 = vmul.f32 %v4558_v62, %v3008_v1 }
 0x35c   : > { %3045 = vst [vmem:[%s7296_s27 + $0x20] sm:$0xff] %v3037_v20  ;;  %v3039_v0 = vmul.f32 %v3031_v13, %v2967_v50 }
 0x35d   : > { %3046 = vst [vmem:[%s7296_s27 + $0x28] sm:$0xff] %v3038_v26  ;;  %v3040_v30 = vmul.f32 %v3032_v42, %v2968_v59 }
 0x35e   : > { %3047 = vst [vmem:[%s7296_s27 + $0x30] sm:$0xff] %v3039_v0 }
 0x35f   : > { %3048 = vst [vmem:[%s7296_s27 + $0x38] sm:$0xff] %v3040_v30 }
 0x360 PF: > { %s13_s12 = sadd.s32 1, %s4583_s12  }
 0x361   : > { %p10_p5 = scmp.ge.s32.totalorder %s13_s12, 4  }
 0x363   :  { %12 = sbr.rel (!%p10_p5) target bundleno = 1 (0x1), region = 63 }

</bundles_post_ra>
